<compile_context>
chip_gen: v7x
topology: tpu7x:2x2x1
jax: 0.10.0
libtpu: 0.0.40
codegen_flags: <defaults>
</compile_context>

<pallas_src>
import functools
import math

import jax
import jax.numpy as jnp
from jax.experimental import pallas as pl
from jax.experimental.pallas import tpu as pltpu

EPS = 1e-6


# ----------------------------- helpers -----------------------------

def _vmem_limit_bytes():
    """Generation-aware scoped-VMEM limit (v7x has 64 MiB physical VMEM)."""
    try:
        info = pltpu.get_tpu_info()
        cap = int(getattr(info, "vmem_capacity_bytes", 128 * 1024 * 1024))
    except Exception:
        cap = 64 * 1024 * 1024
    return min(96 * 1024 * 1024, max(32 * 1024 * 1024, (cap * 3) // 4))


# ----------------------------- fused stage kernel -----------------------------

def _stage_kernel(x_ref, p1_ref, p2_ref, p3_ref, p4_ref,
                  dww_ref, dwb_ref, g_ref, be_ref,
                  w1_ref, b1_ref, w2_ref, b2_ref, gm_ref,
                  o_ref, xpad_ref, h_ref, *, B, L, prologue):
    """One ConvNeXt stage.

    grid = (num_blocks,).  Per-block weights arrive as (1, ...) blocks streamed
    along the grid axis; the activation lives in the persistent VMEM scratch
    `xpad_ref` of shape (B, L+6, C) whose 3-row halos stay zero (k=7 dwconv
    padding).  `h_ref` is a (B*L, C) staging buffer so batch is folded into the
    matmul M dimension.
    """
    k = pl.program_id(0)
    nb = pl.num_programs(0)

    # ---------------- prologue (grid step 0 only) ----------------
    @pl.when(k == 0)
    def _init():
        xpad_ref[...] = jnp.zeros_like(xpad_ref)
        if prologue == "stem":
            # Conv1d(k=3, s=3) expressed as a patch matmul, then channels_first LN.
            h0 = (jnp.dot(x_ref[...].astype(jnp.bfloat16), p1_ref[...],
                          preferred_element_type=jnp.float32) + p2_ref[...])
            u = jnp.mean(h0, axis=-1, keepdims=True)
            v = jnp.mean(jnp.square(h0 - u), axis=-1, keepdims=True)
            h0 = (h0 - u) * jax.lax.rsqrt(v + EPS) * p3_ref[...] + p4_ref[...]
        else:
            # channels_first LayerNorm then 1x1 Conv1d (a matmul over channels).
            xin = x_ref[...]
            u = jnp.mean(xin, axis=-1, keepdims=True)
            v = jnp.mean(jnp.square(xin - u), axis=-1, keepdims=True)
            xn = (xin - u) * jax.lax.rsqrt(v + EPS) * p1_ref[...] + p2_ref[...]
            h0 = (jnp.dot(xn.astype(jnp.bfloat16), p3_ref[...],
                          preferred_element_type=jnp.float32) + p4_ref[...])
        for bi in range(B):
            xpad_ref[bi, pl.ds(3, L), :] = h0[bi * L:(bi + 1) * L, :]

    # ---------------- ConvNeXt block k ----------------
    # depthwise Conv1d(k=7, pad=3, groups=C): 7 shifted VPU MACs over the
    # whole (B, L, C) slab (halos are zero => implicit padding).
    dww = dww_ref[0]                                   # (7, C)
    dwb = dwb_ref[0]                                   # (1, C)
    xp = xpad_ref[...]                                 # (B, L+6, C) incl. halos
    acc = xp[:, 0:L, :] * dww[0:1, :] + dwb            # tap 0 initializes acc
    for t in range(1, 7):
        acc = acc + xp[:, t:t + L, :] * dww[t:t + 1, :]
    for bi in range(B):                                # fold batch into M rows
        h_ref[pl.ds(bi * L, L), :] = acc[bi]

    h = h_ref[...]                                     # (B*L, C)

    # LayerNorm (channels_last, eps=1e-6)
    u = jnp.mean(h, axis=-1, keepdims=True)
    v = jnp.mean(jnp.square(h - u), axis=-1, keepdims=True)
    hn = (h - u) * jax.lax.rsqrt(v + EPS) * g_ref[0] + be_ref[0]

    # pwconv1 -> exact-erf GELU -> pwconv2 -> layer scale (bf16 weights, f32 acc)
    a = (jnp.dot(hn.astype(jnp.bfloat16), w1_ref[0],
                 preferred_element_type=jnp.float32) + b1_ref[0])
    a = 0.5 * a * (1.0 + jax.lax.erf(a * (1.0 / math.sqrt(2.0))))
    y = (jnp.dot(a.astype(jnp.bfloat16), w2_ref[0],
                 preferred_element_type=jnp.float32) + b2_ref[0])
    y = y * gm_ref[0]

    # residual add; updated activation stays resident in the padded scratch
    for bi in range(B):
        res = xpad_ref[bi, pl.ds(3, L), :]
        xpad_ref[bi, pl.ds(3, L), :] = res + y[bi * L:(bi + 1) * L, :]

    # write the stage output back to HBM only after the last block
    @pl.when(k == nb - 1)
    def _fin():
        for bi in range(B):
            o_ref[pl.ds(bi * L, L), :] = xpad_ref[bi, pl.ds(3, L), :]


# --------------------------- pallas_call wrapper ---------------------------

@functools.lru_cache(maxsize=None)
def _make_stage_call(B, L, cin, C, nb, prologue):
    M = B * L
    full2 = lambda k: (0, 0)          # whole-array block, resident across grid
    blk3 = lambda k: (k, 0, 0)        # streamed per-block weight slab

    if prologue == "stem":
        # p1=w (cin,C), p2=b, p3=LN weight, p4=LN bias
        pro_specs = [pl.BlockSpec((cin, C), full2),
                     pl.BlockSpec((1, C), full2),
                     pl.BlockSpec((1, C), full2),
                     pl.BlockSpec((1, C), full2)]
    else:
        # p1=LN weight (1,cin), p2=LN bias, p3=w (cin,C), p4=b
        pro_specs = [pl.BlockSpec((1, cin), full2),
                     pl.BlockSpec((1, cin), full2),
                     pl.BlockSpec((cin, C), full2),
                     pl.BlockSpec((1, C), full2)]

    in_specs = ([pl.BlockSpec((M, cin), full2)] + pro_specs + [
        pl.BlockSpec((1, 7, C), blk3),        # dwconv weight
        pl.BlockSpec((1, 1, C), blk3),        # dwconv bias
        pl.BlockSpec((1, 1, C), blk3),        # LN weight
        pl.BlockSpec((1, 1, C), blk3),        # LN bias
        pl.BlockSpec((1, C, 4 * C), blk3),    # pwconv1 weight (bf16)
        pl.BlockSpec((1, 1, 4 * C), blk3),    # pwconv1 bias
        pl.BlockSpec((1, 4 * C, C), blk3),    # pwconv2 weight (bf16)
        pl.BlockSpec((1, 1, C), blk3),        # pwconv2 bias
        pl.BlockSpec((1, 1, C), blk3),        # layer-scale gamma
    ])

    kern = functools.partial(_stage_kernel, B=B, L=L, prologue=prologue)
    return jax.jit(pl.pallas_call(
        kern,
        grid=(nb,),
        in_specs=in_specs,
        out_specs=pl.BlockSpec((M, C), full2),
        out_shape=jax.ShapeDtypeStruct((M, C), jnp.float32),
        scratch_shapes=[
            pltpu.VMEM((B, L + 6, C), jnp.float32),   # zero-haloed activation
            pltpu.VMEM((M, C), jnp.float32),          # batch-folded staging
        ],
        compiler_params=pltpu.CompilerParams(
            dimension_semantics=("arbitrary",),       # blocks are sequential
            vmem_limit_bytes=_vmem_limit_bytes(),
        ),
    ))


# ------------------------------- parameters -------------------------------

def init_params(key, in_chans, dims, depths, layer_scale_init_value=1.0):
    """Synthetic init mirroring ConvNeXt.__init__ shapes.
    Conv1d/Linear weights ~ N(0, 0.02^2) (stored bf16 for matmul weights),
    biases 0, LN weights 1 / biases 0, layer-scale gamma = init value."""
    keys = iter(jax.random.split(key, 512))
    nk = lambda: next(keys)
    std = 0.02
    wdt = jnp.bfloat16
    params = {}

    # stem: Conv1d(in_chans, dims[0], k=3, s=3) + LayerNorm(channels_first)
    c0 = dims[0]
    w = jax.random.normal(nk(), (c0, in_chans, 3), jnp.float32) * std  # torch (out,in,k)
    params["stem"] = dict(
        w=jnp.transpose(w, (1, 2, 0)).reshape(in_chans * 3, c0).astype(wdt),
        b=jnp.zeros((1, c0), jnp.float32),
        g=jnp.ones((1, c0), jnp.float32),
        beta=jnp.zeros((1, c0), jnp.float32),
    )

    # downsample layers 1..3: LayerNorm(channels_first) + Conv1d(k=1)
    params["down"] = []
    for i in range(3):
        w = jax.random.normal(nk(), (dims[i + 1], dims[i], 1), jnp.float32) * std
        params["down"].append(dict(
            g=jnp.ones((1, dims[i]), jnp.float32),
            beta=jnp.zeros((1, dims[i]), jnp.float32),
            w=jnp.transpose(w[:, :, 0], (1, 0)).astype(wdt),
            b=jnp.zeros((1, dims[i + 1]), jnp.float32),
        ))

    # stages: per-block weights stacked along a leading "block" axis
    params["stages"] = []
    for i in range(4):
        dim = dims[i]
        nb = depths[i]
        dww, w1, w2 = [], [], []
        for _ in range(nb):
            dw_t = jax.random.normal(nk(), (dim, 1, 7), jnp.float32) * std  # torch dwconv
            w1_t = jax.random.normal(nk(), (4 * dim, dim), jnp.float32) * std
            w2_t = jax.random.normal(nk(), (dim, 4 * dim), jnp.float32) * std
            dww.append(jnp.transpose(dw_t[:, 0, :], (1, 0)))                # (7, dim)
            w1.append(jnp.transpose(w1_t, (1, 0)))                           # (dim, 4dim)
            w2.append(jnp.transpose(w2_t, (1, 0)))                           # (4dim, dim)
        params["stages"].append(dict(
            dww=jnp.stack(dww, 0),                                           # (nb,7,dim) f32
            dwb=jnp.zeros((nb, 1, dim), jnp.float32),
            g=jnp.ones((nb, 1, dim), jnp.float32),
            beta=jnp.zeros((nb, 1, dim), jnp.float32),
            w1=jnp.stack(w1, 0).astype(wdt),                                 # bf16
            b1=jnp.zeros((nb, 1, 4 * dim), jnp.float32),
            w2=jnp.stack(w2, 0).astype(wdt),                                 # bf16
            b2=jnp.zeros((nb, 1, dim), jnp.float32),
            gamma=jnp.full((nb, 1, dim), layer_scale_init_value, jnp.float32),
        ))
    return params


# --------------------------------- forward ---------------------------------

def convnext_forward(params, input_tensor, dims, depths):
    """input_tensor: (B, T, N, D) float32.  Returns (x, mask, None) like the
    PyTorch module: x (B, dims[-1], root_t, root_t), mask (B, root_t, root_t)."""
    b, t, n, d = input_tensor.shape
    cin = t * n
    x = input_tensor.reshape(b, cin, d)                  # 'b t n d -> b (t n) d'

    # stem patch extraction (stride-3 / k=3 conv -> non-overlapping patches);
    # one tiny host-side transpose, the matmul itself runs inside stage 0.
    L = (d - 3) // 3 + 1
    patches = x[:, :, :L * 3].reshape(b, cin, L, 3)
    patches = jnp.transpose(patches, (0, 2, 1, 3)).reshape(b * L, cin * 3)

    act = patches                                        # (B*L, cin*3)
    for i in range(4):
        sp = params["stages"][i]
        if i == 0:
            pro = params["stem"]
            p1, p2, p3, p4 = pro["w"], pro["b"], pro["g"], pro["beta"]
            cin_i, prologue = cin * 3, "stem"
        else:
            pro = params["down"][i - 1]
            p1, p2, p3, p4 = pro["g"], pro["beta"], pro["w"], pro["b"]
            cin_i, prologue = dims[i - 1], "down"
        call = _make_stage_call(b, L, cin_i, dims[i], depths[i], prologue)
        act = call(act, p1, p2, p3, p4,
                   sp["dww"], sp["dwb"], sp["g"], sp["beta"],
                   sp["w1"], sp["b1"], sp["w2"], sp["b2"], sp["gamma"])
        # drop_block: identity at inference (drop_prob starts at 0 / not training)

    C = dims[-1]
    rt = int(round(L ** 0.5))
    assert rt * rt == L, "final sequence length must be a perfect square"
    xo = jnp.transpose(act.reshape(b, L, C), (0, 2, 1)).reshape(b, C, rt, rt)
    mask = jnp.zeros((b, rt, rt), dtype=jnp.bool_)
    return xo, mask, None


# ----------------------------------- main -----------------------------------

if __name__ == "__main__":
    # ConvNeXt default hyper-parameters from __init__
    stack_num, frame_skip, num_txrx = 16, 4, 8
    depths = (3, 3, 18, 3)
    dims = [96, 192, 384, 768]
    in_chans = num_txrx * num_txrx * (stack_num // frame_skip)   # 256
    if stack_num // frame_skip > 1:
        dims[0] = 192                                            # same override as the module
    dims = tuple(dims)

    key = jax.random.PRNGKey(0)
    kp, kx = jax.random.split(key)
    params = init_params(kp, in_chans, dims, depths, layer_scale_init_value=1.0)

    # Small input: B=2, T=4, N=64 (T*N = in_chans = 256), sequence length D=48
    # -> stem (stride 3) gives L=16, a perfect square so the final rearrange works.
    B, D = 2, 48
    T = stack_num // frame_skip
    N = num_txrx * num_txrx
    x = jax.random.normal(kx, (B, T, N, D), jnp.float32)

    out, mask, vc = convnext_forward(params, x, dims, depths)
    jax.block_until_ready(out)
    jax.block_until_ready(mask)

    assert out.shape == (B, dims[-1], 4, 4) and out.dtype == jnp.float32
    assert mask.shape == (B, 4, 4) and mask.dtype == jnp.bool_
    assert vc is None
    print("KERNEL_OK")
</pallas_src>

<mosaic_0001>
module attributes {stable_mosaic.version = 11 : i64} {
  func.func @_stage_kernel(%arg0: i32, %arg1: memref<32x768xf32, #tpu.memory_space<vmem>>, %arg2: memref<768x192xbf16, #tpu.memory_space<vmem>>, %arg3: memref<1x192xf32, #tpu.memory_space<vmem>>, %arg4: memref<1x192xf32, #tpu.memory_space<vmem>>, %arg5: memref<1x192xf32, #tpu.memory_space<vmem>>, %arg6: memref<1x7x192xf32, #tpu.memory_space<vmem>>, %arg7: memref<1x1x192xf32, #tpu.memory_space<vmem>>, %arg8: memref<1x1x192xf32, #tpu.memory_space<vmem>>, %arg9: memref<1x1x192xf32, #tpu.memory_space<vmem>>, %arg10: memref<1x192x768xbf16, #tpu.memory_space<vmem>>, %arg11: memref<1x1x768xf32, #tpu.memory_space<vmem>>, %arg12: memref<1x768x192xbf16, #tpu.memory_space<vmem>>, %arg13: memref<1x1x192xf32, #tpu.memory_space<vmem>>, %arg14: memref<1x1x192xf32, #tpu.memory_space<vmem>>, %arg15: memref<32x192xf32, #tpu.memory_space<vmem>>, %arg16: memref<2x22x192xf32, #tpu.memory_space<vmem>>, %arg17: memref<32x192xf32, #tpu.memory_space<vmem>>) attributes {dimension_semantics = [#tpu.dimension_semantics<arbitrary>], iteration_bounds = array<i64: 3>, scalar_prefetch = 0 : i64, scratch_operands = 2 : i64, tpu.core_type = #tpu.core_type<tc>, window_params = [{pipeline_mode = #tpu.pipeline_mode<synchronous>, transform_indices = @transform_0, window_bounds = array<i64: 32, 768>}, {pipeline_mode = #tpu.pipeline_mode<synchronous>, transform_indices = @transform_1, window_bounds = array<i64: 768, 192>}, {pipeline_mode = #tpu.pipeline_mode<synchronous>, transform_indices = @transform_2, window_bounds = array<i64: 1, 192>}, {pipeline_mode = #tpu.pipeline_mode<synchronous>, transform_indices = @transform_3, window_bounds = array<i64: 1, 192>}, {pipeline_mode = #tpu.pipeline_mode<synchronous>, transform_indices = @transform_4, window_bounds = array<i64: 1, 192>}, {transform_indices = @transform_5, window_bounds = array<i64: 1, 7, 192>}, {transform_indices = @transform_6, window_bounds = array<i64: 1, 1, 192>}, {transform_indices = @transform_7, window_bounds = array<i64: 1, 1, 192>}, {transform_indices = @transform_8, window_bounds = array<i64: 1, 1, 192>}, {transform_indices = @transform_9, window_bounds = array<i64: 1, 192, 768>}, {transform_indices = @transform_10, window_bounds = array<i64: 1, 1, 768>}, {transform_indices = @transform_11, window_bounds = array<i64: 1, 768, 192>}, {transform_indices = @transform_12, window_bounds = array<i64: 1, 1, 192>}, {transform_indices = @transform_13, window_bounds = array<i64: 1, 1, 192>}, {pipeline_mode = #tpu.pipeline_mode<synchronous>, transform_indices = @transform_14, window_bounds = array<i64: 32, 192>}]} {
    %c0_i32 = arith.constant 0 : i32
    %0 = arith.cmpi eq, %arg0, %c0_i32 : i32
    %1 = arith.extui %0 : i1 to i32
    %c0_i32_0 = arith.constant 0 : i32
    %2 = arith.cmpi ne, %1, %c0_i32_0 : i32
    scf.if %2 {
      %cst_55 = arith.constant 0.000000e+00 : f32
      %130 = vector.broadcast %cst_55 : f32 to vector<2x22x192xf32>
      %c0_56 = arith.constant 0 : index
      %c0_57 = arith.constant 0 : index
      %c0_58 = arith.constant 0 : index
      %131 = vector.load %arg16[%c0_56, %c0_57, %c0_58] : memref<2x22x192xf32, #tpu.memory_space<vmem>>, vector<2x22x192xf32>
      tpu.vector_store %arg16[%c0_56, %c0_57, %c0_58], %130 {strides = array<i32>} : memref<2x22x192xf32, #tpu.memory_space<vmem>>, vector<2x22x192xf32>,
      %c0_59 = arith.constant 0 : index
      %c0_60 = arith.constant 0 : index
      %132 = vector.load %arg1[%c0_59, %c0_60] : memref<32x768xf32, #tpu.memory_space<vmem>>, vector<32x768xf32>
      %133 = arith.truncf %132 : vector<32x768xf32> to vector<32x768xbf16>
      %c0_61 = arith.constant 0 : index
      %c0_62 = arith.constant 0 : index
      %134 = vector.load %arg2[%c0_61, %c0_62] : memref<768x192xbf16, #tpu.memory_space<vmem>>, vector<768x192xbf16>
      %cst_63 = arith.constant dense<0.000000e+00> : vector<32x192xf32>
      %135 = tpu.matmul %133, %134, %cst_63 {dimension_numbers = #tpu.dot_dimension_numbers<[1], [0], [0], [1], [0, 0, 1, 1], [], []>} : vector<32x768xbf16>, vector<768x192xbf16>, vector<32x192xf32> -> vector<32x192xf32>
      %c0_64 = arith.constant 0 : index
      %c0_65 = arith.constant 0 : index
      %136 = vector.load %arg3[%c0_64, %c0_65] : memref<1x192xf32, #tpu.memory_space<vmem>>, vector<1x192xf32>
      %137 = vector.broadcast %136 : vector<1x192xf32> to vector<32x192xf32>
      %138 = arith.addf %135, %137 : vector<32x192xf32>
      %cst_66 = arith.constant dense<0.000000e+00> : vector<32xf32>
      %139 = vector.multi_reduction <add>, %138, %cst_66 [1] : vector<32x192xf32> to vector<32xf32>
      %140 = vector.shape_cast %139 : vector<32xf32> to vector<32x1xf32>
      %cst_67 = arith.constant 1.920000e+02 : f32
      %141 = vector.broadcast %cst_67 : f32 to vector<32x1xf32>
      %142 = arith.divf %140, %141 : vector<32x1xf32>
      %143 = vector.broadcast %142 : vector<32x1xf32> to vector<32x192xf32>
      %144 = arith.subf %138, %143 : vector<32x192xf32>
      %145 = arith.mulf %144, %144 : vector<32x192xf32>
      %cst_68 = arith.constant dense<0.000000e+00> : vector<32xf32>
      %146 = vector.multi_reduction <add>, %145, %cst_68 [1] : vector<32x192xf32> to vector<32xf32>
      %147 = vector.shape_cast %146 : vector<32xf32> to vector<32x1xf32>
      %cst_69 = arith.constant 1.920000e+02 : f32
      %148 = vector.broadcast %cst_69 : f32 to vector<32x1xf32>
      %149 = arith.divf %147, %148 : vector<32x1xf32>
      %150 = vector.broadcast %142 : vector<32x1xf32> to vector<32x192xf32>
      %151 = arith.subf %138, %150 : vector<32x192xf32>
      %cst_70 = arith.constant 9.99999997E-7 : f32
      %152 = vector.broadcast %cst_70 : f32 to vector<32x1xf32>
      %153 = arith.addf %149, %152 : vector<32x1xf32>
      %154 = math.rsqrt %153 : vector<32x1xf32>
      %155 = vector.broadcast %154 : vector<32x1xf32> to vector<32x192xf32>
      %156 = arith.mulf %151, %155 : vector<32x192xf32>
      %c0_71 = arith.constant 0 : index
      %c0_72 = arith.constant 0 : index
      %157 = vector.load %arg4[%c0_71, %c0_72] : memref<1x192xf32, #tpu.memory_space<vmem>>, vector<1x192xf32>
      %158 = vector.broadcast %157 : vector<1x192xf32> to vector<32x192xf32>
      %159 = arith.mulf %156, %158 : vector<32x192xf32>
      %c0_73 = arith.constant 0 : index
      %c0_74 = arith.constant 0 : index
      %160 = vector.load %arg5[%c0_73, %c0_74] : memref<1x192xf32, #tpu.memory_space<vmem>>, vector<1x192xf32>
      %161 = vector.broadcast %160 : vector<1x192xf32> to vector<32x192xf32>
      %162 = arith.addf %159, %161 : vector<32x192xf32>
      %163 = vector.extract_strided_slice %162 {offsets = [0, 0], sizes = [16, 192], strides = [1, 1]} : vector<32x192xf32> to vector<16x192xf32>
      %c0_75 = arith.constant 0 : index
      %c3_76 = arith.constant 3 : index
      %c0_77 = arith.constant 0 : index
      %164 = vector.load %arg16[%c0_75, %c3_76, %c0_77] : memref<2x22x192xf32, #tpu.memory_space<vmem>>, vector<1x16x192xf32>
      %165 = vector.shape_cast %164 : vector<1x16x192xf32> to vector<16x192xf32>
      %166 = vector.shape_cast %163 : vector<16x192xf32> to vector<1x16x192xf32>
      tpu.vector_store %arg16[%c0_75, %c3_76, %c0_77], %166 {strides = array<i32>} : memref<2x22x192xf32, #tpu.memory_space<vmem>>, vector<1x16x192xf32>,
      %167 = vector.extract_strided_slice %162 {offsets = [16, 0], sizes = [16, 192], strides = [1, 1]} : vector<32x192xf32> to vector<16x192xf32>
      %c1_78 = arith.constant 1 : index
      %c3_79 = arith.constant 3 : index
      %c0_80 = arith.constant 0 : index
      %168 = vector.load %arg16[%c1_78, %c3_79, %c0_80] : memref<2x22x192xf32, #tpu.memory_space<vmem>>, vector<1x16x192xf32>
      %169 = vector.shape_cast %168 : vector<1x16x192xf32> to vector<16x192xf32>
      %170 = vector.shape_cast %167 : vector<16x192xf32> to vector<1x16x192xf32>
      tpu.vector_store %arg16[%c1_78, %c3_79, %c0_80], %170 {strides = array<i32>} : memref<2x22x192xf32, #tpu.memory_space<vmem>>, vector<1x16x192xf32>,
    } else {
    }
    %c0 = arith.constant 0 : index
    %c0_1 = arith.constant 0 : index
    %c0_2 = arith.constant 0 : index
    %3 = vector.load %arg6[%c0, %c0_1, %c0_2] : memref<1x7x192xf32, #tpu.memory_space<vmem>>, vector<1x7x192xf32>
    %4 = vector.shape_cast %3 : vector<1x7x192xf32> to vector<7x192xf32>
    %c0_3 = arith.constant 0 : index
    %c0_4 = arith.constant 0 : index
    %c0_5 = arith.constant 0 : index
    %5 = vector.load %arg7[%c0_3, %c0_4, %c0_5] : memref<1x1x192xf32, #tpu.memory_space<vmem>>, vector<1x1x192xf32>
    %6 = vector.shape_cast %5 : vector<1x1x192xf32> to vector<1x192xf32>
    %c0_6 = arith.constant 0 : index
    %c0_7 = arith.constant 0 : index
    %c0_8 = arith.constant 0 : index
    %7 = vector.load %arg16[%c0_6, %c0_7, %c0_8] : memref<2x22x192xf32, #tpu.memory_space<vmem>>, vector<2x22x192xf32>
    %8 = vector.extract_strided_slice %7 {offsets = [0, 0, 0], sizes = [2, 16, 192], strides = [1, 1, 1]} : vector<2x22x192xf32> to vector<2x16x192xf32>
    %9 = vector.extract_strided_slice %4 {offsets = [0, 0], sizes = [1, 192], strides = [1, 1]} : vector<7x192xf32> to vector<1x192xf32>
    %10 = vector.shape_cast %9 : vector<1x192xf32> to vector<1x1x192xf32>
    %11 = vector.broadcast %10 : vector<1x1x192xf32> to vector<2x16x192xf32>
    %12 = arith.mulf %8, %11 : vector<2x16x192xf32>
    %13 = vector.shape_cast %6 : vector<1x192xf32> to vector<1x1x192xf32>
    %14 = vector.broadcast %13 : vector<1x1x192xf32> to vector<2x16x192xf32>
    %15 = arith.addf %12, %14 : vector<2x16x192xf32>
    %16 = vector.extract_strided_slice %7 {offsets = [0, 1, 0], sizes = [2, 16, 192], strides = [1, 1, 1]} : vector<2x22x192xf32> to vector<2x16x192xf32>
    %17 = vector.extract_strided_slice %4 {offsets = [1, 0], sizes = [1, 192], strides = [1, 1]} : vector<7x192xf32> to vector<1x192xf32>
    %18 = vector.shape_cast %17 : vector<1x192xf32> to vector<1x1x192xf32>
    %19 = vector.broadcast %18 : vector<1x1x192xf32> to vector<2x16x192xf32>
    %20 = arith.mulf %16, %19 : vector<2x16x192xf32>
    %21 = arith.addf %15, %20 : vector<2x16x192xf32>
    %22 = vector.extract_strided_slice %7 {offsets = [0, 2, 0], sizes = [2, 16, 192], strides = [1, 1, 1]} : vector<2x22x192xf32> to vector<2x16x192xf32>
    %23 = vector.extract_strided_slice %4 {offsets = [2, 0], sizes = [1, 192], strides = [1, 1]} : vector<7x192xf32> to vector<1x192xf32>
    %24 = vector.shape_cast %23 : vector<1x192xf32> to vector<1x1x192xf32>
    %25 = vector.broadcast %24 : vector<1x1x192xf32> to vector<2x16x192xf32>
    %26 = arith.mulf %22, %25 : vector<2x16x192xf32>
    %27 = arith.addf %21, %26 : vector<2x16x192xf32>
    %28 = vector.extract_strided_slice %7 {offsets = [0, 3, 0], sizes = [2, 16, 192], strides = [1, 1, 1]} : vector<2x22x192xf32> to vector<2x16x192xf32>
    %29 = vector.extract_strided_slice %4 {offsets = [3, 0], sizes = [1, 192], strides = [1, 1]} : vector<7x192xf32> to vector<1x192xf32>
    %30 = vector.shape_cast %29 : vector<1x192xf32> to vector<1x1x192xf32>
    %31 = vector.broadcast %30 : vector<1x1x192xf32> to vector<2x16x192xf32>
    %32 = arith.mulf %28, %31 : vector<2x16x192xf32>
    %33 = arith.addf %27, %32 : vector<2x16x192xf32>
    %34 = vector.extract_strided_slice %7 {offsets = [0, 4, 0], sizes = [2, 16, 192], strides = [1, 1, 1]} : vector<2x22x192xf32> to vector<2x16x192xf32>
    %35 = vector.extract_strided_slice %4 {offsets = [4, 0], sizes = [1, 192], strides = [1, 1]} : vector<7x192xf32> to vector<1x192xf32>
    %36 = vector.shape_cast %35 : vector<1x192xf32> to vector<1x1x192xf32>
    %37 = vector.broadcast %36 : vector<1x1x192xf32> to vector<2x16x192xf32>
    %38 = arith.mulf %34, %37 : vector<2x16x192xf32>
    %39 = arith.addf %33, %38 : vector<2x16x192xf32>
    %40 = vector.extract_strided_slice %7 {offsets = [0, 5, 0], sizes = [2, 16, 192], strides = [1, 1, 1]} : vector<2x22x192xf32> to vector<2x16x192xf32>
    %41 = vector.extract_strided_slice %4 {offsets = [5, 0], sizes = [1, 192], strides = [1, 1]} : vector<7x192xf32> to vector<1x192xf32>
    %42 = vector.shape_cast %41 : vector<1x192xf32> to vector<1x1x192xf32>
    %43 = vector.broadcast %42 : vector<1x1x192xf32> to vector<2x16x192xf32>
    %44 = arith.mulf %40, %43 : vector<2x16x192xf32>
    %45 = arith.addf %39, %44 : vector<2x16x192xf32>
    %46 = vector.extract_strided_slice %7 {offsets = [0, 6, 0], sizes = [2, 16, 192], strides = [1, 1, 1]} : vector<2x22x192xf32> to vector<2x16x192xf32>
    %47 = vector.extract_strided_slice %4 {offsets = [6, 0], sizes = [1, 192], strides = [1, 1]} : vector<7x192xf32> to vector<1x192xf32>
    %48 = vector.shape_cast %47 : vector<1x192xf32> to vector<1x1x192xf32>
    %49 = vector.broadcast %48 : vector<1x1x192xf32> to vector<2x16x192xf32>
    %50 = arith.mulf %46, %49 : vector<2x16x192xf32>
    %51 = arith.addf %45, %50 : vector<2x16x192xf32>
    %52 = vector.extract_strided_slice %51 {offsets = [0, 0, 0], sizes = [1, 16, 192], strides = [1, 1, 1]} : vector<2x16x192xf32> to vector<1x16x192xf32>
    %53 = vector.shape_cast %52 : vector<1x16x192xf32> to vector<16x192xf32>
    %c0_9 = arith.constant 0 : index
    %c0_10 = arith.constant 0 : index
    %54 = vector.load %arg17[%c0_9, %c0_10] : memref<32x192xf32, #tpu.memory_space<vmem>>, vector<16x192xf32>
    tpu.vector_store %arg17[%c0_9, %c0_10], %53 {strides = array<i32>} : memref<32x192xf32, #tpu.memory_space<vmem>>, vector<16x192xf32>,
    %55 = vector.extract_strided_slice %51 {offsets = [1, 0, 0], sizes = [1, 16, 192], strides = [1, 1, 1]} : vector<2x16x192xf32> to vector<1x16x192xf32>
    %56 = vector.shape_cast %55 : vector<1x16x192xf32> to vector<16x192xf32>
    %c16 = arith.constant 16 : index
    %c0_11 = arith.constant 0 : index
    %57 = vector.load %arg17[%c16, %c0_11] : memref<32x192xf32, #tpu.memory_space<vmem>>, vector<16x192xf32>
    tpu.vector_store %arg17[%c16, %c0_11], %56 {strides = array<i32>} : memref<32x192xf32, #tpu.memory_space<vmem>>, vector<16x192xf32>,
    %c0_12 = arith.constant 0 : index
    %c0_13 = arith.constant 0 : index
    %58 = vector.load %arg17[%c0_12, %c0_13] : memref<32x192xf32, #tpu.memory_space<vmem>>, vector<32x192xf32>
    %cst = arith.constant dense<0.000000e+00> : vector<32xf32>
    %59 = vector.multi_reduction <add>, %58, %cst [1] : vector<32x192xf32> to vector<32xf32>
    %60 = vector.shape_cast %59 : vector<32xf32> to vector<32x1xf32>
    %cst_14 = arith.constant 1.920000e+02 : f32
    %61 = vector.broadcast %cst_14 : f32 to vector<32x1xf32>
    %62 = arith.divf %60, %61 : vector<32x1xf32>
    %63 = vector.broadcast %62 : vector<32x1xf32> to vector<32x192xf32>
    %64 = arith.subf %58, %63 : vector<32x192xf32>
    %65 = arith.mulf %64, %64 : vector<32x192xf32>
    %cst_15 = arith.constant dense<0.000000e+00> : vector<32xf32>
    %66 = vector.multi_reduction <add>, %65, %cst_15 [1] : vector<32x192xf32> to vector<32xf32>
    %67 = vector.shape_cast %66 : vector<32xf32> to vector<32x1xf32>
    %cst_16 = arith.constant 1.920000e+02 : f32
    %68 = vector.broadcast %cst_16 : f32 to vector<32x1xf32>
    %69 = arith.divf %67, %68 : vector<32x1xf32>
    %70 = vector.broadcast %62 : vector<32x1xf32> to vector<32x192xf32>
    %71 = arith.subf %58, %70 : vector<32x192xf32>
    %cst_17 = arith.constant 9.99999997E-7 : f32
    %72 = vector.broadcast %cst_17 : f32 to vector<32x1xf32>
    %73 = arith.addf %69, %72 : vector<32x1xf32>
    %74 = math.rsqrt %73 : vector<32x1xf32>
    %75 = vector.broadcast %74 : vector<32x1xf32> to vector<32x192xf32>
    %76 = arith.mulf %71, %75 : vector<32x192xf32>
    %c0_18 = arith.constant 0 : index
    %c0_19 = arith.constant 0 : index
    %c0_20 = arith.constant 0 : index
    %77 = vector.load %arg8[%c0_18, %c0_19, %c0_20] : memref<1x1x192xf32, #tpu.memory_space<vmem>>, vector<1x1x192xf32>
    %78 = vector.shape_cast %77 : vector<1x1x192xf32> to vector<1x192xf32>
    %79 = vector.broadcast %78 : vector<1x192xf32> to vector<32x192xf32>
    %80 = arith.mulf %76, %79 : vector<32x192xf32>
    %c0_21 = arith.constant 0 : index
    %c0_22 = arith.constant 0 : index
    %c0_23 = arith.constant 0 : index
    %81 = vector.load %arg9[%c0_21, %c0_22, %c0_23] : memref<1x1x192xf32, #tpu.memory_space<vmem>>, vector<1x1x192xf32>
    %82 = vector.shape_cast %81 : vector<1x1x192xf32> to vector<1x192xf32>
    %83 = vector.broadcast %82 : vector<1x192xf32> to vector<32x192xf32>
    %84 = arith.addf %80, %83 : vector<32x192xf32>
    %85 = arith.truncf %84 : vector<32x192xf32> to vector<32x192xbf16>
    %c0_24 = arith.constant 0 : index
    %c0_25 = arith.constant 0 : index
    %c0_26 = arith.constant 0 : index
    %86 = vector.load %arg10[%c0_24, %c0_25, %c0_26] : memref<1x192x768xbf16, #tpu.memory_space<vmem>>, vector<1x192x768xbf16>
    %87 = vector.shape_cast %86 : vector<1x192x768xbf16> to vector<192x768xbf16>
    %cst_27 = arith.constant dense<0.000000e+00> : vector<32x768xf32>
    %88 = tpu.matmul %85, %87, %cst_27 {dimension_numbers = #tpu.dot_dimension_numbers<[1], [0], [0], [1], [0, 0, 1, 1], [], []>} : vector<32x192xbf16>, vector<192x768xbf16>, vector<32x768xf32> -> vector<32x768xf32>
    %c0_28 = arith.constant 0 : index
    %c0_29 = arith.constant 0 : index
    %c0_30 = arith.constant 0 : index
    %89 = vector.load %arg11[%c0_28, %c0_29, %c0_30] : memref<1x1x768xf32, #tpu.memory_space<vmem>>, vector<1x1x768xf32>
    %90 = vector.shape_cast %89 : vector<1x1x768xf32> to vector<1x768xf32>
    %91 = vector.broadcast %90 : vector<1x768xf32> to vector<32x768xf32>
    %92 = arith.addf %88, %91 : vector<32x768xf32>
    %cst_31 = arith.constant 5.000000e-01 : f32
    %93 = vector.broadcast %cst_31 : f32 to vector<32x768xf32>
    %94 = arith.mulf %93, %92 : vector<32x768xf32>
    %cst_32 = arith.constant 0.707106769 : f32
    %95 = vector.broadcast %cst_32 : f32 to vector<32x768xf32>
    %96 = arith.mulf %92, %95 : vector<32x768xf32>
    %97 = math.erf %96 : vector<32x768xf32>
    %cst_33 = arith.constant 1.000000e+00 : f32
    %98 = vector.broadcast %cst_33 : f32 to vector<32x768xf32>
    %99 = arith.addf %98, %97 : vector<32x768xf32>
    %100 = arith.mulf %94, %99 : vector<32x768xf32>
    %101 = arith.truncf %100 : vector<32x768xf32> to vector<32x768xbf16>
    %c0_34 = arith.constant 0 : index
    %c0_35 = arith.constant 0 : index
    %c0_36 = arith.constant 0 : index
    %102 = vector.load %arg12[%c0_34, %c0_35, %c0_36] : memref<1x768x192xbf16, #tpu.memory_space<vmem>>, vector<1x768x192xbf16>
    %103 = vector.shape_cast %102 : vector<1x768x192xbf16> to vector<768x192xbf16>
    %cst_37 = arith.constant dense<0.000000e+00> : vector<32x192xf32>
    %104 = tpu.matmul %101, %103, %cst_37 {dimension_numbers = #tpu.dot_dimension_numbers<[1], [0], [0], [1], [0, 0, 1, 1], [], []>} : vector<32x768xbf16>, vector<768x192xbf16>, vector<32x192xf32> -> vector<32x192xf32>
    %c0_38 = arith.constant 0 : index
    %c0_39 = arith.constant 0 : index
    %c0_40 = arith.constant 0 : index
    %105 = vector.load %arg13[%c0_38, %c0_39, %c0_40] : memref<1x1x192xf32, #tpu.memory_space<vmem>>, vector<1x1x192xf32>
    %106 = vector.shape_cast %105 : vector<1x1x192xf32> to vector<1x192xf32>
    %107 = vector.broadcast %106 : vector<1x192xf32> to vector<32x192xf32>
    %108 = arith.addf %104, %107 : vector<32x192xf32>
    %c0_41 = arith.constant 0 : index
    %c0_42 = arith.constant 0 : index
    %c0_43 = arith.constant 0 : index
    %109 = vector.load %arg14[%c0_41, %c0_42, %c0_43] : memref<1x1x192xf32, #tpu.memory_space<vmem>>, vector<1x1x192xf32>
    %110 = vector.shape_cast %109 : vector<1x1x192xf32> to vector<1x192xf32>
    %111 = vector.broadcast %110 : vector<1x192xf32> to vector<32x192xf32>
    %112 = arith.mulf %108, %111 : vector<32x192xf32>
    %c0_44 = arith.constant 0 : index
    %c3 = arith.constant 3 : index
    %c0_45 = arith.constant 0 : index
    %113 = vector.load %arg16[%c0_44, %c3, %c0_45] : memref<2x22x192xf32, #tpu.memory_space<vmem>>, vector<1x16x192xf32>
    %114 = vector.shape_cast %113 : vector<1x16x192xf32> to vector<16x192xf32>
    %115 = vector.extract_strided_slice %112 {offsets = [0, 0], sizes = [16, 192], strides = [1, 1]} : vector<32x192xf32> to vector<16x192xf32>
    %116 = arith.addf %114, %115 : vector<16x192xf32>
    %c0_46 = arith.constant 0 : index
    %c3_47 = arith.constant 3 : index
    %c0_48 = arith.constant 0 : index
    %117 = vector.load %arg16[%c0_46, %c3_47, %c0_48] : memref<2x22x192xf32, #tpu.memory_space<vmem>>, vector<1x16x192xf32>
    %118 = vector.shape_cast %117 : vector<1x16x192xf32> to vector<16x192xf32>
    %119 = vector.shape_cast %116 : vector<16x192xf32> to vector<1x16x192xf32>
    tpu.vector_store %arg16[%c0_46, %c3_47, %c0_48], %119 {strides = array<i32>} : memref<2x22x192xf32, #tpu.memory_space<vmem>>, vector<1x16x192xf32>,
    %c1 = arith.constant 1 : index
    %c3_49 = arith.constant 3 : index
    %c0_50 = arith.constant 0 : index
    %120 = vector.load %arg16[%c1, %c3_49, %c0_50] : memref<2x22x192xf32, #tpu.memory_space<vmem>>, vector<1x16x192xf32>
    %121 = vector.shape_cast %120 : vector<1x16x192xf32> to vector<16x192xf32>
    %122 = vector.extract_strided_slice %112 {offsets = [16, 0], sizes = [16, 192], strides = [1, 1]} : vector<32x192xf32> to vector<16x192xf32>
    %123 = arith.addf %121, %122 : vector<16x192xf32>
    %c1_51 = arith.constant 1 : index
    %c3_52 = arith.constant 3 : index
    %c0_53 = arith.constant 0 : index
    %124 = vector.load %arg16[%c1_51, %c3_52, %c0_53] : memref<2x22x192xf32, #tpu.memory_space<vmem>>, vector<1x16x192xf32>
    %125 = vector.shape_cast %124 : vector<1x16x192xf32> to vector<16x192xf32>
    %126 = vector.shape_cast %123 : vector<16x192xf32> to vector<1x16x192xf32>
    tpu.vector_store %arg16[%c1_51, %c3_52, %c0_53], %126 {strides = array<i32>} : memref<2x22x192xf32, #tpu.memory_space<vmem>>, vector<1x16x192xf32>,
    %c2_i32 = arith.constant 2 : i32
    %127 = arith.cmpi eq, %arg0, %c2_i32 : i32
    %128 = arith.extui %127 : i1 to i32
    %c0_i32_54 = arith.constant 0 : i32
    %129 = arith.cmpi ne, %128, %c0_i32_54 : i32
    scf.if %129 {
      %c0_55 = arith.constant 0 : index
      %c3_56 = arith.constant 3 : index
      %c0_57 = arith.constant 0 : index
      %130 = vector.load %arg16[%c0_55, %c3_56, %c0_57] : memref<2x22x192xf32, #tpu.memory_space<vmem>>, vector<1x16x192xf32>
      %131 = vector.shape_cast %130 : vector<1x16x192xf32> to vector<16x192xf32>
      %c0_58 = arith.constant 0 : index
      %c0_59 = arith.constant 0 : index
      %132 = vector.load %arg15[%c0_58, %c0_59] : memref<32x192xf32, #tpu.memory_space<vmem>>, vector<16x192xf32>
      tpu.vector_store %arg15[%c0_58, %c0_59], %131 {strides = array<i32>} : memref<32x192xf32, #tpu.memory_space<vmem>>, vector<16x192xf32>,
      %c1_60 = arith.constant 1 : index
      %c3_61 = arith.constant 3 : index
      %c0_62 = arith.constant 0 : index
      %133 = vector.load %arg16[%c1_60, %c3_61, %c0_62] : memref<2x22x192xf32, #tpu.memory_space<vmem>>, vector<1x16x192xf32>
      %134 = vector.shape_cast %133 : vector<1x16x192xf32> to vector<16x192xf32>
      %c16_63 = arith.constant 16 : index
      %c0_64 = arith.constant 0 : index
      %135 = vector.load %arg15[%c16_63, %c0_64] : memref<32x192xf32, #tpu.memory_space<vmem>>, vector<16x192xf32>
      tpu.vector_store %arg15[%c16_63, %c0_64], %134 {strides = array<i32>} : memref<32x192xf32, #tpu.memory_space<vmem>>, vector<16x192xf32>,
    } else {
    }
    return
  }
  func.func @transform_0(%arg0: i32) -> (i32, i32) {
    %c0_i32 = arith.constant 0 : i32
    %c0_i32_0 = arith.constant 0 : i32
    %c0_i32_1 = arith.constant 0 : i32
    return %c0_i32, %c0_i32_0 : i32, i32
  }
  func.func @transform_1(%arg0: i32) -> (i32, i32) {
    %c0_i32 = arith.constant 0 : i32
    %c0_i32_0 = arith.constant 0 : i32
    %c0_i32_1 = arith.constant 0 : i32
    return %c0_i32, %c0_i32_0 : i32, i32
  }
  func.func @transform_2(%arg0: i32) -> (i32, i32) {
    %c0_i32 = arith.constant 0 : i32
    %c0_i32_0 = arith.constant 0 : i32
    %c0_i32_1 = arith.constant 0 : i32
    return %c0_i32, %c0_i32_0 : i32, i32
  }
  func.func @transform_3(%arg0: i32) -> (i32, i32) {
    %c0_i32 = arith.constant 0 : i32
    %c0_i32_0 = arith.constant 0 : i32
    %c0_i32_1 = arith.constant 0 : i32
    return %c0_i32, %c0_i32_0 : i32, i32
  }
  func.func @transform_4(%arg0: i32) -> (i32, i32) {
    %c0_i32 = arith.constant 0 : i32
    %c0_i32_0 = arith.constant 0 : i32
    %c0_i32_1 = arith.constant 0 : i32
    return %c0_i32, %c0_i32_0 : i32, i32
  }
  func.func @transform_5(%arg0: i32) -> (i32, i32, i32) {
    %c0_i32 = arith.constant 0 : i32
    %c0_i32_0 = arith.constant 0 : i32
    %c0_i32_1 = arith.constant 0 : i32
    return %arg0, %c0_i32, %c0_i32_0 : i32, i32, i32
  }
  func.func @transform_6(%arg0: i32) -> (i32, i32, i32) {
    %c0_i32 = arith.constant 0 : i32
    %c0_i32_0 = arith.constant 0 : i32
    %c0_i32_1 = arith.constant 0 : i32
    return %arg0, %c0_i32, %c0_i32_0 : i32, i32, i32
  }
  func.func @transform_7(%arg0: i32) -> (i32, i32, i32) {
    %c0_i32 = arith.constant 0 : i32
    %c0_i32_0 = arith.constant 0 : i32
    %c0_i32_1 = arith.constant 0 : i32
    return %arg0, %c0_i32, %c0_i32_0 : i32, i32, i32
  }
  func.func @transform_8(%arg0: i32) -> (i32, i32, i32) {
    %c0_i32 = arith.constant 0 : i32
    %c0_i32_0 = arith.constant 0 : i32
    %c0_i32_1 = arith.constant 0 : i32
    return %arg0, %c0_i32, %c0_i32_0 : i32, i32, i32
  }
  func.func @transform_9(%arg0: i32) -> (i32, i32, i32) {
    %c0_i32 = arith.constant 0 : i32
    %c0_i32_0 = arith.constant 0 : i32
    %c0_i32_1 = arith.constant 0 : i32
    return %arg0, %c0_i32, %c0_i32_0 : i32, i32, i32
  }
  func.func @transform_10(%arg0: i32) -> (i32, i32, i32) {
    %c0_i32 = arith.constant 0 : i32
    %c0_i32_0 = arith.constant 0 : i32
    %c0_i32_1 = arith.constant 0 : i32
    return %arg0, %c0_i32, %c0_i32_0 : i32, i32, i32
  }
  func.func @transform_11(%arg0: i32) -> (i32, i32, i32) {
    %c0_i32 = arith.constant 0 : i32
    %c0_i32_0 = arith.constant 0 : i32
    %c0_i32_1 = arith.constant 0 : i32
    return %arg0, %c0_i32, %c0_i32_0 : i32, i32, i32
  }
  func.func @transform_12(%arg0: i32) -> (i32, i32, i32) {
    %c0_i32 = arith.constant 0 : i32
    %c0_i32_0 = arith.constant 0 : i32
    %c0_i32_1 = arith.constant 0 : i32
    return %arg0, %c0_i32, %c0_i32_0 : i32, i32, i32
  }
  func.func @transform_13(%arg0: i32) -> (i32, i32, i32) {
    %c0_i32 = arith.constant 0 : i32
    %c0_i32_0 = arith.constant 0 : i32
    %c0_i32_1 = arith.constant 0 : i32
    return %arg0, %c0_i32, %c0_i32_0 : i32, i32, i32
  }
  func.func @transform_14(%arg0: i32) -> (i32, i32) {
    %c0_i32 = arith.constant 0 : i32
    %c0_i32_0 = arith.constant 0 : i32
    %c0_i32_1 = arith.constant 0 : i32
    return %c0_i32, %c0_i32_0 : i32, i32
  }
}

</mosaic_0001>

<bundles_post_ra>
// kernel: tpu_custom_call.1
= control target key start
LH: loop header
LB: loop body
LE: loop exit
PB: predicated region body
PF: predicated region fallthrough
CT: control target
= control target key end

     0   :  { %s6295_s0 = inlined_call_operand.vmem [shape: f32[32,768], index: 0, kind: input, shape index: {}]   ;;  %s6296_s1 = inlined_call_operand.vmem [shape: bf16[768,192], index: 1, kind: input, shape index: {}]   ;;  %s6297_s2 = inlined_call_operand.vmem [shape: f32[1,192], index: 2, kind: input, shape index: {}]   ;;  %s6298_s3 = inlined_call_operand.vmem [shape: f32[1,192], index: 3, kind: input, shape index: {}]   ;;  %s6299_s4 = inlined_call_operand.vmem [shape: f32[1,192], index: 4, kind: input, shape index: {}]   ;;  %s6300_s5 = inlined_call_operand.vmem [shape: f32[3,7,192], index: 5, kind: input, shape index: {}]   ;;  %s6301_s6 = inlined_call_operand.vmem [shape: f32[3,1,192], index: 6, kind: input, shape index: {}]   ;;  %s6302_s7 = inlined_call_operand.vmem [shape: f32[3,1,192], index: 7, kind: input, shape index: {}]   ;;  %s6303_s8 = inlined_call_operand.vmem [shape: f32[3,1,192], index: 8, kind: input, shape index: {}]   ;;  %s6304_s9 = inlined_call_operand.vmem [shape: bf16[3,192,768], index: 9, kind: input, shape index: {}]   ;;  %s6305_s10 = inlined_call_operand.vmem [shape: f32[3,1,768], index: 10, kind: input, shape index: {}]   ;;  %s6306_s11 = inlined_call_operand.vmem [shape: bf16[3,768,192], index: 11, kind: input, shape index: {}]   ;;  %s6307_s12 = inlined_call_operand.vmem [shape: f32[3,1,192], index: 12, kind: input, shape index: {}]   ;;  %s6308_s13 = inlined_call_operand.vmem [shape: f32[3,1,192], index: 13, kind: input, shape index: {}]   ;;  %s6309_s14 = inlined_call_operand.hbm [shape: f32[32,192], index: 14, kind: output, shape index: {}]  }
   0x1   :  { %6350 = sst [smem:[#allocation20_spill]] %s6298_s3 }
   0x2   :  { %6351 = sst [smem:[#allocation21_spill]] %s6299_s4 }
   0x3   :  { %6352 = sst [smem:[#allocation22_spill]] %s6300_s5 }
   0x4   :  { %6353 = sst [smem:[#allocation23_spill]] %s6309_s14 }
   0x5   :  { %19 = vsyncpa [#allocation5], 0  ;;  %s4932_s29 = smov 0  }
   0x6 LB: > { %6354 = sst [smem:[#allocation7_spill]] %s4851_s29  ;;  %s4938_s30 = sadd.s32 4294967295, %s4851_s29   ;;  %s4851_s29 = sphi %s4932_s29, %s25_s29  }
   0x7   : > { %p3967_p0 = scmp.ge.s32.totalorder %s4851_s29, 1  ;;  %p482_p1 = scmp.lt.s32.totalorder %s4851_s29, 4 }
   0x9   : > { %p483_p2 = pnand %p3967_p0, %p482_p1 }
   0xb   : > { %486 = sbr.rel (%p483_p2) target bundleno = 1677 (0x68d), region = 76 }
  0x12   : > { %p557_p3 = scmp.lt.s32.totalorder %s4938_s30, 2  ;;  %s6355_s5 = sld [smem:[#allocation22_spill]] }
  0x13   : > { %p3977_p4 = scmp.ne.s32.totalorder %s4938_s30, 0 }
  0x14   : > { %s558_s15 = scalar_select %p557_p3, %s4938_s30, 2 }
  0x15   : > { %v4355_v0 = vld [vmem:[%s6296_s1 + $0x4] ss:$8 sps:$4 sm:$0xff] (!%p3977_p4)   ;;  %v4359_v2 = vld [vmem:[%s6296_s1] ss:$8 sps:$4 sm:$0xff] (!%p3977_p4)   ;;  %v4361_v4 = vld [vmem:[%s6296_s1 + $0x14] ss:$8 sps:$4 sm:$0xff] (!%p3977_p4)  }
  0x16   : > { %s4253_s16 = sshll.u32 %s558_s15, 4  ;;  %s4944_s17 = sshll.u32 %s558_s15, 1  ;;  %v4357_v1 = vld [vmem:[%s6296_s1 + $0x104] ss:$8 sps:$4 sm:$0xff] (!%p3977_p4)   ;;  %1239 = vmatprep.subr.bf16.mxu1 (!%p3977_p4), %v4355_v0  ;;  %v4360_v3 = vld [vmem:[%s6296_s1 + $0x100] ss:$8 sps:$4 sm:$0xff] (!%p3977_p4)  }
  0x17   : > { %s4334_s18 = smul.u32 576, %s558_s15  ;;  %s591_s4 = scalar_lea.vmem %s6307_s12, %s4944_s17  ;;  %1292 = vmatprep.subr.bf16.mxu0 (!%p3977_p4), %v4357_v1  ;;  %1240 = vmatpush1.bf16.msra.mxu1 (!%p3977_p4), %v4359_v2  ;;  %v4363_v5 = vld [vmem:[%s6296_s1 + $0x114] ss:$8 sps:$4 sm:$0xff] (!%p3977_p4)   ;;  %v4365_v6 = vld [vmem:[%s6296_s1 + $0x10] ss:$8 sps:$4 sm:$0xff] (!%p3977_p4)   ;;  %v616_v47 = vld [vmem:[%s6295_s0 + $0x8] sm:$0xff] (!%p3977_p4) }
  0x18   : > { %s4949_s20 = scalar_lea.vmem %s6355_s5, %s4253_s16  ;;  %s4335_s3 = smul.u32 6, %s558_s15  ;;  %1293 = vmatpush1.bf16.msra.mxu0 (!%p3977_p4), %v4360_v3  ;;  %1241 = vmatprep.subr.bf16.mxu1 (!%p3977_p4), %v4361_v4  ;;  %v4366_v7 = vld [vmem:[%s6296_s1 + $0x110] ss:$8 sps:$4 sm:$0xff] (!%p3977_p4)   ;;  %v4367_v8 = vld [vmem:[%s6296_s1 + $0x24] ss:$8 sps:$4 sm:$0xff] (!%p3977_p4)   ;;  %vm602_vm0 = vcmask (!%p3977_p4), 523264  }
  0x19   : > { %6356 = sst [smem:[#allocation8_spill]] %s4949_s20  ;;  %s595_s20 = scalar_lea.vmem %s6308_s13, %s4944_s17  ;;  %1294 = vmatprep.subr.bf16.mxu0 (!%p3977_p4), %v4363_v5  ;;  %v4369_v9 = vld [vmem:[%s6296_s1 + $0x124] ss:$8 sps:$4 sm:$0xff] (!%p3977_p4)   ;;  %v4371_v10 = vld [vmem:[%s6296_s1 + $0x20] ss:$8 sps:$4 sm:$0xff] (!%p3977_p4)   ;;  %v622_v48 = vld [vmem:[%s6295_s0 + $0x38] sm:$0xff] (!%p3977_p4) }
  0x1a   : > { %s4974_s23 = scalar_lea.vmem %s6304_s9, %s4334_s18  ;;  %s4336_s24 = smul.u32 768, %s558_s15  ;;  %v4372_v11 = vld [vmem:[%s6296_s1 + $0x120] ss:$8 sps:$4 sm:$0xff] (!%p3977_p4)   ;;  %v4373_v12 = vld [vmem:[%s6296_s1 + $0x34] ss:$8 sps:$4 sm:$0xff] (!%p3977_p4)   ;;  %v640_v52 = vpack.c.bf16 (!%p3977_p4), %v622_v48, %v616_v47  ;;  %vm607_vm1 = vcmask (!%p3977_p4), 521216  }
  0x1b   : > { %s4979_s27 = scalar_lea.vmem %s6305_s10, %s4335_s3  ;;  %600 = sbr.rel (%p3977_p4) target bundleno = 696 (0x2b8), region = 80  ;;  %1242 = vmatpush1.bf16.msra.mxu1 (!%p3977_p4), %v4365_v6  ;;  %v4375_v13 = vld [vmem:[%s6296_s1 + $0x134] ss:$8 sps:$4 sm:$0xff] (!%p3977_p4)   ;;  %v4377_v14 = vld [vmem:[%s6296_s1 + $0x30] ss:$8 sps:$4 sm:$0xff] (!%p3977_p4)   ;;  %v624_v50 = vld [vmem:[%s6295_s0 + $0x48] sm:$0xff] (!%p3977_p4) }
  0x1c   : > { %s4984_s14 = scalar_lea.vmem %s6306_s11, %s4336_s24  ;;  %1295 = vmatpush1.bf16.msra.mxu0 (!%p3977_p4), %v4366_v7  ;;  %1243 = vmatprep.subr.bf16.mxu1 (!%p3977_p4), %v4367_v8  ;;  %v4378_v15 = vld [vmem:[%s6296_s1 + $0x130] ss:$8 sps:$4 sm:$0xff] (!%p3977_p4)   ;;  %v4379_v16 = vld [vmem:[%s6296_s1 + $0x44] ss:$8 sps:$4 sm:$0xff] (!%p3977_p4)   ;;  %v4383_v18 = vld [vmem:[%s6296_s1 + $0x40] ss:$8 sps:$4 sm:$0xff] (!%p3977_p4)  }
  0x1d   : > { %1296 = vmatprep.subr.bf16.mxu0 (!%p3977_p4), %v4369_v9  ;;  %v4381_v17 = vld [vmem:[%s6296_s1 + $0x144] ss:$8 sps:$4 sm:$0xff] (!%p3977_p4)   ;;  %v4384_v19 = vld [vmem:[%s6296_s1 + $0x140] ss:$8 sps:$4 sm:$0xff] (!%p3977_p4)   ;;  %v4385_v20 = vld [vmem:[%s6296_s1 + $0x54] ss:$8 sps:$4 sm:$0xff] (!%p3977_p4)   ;;  %1271 = vmatprep.mubr.bf16.mxu1 (!%p3977_p4), %v640_v52 }
  0x1e   : > { %v4387_v21 = vld [vmem:[%s6296_s1 + $0x154] ss:$8 sps:$4 sm:$0xff] (!%p3977_p4)   ;;  %v4389_v22 = vld [vmem:[%s6296_s1 + $0x50] ss:$8 sps:$4 sm:$0xff] (!%p3977_p4)   ;;  %v4391_v24 = vld [vmem:[%s6296_s1 + $0x64] ss:$8 sps:$4 sm:$0xff] (!%p3977_p4)  }
  0x1f   : > { %1244 = vmatpush1.bf16.msra.mxu1 (!%p3977_p4), %v4371_v10  ;;  %v4390_v23 = vld [vmem:[%s6296_s1 + $0x150] ss:$8 sps:$4 sm:$0xff] (!%p3977_p4)   ;;  %v4393_v25 = vld [vmem:[%s6296_s1 + $0x164] ss:$8 sps:$4 sm:$0xff] (!%p3977_p4)   ;;  %v4395_v26 = vld [vmem:[%s6296_s1 + $0x60] ss:$8 sps:$4 sm:$0xff] (!%p3977_p4)  }
  0x20   : > { %1297 = vmatpush1.bf16.msra.mxu0 (!%p3977_p4), %v4372_v11  ;;  %1245 = vmatprep.subr.bf16.mxu1 (!%p3977_p4), %v4373_v12  ;;  %v4396_v27 = vld [vmem:[%s6296_s1 + $0x160] ss:$8 sps:$4 sm:$0xff] (!%p3977_p4)   ;;  %v4397_v28 = vld [vmem:[%s6296_s1 + $0x74] ss:$8 sps:$4 sm:$0xff] (!%p3977_p4)   ;;  %v4401_v30 = vld [vmem:[%s6296_s1 + $0x70] ss:$8 sps:$4 sm:$0xff] (!%p3977_p4)  }
  0x21   : > { %1298 = vmatprep.subr.bf16.mxu0 (!%p3977_p4), %v4375_v13  ;;  %v4399_v29 = vld [vmem:[%s6296_s1 + $0x174] ss:$8 sps:$4 sm:$0xff] (!%p3977_p4)   ;;  %v4402_v31 = vld [vmem:[%s6296_s1 + $0x170] ss:$8 sps:$4 sm:$0xff] (!%p3977_p4)   ;;  %v4403_v32 = vld [vmem:[%s6296_s1 + $0x84] ss:$8 sps:$4 sm:$0xff] (!%p3977_p4)  }
  0x22   : > { %v4405_v33 = vld [vmem:[%s6296_s1 + $0x184] ss:$8 sps:$4 sm:$0xff]   ;;  %v4407_v34 = vld [vmem:[%s6296_s1 + $0x80] ss:$8 sps:$4 sm:$0xff]   ;;  %v4409_v36 = vld [vmem:[%s6296_s1 + $0x94] ss:$8 sps:$4 sm:$0xff]  }
  0x23   : > { %1246 = vmatpush1.bf16.msra.mxu1 %v4377_v14  ;;  %v4408_v35 = vld [vmem:[%s6296_s1 + $0x180] ss:$8 sps:$4 sm:$0xff]   ;;  %v4411_v37 = vld [vmem:[%s6296_s1 + $0x194] ss:$8 sps:$4 sm:$0xff]   ;;  %v4413_v38 = vld [vmem:[%s6296_s1 + $0x90] ss:$8 sps:$4 sm:$0xff]  }
  0x24   : > { %1299 = vmatpush1.bf16.msra.mxu0 %v4378_v15  ;;  %1247 = vmatprep.subr.bf16.mxu1 %v4379_v16  ;;  %v4414_v39 = vld [vmem:[%s6296_s1 + $0x190] ss:$8 sps:$4 sm:$0xff]   ;;  %v4415_v40 = vld [vmem:[%s6296_s1 + $0xa4] ss:$8 sps:$4 sm:$0xff]   ;;  %v4419_v42 = vld [vmem:[%s6296_s1 + $0xa0] ss:$8 sps:$4 sm:$0xff]  }
  0x25   : > { %1300 = vmatprep.subr.bf16.mxu0 %v4381_v17  ;;  %v4417_v41 = vld [vmem:[%s6296_s1 + $0x1a4] ss:$8 sps:$4 sm:$0xff]   ;;  %v4420_v43 = vld [vmem:[%s6296_s1 + $0x1a0] ss:$8 sps:$4 sm:$0xff]   ;;  %v4421_v44 = vld [vmem:[%s6296_s1 + $0xb4] ss:$8 sps:$4 sm:$0xff]  }
  0x26   : > { %v4423_v45 = vld [vmem:[%s6296_s1 + $0x1b4] ss:$8 sps:$4 sm:$0xff]   ;;  %v4425_v46 = vld [vmem:[%s6296_s1 + $0xb0] ss:$8 sps:$4 sm:$0xff]   ;;  %v4427_v54 = vld [vmem:[%s6296_s1 + $0xc4] ss:$8 sps:$4 sm:$0xff]  }
  0x27   : > { %1248 = vmatpush1.bf16.msra.mxu1 %v4383_v18  ;;  %v618_v49 = vld [vmem:[%s6295_s0 + $0x18] sm:$0xff]  ;;  %v4429_v55 = vld [vmem:[%s6296_s1 + $0x1c4] ss:$8 sps:$4 sm:$0xff]   ;;  %v4431_v56 = vld [vmem:[%s6296_s1 + $0xc0] ss:$8 sps:$4 sm:$0xff]   ;;  %s6357_s24 = sld [smem:[#allocation20_spill]] }
  0x28   : > { %1301 = vmatpush1.bf16.msra.mxu0 %v4384_v19  ;;  %1249 = vmatprep.subr.bf16.mxu1 %v4385_v20  ;;  %v4426_v51 = vld [vmem:[%s6296_s1 + $0x1b0] ss:$8 sps:$4 sm:$0xff]   ;;  %v642_v53 = vpack.c.bf16 %v624_v50, %v618_v49  ;;  %v4432_v57 = vld [vmem:[%s6296_s1 + $0x1c0] ss:$8 sps:$4 sm:$0xff]   ;;  %v4433_v58 = vld [vmem:[%s6296_s1 + $0xd4] ss:$8 sps:$4 sm:$0xff]  }
  0x29   : > { %1302 = vmatprep.subr.bf16.mxu0 %v4387_v21  ;;  %v4435_v59 = vld [vmem:[%s6296_s1 + $0x1d4] ss:$8 sps:$4 sm:$0xff]   ;;  %v4437_v60 = vld [vmem:[%s6296_s1 + $0xd0] ss:$8 sps:$4 sm:$0xff]   ;;  %v4439_v62 = vld [vmem:[%s6296_s1 + $0xe4] ss:$8 sps:$4 sm:$0xff]  }
  0x2a   : > { %1324 = vmatprep.mubr.bf16.mxu0 %v642_v53  ;;  %v4438_v61 = vld [vmem:[%s6296_s1 + $0x1d0] ss:$8 sps:$4 sm:$0xff]   ;;  %v4441_v63 = vld [vmem:[%s6296_s1 + $0x1e4] ss:$8 sps:$4 sm:$0xff]   ;;  %v4443_v0 = vld [vmem:[%s6296_s1 + $0xe0] ss:$8 sps:$4 sm:$0xff]  }
  0x2b   : > { %1250 = vmatpush1.bf16.msra.mxu1 %v4389_v22  ;;  %v4444_v1 = vld [vmem:[%s6296_s1 + $0x1e0] ss:$8 sps:$4 sm:$0xff]   ;;  %v4445_v2 = vld [vmem:[%s6296_s1 + $0xf4] ss:$8 sps:$4 sm:$0xff]   ;;  %v4449_v4 = vld [vmem:[%s6296_s1 + $0xf0] ss:$8 sps:$4 sm:$0xff]  }
  0x2c   : > { %1303 = vmatpush1.bf16.msra.mxu0 %v4390_v23  ;;  %1251 = vmatprep.subr.bf16.mxu1 %v4391_v24  ;;  %v4447_v3 = vld [vmem:[%s6296_s1 + $0x1f4] ss:$8 sps:$4 sm:$0xff]   ;;  %v4450_v5 = vld [vmem:[%s6296_s1 + $0x1f0] ss:$8 sps:$4 sm:$0xff]   ;;  %v615_v6 = vld [vmem:[%s6295_s0] sm:$0xff]  ;;  %s6358_s5 = sld [smem:[#allocation21_spill]] }
  0x2d   : > { %1304 = vmatprep.subr.bf16.mxu0 %v4393_v25  ;;  %v621_v7 = vld [vmem:[%s6295_s0 + $0x30] sm:$0xff]  ;;  %v623_v9 = vld [vmem:[%s6295_s0 + $0x40] sm:$0xff]  ;;  %v628_v14 = vld [vmem:[%s6295_s0 + $0x68] sm:$0xff]  ;;  %vm1529_vm2 = vcmask 523267   ;;  %vm1515_vm3 = vcmask 1042432   ;;  %vm1534_vm4 = vcmask 518144  }
  0x2e   : > { %v617_v8 = vld [vmem:[%s6295_s0 + $0x10] sm:$0xff]  ;;  %v4453_v10 = vld [vmem:[%s6296_s1 + $0x204] ss:$8 sps:$4 sm:$0xff]   ;;  %v4451_v11 = vld [vmem:[%s6296_s1 + $0x200] ss:$8 sps:$4 sm:$0xff]   ;;  %v639_v12 = vpack.c.bf16 %v621_v7, %v615_v6 }
  0x2f   : > { %1252 = vmatpush1.bf16.msra.mxu1 %v4395_v26  ;;  %v641_v13 = vpack.c.bf16 %v623_v9, %v617_v8  ;;  %v634_v15 = vld [vmem:[%s6295_s0 + $0x98] sm:$0xff]  ;;  %v636_v17 = vld [vmem:[%s6295_s0 + $0xa8] sm:$0xff]  ;;  %v627_v21 = vld [vmem:[%s6295_s0 + $0x60] sm:$0xff] }
  0x30   : > { %1305 = vmatpush1.bf16.msra.mxu0 %v4396_v27  ;;  %1253 = vmatprep.subr.bf16.mxu1 %v4397_v28  ;;  %v630_v16 = vld [vmem:[%s6295_s0 + $0x78] sm:$0xff]  ;;  %v646_v20 = vpack.c.bf16 %v634_v15, %v628_v14  ;;  %v633_v23 = vld [vmem:[%s6295_s0 + $0x90] sm:$0xff]  ;;  %v635_v25 = vld [vmem:[%s6295_s0 + $0xa0] sm:$0xff] }
  0x31   : > { %1306 = vmatprep.subr.bf16.mxu0 %v4399_v29  ;;  %v4456_v18 = vld [vmem:[%s6296_s1 + $0x214] ss:$8 sps:$4 sm:$0xff]   ;;  %v4454_v19 = vld [vmem:[%s6296_s1 + $0x210] ss:$8 sps:$4 sm:$0xff]   ;;  %v648_v22 = vpack.c.bf16 %v636_v17, %v630_v16  ;;  %v4459_v26 = vld [vmem:[%s6296_s1 + $0x224] ss:$8 sps:$4 sm:$0xff]   ;;  %v645_v28 = vpack.c.bf16 %v633_v23, %v627_v21 }
  0x32   : > { %v629_v24 = vld [vmem:[%s6295_s0 + $0x70] sm:$0xff]  ;;  %v620_v27 = vld [vmem:[%s6295_s0 + $0x28] sm:$0xff] }
  0x33   : > { %1254 = vmatpush1.bf16.msra.mxu1 %v4401_v30  ;;  %v647_v29 = vpack.c.bf16 %v635_v25, %v629_v24  ;;  %v626_v30 = vld [vmem:[%s6295_s0 + $0x58] sm:$0xff]  ;;  %v4475_v47 = vld [vmem:[%s6296_s1 + $0x280] ss:$8 sps:$4 sm:$0xff]   ;;  %v4483_v50 = vld [vmem:[%s6296_s1 + $0x2a4] ss:$8 sps:$4 sm:$0xff]  }
  0x34   : > { %1307 = vmatpush1.bf16.msra.mxu0 %v4402_v31  ;;  %1255 = vmatprep.subr.bf16.mxu1 %v4403_v32  ;;  %v632_v31 = vld [vmem:[%s6295_s0 + $0x88] sm:$0xff]  ;;  %v638_v32 = vld [vmem:[%s6295_s0 + $0xb8] sm:$0xff] }
  0x35   : > { %1308 = vmatprep.subr.bf16.mxu0 %v4405_v33  ;;  %v4457_v33 = vld [vmem:[%s6296_s1 + $0x220] ss:$8 sps:$4 sm:$0xff]   ;;  %v4480_v48 = vld [vmem:[%s6296_s1 + $0x294] ss:$8 sps:$4 sm:$0xff]   ;;  %v4478_v49 = vld [vmem:[%s6296_s1 + $0x290] ss:$8 sps:$4 sm:$0xff]  }
  0x36   : > { %v4486_v52 = vld [vmem:[%s6296_s1 + $0x2b4] ss:$8 sps:$4 sm:$0xff]   ;;  %v4484_v53 = vld [vmem:[%s6296_s1 + $0x2b0] ss:$8 sps:$4 sm:$0xff]  }
  0x37   : > { %1256 = vmatpush1.bf16.msra.mxu1 %v4407_v34  ;;  %v4462_v34 = vld [vmem:[%s6296_s1 + $0x234] ss:$8 sps:$4 sm:$0xff]  }
  0x38   : > { %1309 = vmatpush1.bf16.msra.mxu0 %v4408_v35  ;;  %1257 = vmatprep.subr.bf16.mxu1 %v4409_v36  ;;  %v644_v35 = vpack.c.bf16 %v626_v30, %v620_v27  ;;  %v650_v36 = vpack.c.bf16 %v638_v32, %v632_v31 }
  0x39   : > { %1310 = vmatprep.subr.bf16.mxu0 %v4411_v37  ;;  %v4460_v37 = vld [vmem:[%s6296_s1 + $0x230] ss:$8 sps:$4 sm:$0xff]  }
  0x3b   : > { %1258 = vmatpush1.bf16.msra.mxu1 %v4413_v38  ;;  %v4465_v38 = vld [vmem:[%s6296_s1 + $0x244] ss:$8 sps:$4 sm:$0xff]  }
  0x3c   : > { %1311 = vmatpush1.bf16.msra.mxu0 %v4414_v39  ;;  %1259 = vmatprep.subr.bf16.mxu1 %v4415_v40  ;;  %v4463_v39 = vld [vmem:[%s6296_s1 + $0x240] ss:$8 sps:$4 sm:$0xff]   ;;  %v4468_v40 = vld [vmem:[%s6296_s1 + $0x254] ss:$8 sps:$4 sm:$0xff]  }
  0x3d   : > { %1312 = vmatprep.subr.bf16.mxu0 %v4417_v41  ;;  %v4466_v41 = vld [vmem:[%s6296_s1 + $0x250] ss:$8 sps:$4 sm:$0xff]  }
  0x3f   : > { %1260 = vmatpush1.bf16.msra.mxu1 %v4419_v42  ;;  %v4471_v42 = vld [vmem:[%s6296_s1 + $0x264] ss:$8 sps:$4 sm:$0xff]  }
  0x40   : > { %1313 = vmatpush1.bf16.msra.mxu0 %v4420_v43  ;;  %1261 = vmatprep.subr.bf16.mxu1 %v4421_v44  ;;  %v4469_v43 = vld [vmem:[%s6296_s1 + $0x260] ss:$8 sps:$4 sm:$0xff]   ;;  %v4474_v44 = vld [vmem:[%s6296_s1 + $0x274] ss:$8 sps:$4 sm:$0xff]  }
  0x41   : > { %1314 = vmatprep.subr.bf16.mxu0 %v4423_v45  ;;  %v4472_v45 = vld [vmem:[%s6296_s1 + $0x270] ss:$8 sps:$4 sm:$0xff]  }
  0x43   : > { %1262 = vmatpush1.bf16.msra.mxu1 %v4425_v46  ;;  %v4477_v46 = vld [vmem:[%s6296_s1 + $0x284] ss:$8 sps:$4 sm:$0xff]  }
  0x44   : > { %1315 = vmatpush1.bf16.msra.mxu0 %v4426_v51  ;;  %1263 = vmatprep.subr.bf16.mxu1 %v4427_v54  ;;  %v4481_v51 = vld [vmem:[%s6296_s1 + $0x2a0] ss:$8 sps:$4 sm:$0xff]   ;;  %v4489_v54 = vld [vmem:[%s6296_s1 + $0x2c4] ss:$8 sps:$4 sm:$0xff]  }
  0x45   : > { %1316 = vmatprep.subr.bf16.mxu0 %v4429_v55  ;;  %v4487_v55 = vld [vmem:[%s6296_s1 + $0x2c0] ss:$8 sps:$4 sm:$0xff]  }
  0x47   : > { %1264 = vmatpush1.bf16.msra.mxu1 %v4431_v56  ;;  %v4492_v56 = vld [vmem:[%s6296_s1 + $0x2d4] ss:$8 sps:$4 sm:$0xff]  }
  0x48   : > { %1317 = vmatpush1.bf16.msra.mxu0 %v4432_v57  ;;  %1265 = vmatprep.subr.bf16.mxu1 %v4433_v58  ;;  %v4490_v57 = vld [vmem:[%s6296_s1 + $0x2d0] ss:$8 sps:$4 sm:$0xff]   ;;  %v4495_v58 = vld [vmem:[%s6296_s1 + $0x2e4] ss:$8 sps:$4 sm:$0xff]  }
  0x49   : > { %1318 = vmatprep.subr.bf16.mxu0 %v4435_v59  ;;  %v4493_v59 = vld [vmem:[%s6296_s1 + $0x2e0] ss:$8 sps:$4 sm:$0xff]  }
  0x4b   : > { %1266 = vmatpush1.bf16.msra.mxu1 %v4437_v60  ;;  %v4498_v60 = vld [vmem:[%s6296_s1 + $0x2f4] ss:$8 sps:$4 sm:$0xff]  }
  0x4c   : > { %1319 = vmatpush1.bf16.msra.mxu0 %v4438_v61  ;;  %1267 = vmatprep.subr.bf16.mxu1 %v4439_v62  ;;  %v4496_v61 = vld [vmem:[%s6296_s1 + $0x2f0] ss:$8 sps:$4 sm:$0xff]   ;;  %v619_v62 = vld [vmem:[%s6295_s0 + $0x20] sm:$0xff] }
  0x4d   : > { %1320 = vmatprep.subr.bf16.mxu0 %v4441_v63  ;;  %v625_v63 = vld [vmem:[%s6295_s0 + $0x50] sm:$0xff] }
  0x4f   : > { %1268 = vmatpush1.bf16.msra.mxu1 %v4443_v0  ;;  %v631_v0 = vld [vmem:[%s6295_s0 + $0x80] sm:$0xff] }
  0x50   : > { %1321 = vmatpush1.bf16.msra.mxu0 %v4444_v1  ;;  %1269 = vmatprep.subr.bf16.mxu1 %v4445_v2  ;;  %v637_v1 = vld [vmem:[%s6295_s0 + $0xb0] sm:$0xff]  ;;  %v643_v2 = vpack.c.bf16 %v625_v63, %v619_v62 }
  0x51   : > { %1322 = vmatprep.subr.bf16.mxu0 %v4447_v3  ;;  %v649_v3 = vpack.c.bf16 %v637_v1, %v631_v0 }
  0x53   : > { %1270 = vmatpush1.bf16.msra.mxu1 %v4449_v4  ;;  %v749_v4 = vlaneseq }
  0x54   : > { %1323 = vmatpush1.bf16.msra.mxu0 %v4450_v5  ;;  %4254 = vmatprep.subr.bf16.mxu1 %v4453_v10 }
  0x55   : > { %1345 = vmatprep.subr.bf16.mxu0 %v4453_v10  ;;  %v750_v5 = vshrl.u32 %v749_v4, 7 }
  0x56   : > { %1272 = vmatmul.mubr.bf16.vlgmr.msra.gmra.mrb[0].mxu1 %v639_v12 }
  0x57   : > { %1325 = vmatmul.mubr.bf16.vlgmr.msra.gmra.mrb[0].mxu0 %v641_v13  ;;  %4270 = vmatpush1.bf16.msra.mxu1 %v4451_v11  ;;  %v5347_v9 = vsub.s32 0, %v750_v5  ;;  %v5352_v12 = vsub.s32 1, %v750_v5 }
  0x58   : > { %1346 = vmatpush1.bf16.msra.mxu0 %v4451_v11  ;;  %4255 = vmatprep.subr.bf16.mxu1 %v4456_v18  ;;  %v747_v11 = vld [vmem:[%s6297_s2] sm:$0x3] }
  0x59   : > { %1347 = vmatprep.subr.bf16.mxu0 %v4456_v18  ;;  %1281 = vmatprep.mubr.bf16.mxu1 %v646_v20  ;;  %v752_v13 = vrot.slane %v747_v11, %v5347_v9  ;;  %v756_v14 = vrot.slane %v747_v11, %v5352_v12 }
  0x5a   : > { %1334 = vmatprep.mubr.bf16.mxu0 %v648_v22 }
  0x5b   : > { %4271 = vmatpush1.bf16.msra.mxu1 %v4454_v19 }
  0x5c   : > { %1348 = vmatpush1.bf16.msra.mxu0 %v4454_v19  ;;  %4256 = vmatprep.subr.bf16.mxu1 %v4459_v26 }
  0x5d   : > { %1349 = vmatprep.subr.bf16.mxu0 %v4459_v26 }
  0x5e   : > { %1282 = vmatmul.mubr.bf16.gmra.mrb[4].mxu1 %v645_v28 }
  0x5f   : > { %1335 = vmatmul.mubr.bf16.gmra.mrb[4].mxu0 %v647_v29  ;;  %4272 = vmatpush1.bf16.msra.mxu1 %v4457_v33 }
  0x60   : > { %1350 = vmatpush1.bf16.msra.mxu0 %v4457_v33  ;;  %4257 = vmatprep.subr.bf16.mxu1 %v4462_v34 }
  0x61   : > { %1351 = vmatprep.subr.bf16.mxu0 %v4462_v34  ;;  %1377 = vmatprep.mubr.bf16.mxu0 %v644_v35 }
  0x62   : > { %1387 = vmatprep.mubr.bf16.mxu1 %v650_v36 }
  0x63   : > { %4273 = vmatpush1.bf16.msra.mxu1 %v4460_v37 }
  0x64   : > { %1352 = vmatpush1.bf16.msra.mxu0 %v4460_v37  ;;  %4258 = vmatprep.subr.bf16.mxu1 %v4465_v38 }
  0x65   : > { %1353 = vmatprep.subr.bf16.mxu0 %v4465_v38 }
  0x67   : > { %4274 = vmatpush1.bf16.msra.mxu1 %v4463_v39 }
  0x68   : > { %1354 = vmatpush1.bf16.msra.mxu0 %v4463_v39  ;;  %4259 = vmatprep.subr.bf16.mxu1 %v4468_v40 }
  0x69   : > { %1355 = vmatprep.subr.bf16.mxu0 %v4468_v40 }
  0x6b   : > { %4275 = vmatpush1.bf16.msra.mxu1 %v4466_v41 }
  0x6c   : > { %1356 = vmatpush1.bf16.msra.mxu0 %v4466_v41  ;;  %4260 = vmatprep.subr.bf16.mxu1 %v4471_v42 }
  0x6d   : > { %1357 = vmatprep.subr.bf16.mxu0 %v4471_v42 }
  0x6f   : > { %4276 = vmatpush1.bf16.msra.mxu1 %v4469_v43 }
  0x70   : > { %1358 = vmatpush1.bf16.msra.mxu0 %v4469_v43  ;;  %4261 = vmatprep.subr.bf16.mxu1 %v4474_v44 }
  0x71   : > { %1359 = vmatprep.subr.bf16.mxu0 %v4474_v44 }
  0x73   : > { %4277 = vmatpush1.bf16.msra.mxu1 %v4472_v45 }
  0x74   : > { %1360 = vmatpush1.bf16.msra.mxu0 %v4472_v45  ;;  %4262 = vmatprep.subr.bf16.mxu1 %v4477_v46 }
  0x75   : > { %1361 = vmatprep.subr.bf16.mxu0 %v4477_v46 }
  0x77   : > { %4278 = vmatpush1.bf16.msra.mxu1 %v4475_v47 }
  0x78   : > { %1362 = vmatpush1.bf16.msra.mxu0 %v4475_v47  ;;  %4263 = vmatprep.subr.bf16.mxu1 %v4480_v48 }
  0x79   : > { %1363 = vmatprep.subr.bf16.mxu0 %v4480_v48 }
  0x7b   : > { %4279 = vmatpush1.bf16.msra.mxu1 %v4478_v49 }
  0x7c   : > { %1364 = vmatpush1.bf16.msra.mxu0 %v4478_v49  ;;  %4264 = vmatprep.subr.bf16.mxu1 %v4483_v50 }
  0x7d   : > { %1365 = vmatprep.subr.bf16.mxu0 %v4483_v50 }
  0x7f   : > { %4280 = vmatpush1.bf16.msra.mxu1 %v4481_v51 }
  0x80   : > { %1366 = vmatpush1.bf16.msra.mxu0 %v4481_v51  ;;  %4265 = vmatprep.subr.bf16.mxu1 %v4486_v52 }
  0x81   : > { %1367 = vmatprep.subr.bf16.mxu0 %v4486_v52 }
  0x83   : > { %4281 = vmatpush1.bf16.msra.mxu1 %v4484_v53 }
  0x84   : > { %1368 = vmatpush1.bf16.msra.mxu0 %v4484_v53  ;;  %4266 = vmatprep.subr.bf16.mxu1 %v4489_v54 }
  0x85   : > { %1369 = vmatprep.subr.bf16.mxu0 %v4489_v54 }
  0x87   : > { %4282 = vmatpush1.bf16.msra.mxu1 %v4487_v55 }
  0x88   : > { %1370 = vmatpush1.bf16.msra.mxu0 %v4487_v55  ;;  %4267 = vmatprep.subr.bf16.mxu1 %v4492_v56 }
  0x89   : > { %1371 = vmatprep.subr.bf16.mxu0 %v4492_v56 }
  0x8b   : > { %4283 = vmatpush1.bf16.msra.mxu1 %v4490_v57 }
  0x8c   : > { %1372 = vmatpush1.bf16.msra.mxu0 %v4490_v57  ;;  %4268 = vmatprep.subr.bf16.mxu1 %v4495_v58 }
  0x8d   : > { %1373 = vmatprep.subr.bf16.mxu0 %v4495_v58 }
  0x8f   : > { %4284 = vmatpush1.bf16.msra.mxu1 %v4493_v59 }
  0x90   : > { %1374 = vmatpush1.bf16.msra.mxu0 %v4493_v59  ;;  %4269 = vmatprep.subr.bf16.mxu1 %v4498_v60 }
  0x91   : > { %1375 = vmatprep.subr.bf16.mxu0 %v4498_v60 }
  0x93   : > { %4285 = vmatpush1.bf16.msra.mxu1 %v4496_v61 }
  0x94   : > { %1376 = vmatpush1.bf16.msra.mxu0 %v4496_v61 }
  0x96   : > { %1388 = vmatmul.mubr.bf16.vlgmr.msra.gmra.mrb[8].mxu1 %v649_v3 }
  0x97   : > { %1378 = vmatmul.mubr.bf16.vlgmr.msra.gmra.mrb[0].mxu0 %v643_v2 }
 0x129   : > { %v1273_v6 = vpop.f32.mrb[0].mxu1 }
 0x12a   : > { %v1275_v7 = vpop.f32.mrb[1].mxu1  ;;  %v1274_v31 = vadd.f32 %v1273_v6, %v752_v13 }
 0x12b   : > { %v1277_v8 = vpop.f32.mrb[2].mxu1  ;;  %v1276_v32 = vadd.f32 %v1275_v7, %v756_v14 }
 0x12c   : > { %v1279_v10 = vpop.f32.mrb[3].mxu1  ;;  %v1278_v35 = vadd.f32 %v1277_v8, %v752_v13 }
 0x12d   : > { %v1280_v40 = vadd.f32 %v1279_v10, %v756_v14 }
 0x131   : > { %v1283_v15 = vpop.f32.mrb[4].mxu1 }
 0x132   : > { %v1336_v16 = vpop.f32.mrb[4].mxu0  ;;  %v1284_v17 = vadd.f32 %v1283_v15, %v752_v13  ;;  %v1285_v18 = vpop.f32.mrb[5].mxu1 }
 0x133   : > { %v1338_v19 = vpop.f32.mrb[5].mxu0  ;;  %v1286_v20 = vadd.f32 %v1285_v18, %v756_v14  ;;  %v1287_v21 = vpop.f32.mrb[6].mxu1 }
 0x134   : > { %v1340_v22 = vpop.f32.mrb[6].mxu0  ;;  %v1288_v23 = vadd.f32 %v1287_v21, %v752_v13  ;;  %v1337_v24 = vadd.f32 %v1336_v16, %v1284_v17  ;;  %v1289_v25 = vpop.f32.mrb[7].mxu1 }
 0x135   : > { %v1342_v26 = vpop.f32.mrb[7].mxu0  ;;  %v1290_v27 = vadd.f32 %v1289_v25, %v756_v14  ;;  %v1339_v28 = vadd.f32 %v1338_v19, %v1286_v20 }
 0x136   : > { %v1341_v29 = vadd.f32 %v1340_v22, %v1288_v23 }
 0x137   : > { %v1343_v30 = vadd.f32 %v1342_v26, %v1290_v27 }
 0x169   : > { %v1389_v34 = vpop.f32.mrb[8].mxu1 }
 0x16a   : > { %v1379_v33 = vpop.f32.mrb[0].mxu0  ;;  %v1390_v37 = vadd.f32 %v1389_v34, %v1337_v24  ;;  %v1391_v39 = vpop.f32.mrb[9].mxu1 }
 0x16b   : > { %v4287_v36 = vadd.f32 %v1379_v33, %v1274_v31  ;;  %v1381_v38 = vpop.f32.mrb[1].mxu0  ;;  %v1392_v42 = vadd.f32 %v1391_v39, %v1339_v28  ;;  %v1393_v44 = vpop.f32.mrb[10].mxu1 }
 0x16c   : > { %v4289_v41 = vadd.f32 %v1381_v38, %v1276_v32  ;;  %v1383_v43 = vpop.f32.mrb[2].mxu0  ;;  %v1394_v46 = vadd.f32 %v1393_v44, %v1341_v29  ;;  %v1395_v48 = vpop.f32.mrb[11].mxu1  ;;  %v4853_v29 = vmov 0.0  }
 0x16d   : > { %v4291_v45 = vadd.f32 %v1383_v43, %v1278_v35  ;;  %v1385_v47 = vpop.f32.mrb[3].mxu0  ;;  %v1396_v50 = vadd.f32 %v1395_v48, %v1343_v30  ;;  %v1406_v51 = vsel %vm602_vm0, %v1392_v42, 0.0  ;;  %601 = vst [vmem:[#allocation2] sm:$0xff] %v4853_v29  ;;  %603 = vst.msk [vmem:[#allocation2 + $0x8] sm:$0xff] %vm602_vm0, %v4853_v29  ;;  %v1491_v43 = vld [vmem:[%s6358_s5] sm:$0x3] }
 0x16e   : > { %v4293_v49 = vadd.f32 %v1385_v47, %v1280_v40  ;;  %v1398_v52 = vsel %vm602_vm0, %v4289_v41, 0.0  ;;  %v1407_v53 = vadd.f32 %v1406_v51, %v1390_v37  ;;  %605 = vst.msk [vmem:[#allocation2 + $0x18] sm:$0xff] %vm602_vm0, %v4853_v29  ;;  %606 = vst [vmem:[#allocation2 + $0x20] sm:$0x3f] %v4853_v29  ;;  %v1496_v47 = vrot.slane %v1491_v43, %v5347_v9 }
 0x16f   : > { %v1399_v54 = vadd.f32 %v4287_v36, %v1398_v52  ;;  %v1410_v55 = vsel %vm602_vm0, %v1396_v50, 0.0  ;;  %609 = vst [vmem:[#allocation2 + $0x30] sm:$0xff] %v4853_v29  ;;  %610 = vst.msk [vmem:[#allocation2 + $0x38] sm:$0xff] %vm602_vm0, %v4853_v29  ;;  %v1500_v48 = vrot.slane %v1491_v43, %v5352_v12 }
 0x170   : > { %v1402_v56 = vsel %vm602_vm0, %v4293_v49, 0.0  ;;  %1408 = vadd.xlane.f32.xlu1 %v1407_v53  ;;  %v1411_v57 = vadd.f32 %v1410_v55, %v1394_v46  ;;  %612 = vst.msk [vmem:[#allocation2 + $0x48] sm:$0xff] %vm602_vm0, %v4853_v29  ;;  %613 = vst [vmem:[#allocation2 + $0x50] sm:$0x3f] %v4853_v29 }
 0x171   : > { %1400 = vadd.xlane.f32.xlu0 %v1399_v54  ;;  %v1403_v58 = vadd.f32 %v4291_v45, %v1402_v56  ;;  %608 = vst.msk [vmem:[#allocation2 + $0x28] sm:$0x3f] %vm607_vm1, %v4853_v29  ;;  %614 = vst.msk [vmem:[#allocation2 + $0x58] sm:$0x3f] %vm607_vm1, %v4853_v29 }
 0x174   : > { %1412 = vadd.xlane.f32.xlu1 %v1411_v57 }
 0x175   : > { %1404 = vadd.xlane.f32.xlu0 %v1403_v58 }
 0x1fd   : > { %v1409_v59 = vpop.xlane.xlu1 %1408 }
 0x1fe   : > { %v1401_v60 = vpop.xlane.xlu0 %1400  ;;  %v1417_v61 = vmul.f32 0.0052083335, %v1409_v59 }
 0x1ff   : > { %v1415_v62 = vmul.f32 0.0052083335, %v1401_v60 }
 0x200   : > { %v5360_v63 = vsub.f32 %v1392_v42, %v1417_v61  ;;  %v5366_v2 = vsub.f32 %v1390_v37, %v1417_v61  ;;  %v1471_v42 = vld [vmem:[%s6357_s24] sm:$0x3] }
 0x201   : > { %v5362_v0 = vsub.f32 %v4287_v36, %v1415_v62  ;;  %v5364_v1 = vsub.f32 %v4289_v41, %v1415_v62  ;;  %v1413_v3 = vpop.xlane.xlu1 %1412  ;;  %v1476_v44 = vrot.slane %v1471_v42, %v5347_v9 }
 0x202   : > { %v1405_v4 = vpop.xlane.xlu0 %1404  ;;  %v1418_v5 = vmul.f32 0.0052083335, %v1413_v3  ;;  %v1432_v10 = vmul.f32 %v5360_v63, %v5360_v63  ;;  %v1431_v18 = vmul.f32 %v5366_v2, %v5366_v2 }
 0x203   : > { %v1416_v6 = vmul.f32 0.0052083335, %v1405_v4  ;;  %v1427_v7 = vmul.f32 %v5362_v0, %v5362_v0  ;;  %v1428_v8 = vmul.f32 %v5364_v1, %v5364_v1 }
 0x204   : > { %v5374_v11 = vsub.f32 %v1396_v50, %v1418_v5  ;;  %v5376_v15 = vsub.f32 %v1394_v46, %v1418_v5  ;;  %v1443_v21 = vsel %vm602_vm0, %v1432_v10, 0.0 }
 0x205   : > { %v1421_v13 = vsub.f32 %v4291_v45, %v1416_v6  ;;  %v1422_v14 = vsub.f32 %v4293_v49, %v1416_v6  ;;  %v1435_v16 = vsel %vm602_vm0, %v1428_v8, 0.0  ;;  %v1444_v26 = vadd.f32 %v1443_v21, %v1431_v18 }
 0x206   : > { %v1436_v17 = vadd.f32 %v1435_v16, %v1427_v7  ;;  %v1434_v22 = vmul.f32 %v5374_v11, %v5374_v11  ;;  %v1433_v25 = vmul.f32 %v5376_v15, %v5376_v15  ;;  %v1480_v45 = vrot.slane %v1471_v42, %v5352_v12 }
 0x207   : > { %v1429_v19 = vmul.f32 %v1421_v13, %v1421_v13  ;;  %v1430_v20 = vmul.f32 %v1422_v14, %v1422_v14 }
 0x208   : > { %1437 = vadd.xlane.f32.xlu0 %v1436_v17  ;;  %v1447_v27 = vsel %vm602_vm0, %v1434_v22, 0.0 }
 0x209   : > { %v1439_v23 = vsel %vm602_vm0, %v1430_v20, 0.0  ;;  %v1448_v28 = vadd.f32 %v1447_v27, %v1433_v25 }
 0x20a   : > { %v1440_v24 = vadd.f32 %v1439_v23, %v1429_v19 }
 0x20c   : > { %1441 = vadd.xlane.f32.xlu1 %v1440_v24  ;;  %1445 = vadd.xlane.f32.xlu0 %v1444_v26 }
 0x210   : > { %1449 = vadd.xlane.f32.xlu1 %v1448_v28 }
 0x295   : > { %v1438_v30 = vpop.xlane.xlu0 %1437 }
 0x296   : > { %v1451_v31 = vmul.f32 0.0052083335, %v1438_v30 }
 0x298   : > { %v1455_v32 = vadd.f32 1e-06, %v1451_v31 }
 0x299   : > { %v1442_v33 = vpop.xlane.xlu1 %1441  ;;  %v1446_v35 = vpop.xlane.xlu0 %1445 }
 0x29a   : > { %v1452_v34 = vmul.f32 0.0052083335, %v1442_v33  ;;  %4499 = vrsqrt.f32 %v1455_v32  ;;  %v1453_v36 = vmul.f32 0.0052083335, %v1446_v35 }
 0x29c   : > { %v1456_v37 = vadd.f32 1e-06, %v1452_v34  ;;  %v1457_v38 = vadd.f32 1e-06, %v1453_v36 }
 0x29d   : > { %v1450_v39 = vpop.xlane.xlu1 %1449 }
 0x29e   : > { %4501 = vrsqrt.f32 %v1456_v37  ;;  %v1454_v40 = vmul.f32 0.0052083335, %v1450_v39 }
 0x29f   : > { %4503 = vrsqrt.f32 %v1457_v38 }
 0x2a0   : > { %v1458_v41 = vadd.f32 1e-06, %v1454_v40 }
 0x2a2   : > { %4505 = vrsqrt.f32 %v1458_v41 }
 0x2a4   : > { %v4500_v46 = vpop.eup %4499 }
 0x2a5   : > { %v1463_v49 = vmul.f32 %v4500_v46, %v5362_v0  ;;  %v1464_v50 = vmul.f32 %v4500_v46, %v5364_v1 }
 0x2a7   : > { %v1483_v52 = vmul.f32 %v1476_v44, %v1463_v49  ;;  %v1484_v53 = vmul.f32 %v1480_v45, %v1464_v50 }
 0x2a8   : > { %v4502_v51 = vpop.eup %4501 }
 0x2a9   : > { %v4504_v54 = vpop.eup %4503  ;;  %v1465_v55 = vmul.f32 %v4502_v51, %v1421_v13  ;;  %v1466_v56 = vmul.f32 %v4502_v51, %v1422_v14  ;;  %v1503_v57 = vadd.f32 %v1496_v47, %v1483_v52  ;;  %v1504_v58 = vadd.f32 %v1500_v48, %v1484_v53 }
 0x2aa   : > { %v1467_v59 = vmul.f32 %v4504_v54, %v5366_v2  ;;  %v1468_v60 = vmul.f32 %v4504_v54, %v5360_v63 }
 0x2ab   : > { %v1485_v9 = vmul.f32 %v1476_v44, %v1465_v55  ;;  %v1486_v61 = vmul.f32 %v1480_v45, %v1466_v56  ;;  %v1516_v62 = vrot.slane %v1503_v57, 5  ;;  %v1517_v0 = vrot.slane %v1504_v58, 5 }
 0x2ac   : > { %v4506_v12 = vpop.eup %4505  ;;  %v1487_v3 = vmul.f32 %v1476_v44, %v1467_v59  ;;  %v1488_v1 = vmul.f32 %v1480_v45, %v1468_v60 }
 0x2ad   : > { %v1505_v4 = vadd.f32 %v1496_v47, %v1485_v9  ;;  %v1506_v5 = vadd.f32 %v1500_v48, %v1486_v61  ;;  %v1469_v6 = vmul.f32 %v4506_v12, %v5376_v15  ;;  %v1470_v7 = vmul.f32 %v4506_v12, %v5374_v11  ;;  %1528 = vst [vmem:[#allocation2] sm:$0xf8] %v1516_v62 }
 0x2ae   : > { %1530 = vst.msk [vmem:[#allocation2 + $0x8] sm:$0xf8] %vm1529_vm2, %v1517_v0  ;;  %v1507_v63 = vadd.f32 %v1496_v47, %v1487_v3  ;;  %v1508_v2 = vadd.f32 %v1500_v48, %v1488_v1 }
 0x2af   : > { %v1518_v8 = vrot.slane %v1505_v4, 5  ;;  %v1520_v10 = vrot.slane %v1506_v5, 5  ;;  %v1489_v13 = vmul.f32 %v1476_v44, %v1469_v6  ;;  %v1490_v14 = vmul.f32 %v1480_v45, %v1470_v7 }
 0x2b0   : > { %v1540_v16 = vrot.slane %v1507_v63, 5  ;;  %v1541_v17 = vrot.slane %v1508_v2, 5 }
 0x2b1   : > { %v1519_v18 = vsel %vm1515_vm3, %v1516_v62, %v1518_v8  ;;  %v1521_v19 = vsel %vm1515_vm3, %v1517_v0, %v1520_v10  ;;  %1533 = vst [vmem:[#allocation2 + $0x20] sm:$0x7] %v1518_v8  ;;  %1535 = vst.msk [vmem:[#allocation2 + $0x28] sm:$0x7] %vm1534_vm4, %v1520_v10  ;;  %v1509_v11 = vadd.f32 %v1496_v47, %v1489_v13 }
 0x2b2   : > { %v1510_v15 = vadd.f32 %v1500_v48, %v1490_v14  ;;  %1531 = vst [vmem:[#allocation2 + $0x10] sm:$0xff] %v1519_v18  ;;  %1532 = vst.msk [vmem:[#allocation2 + $0x18] sm:$0xff] %vm602_vm0, %v1521_v19 }
 0x2b3   : > { %1553 = vst [vmem:[#allocation2 + $0x30] sm:$0xf8] %v1540_v16  ;;  %1554 = vst.msk [vmem:[#allocation2 + $0x38] sm:$0xf8] %vm1529_vm2, %v1541_v17  ;;  %v1542_v20 = vrot.slane %v1509_v11, 5 }
 0x2b4   : > { %v1544_v21 = vrot.slane %v1510_v15, 5 }
 0x2b5   : > { %v1543_v22 = vsel %vm1515_vm3, %v1540_v16, %v1542_v20  ;;  %1557 = vst [vmem:[#allocation2 + $0x50] sm:$0x7] %v1542_v20 }
 0x2b6   : > { %v1545_v23 = vsel %vm1515_vm3, %v1541_v17, %v1544_v21  ;;  %1558 = vst.msk [vmem:[#allocation2 + $0x58] sm:$0x7] %vm1534_vm4, %v1544_v21  ;;  %1555 = vst [vmem:[#allocation2 + $0x40] sm:$0xff] %v1543_v22 }
 0x2b7   : > { %1556 = vst.msk [vmem:[#allocation2 + $0x48] sm:$0xff] %vm602_vm0, %v1545_v23 }
 0x2b8 PF: > { %v1574_v24 = vlaneseq  ;;  %s6359_s19 = sld [smem:[#allocation8_spill]]  ;;  %s6360_s15 = scalar_lea.vmem %s6301_s6, %s4944_s17  ;;  %vm1641_vm5 = vcmask 1046528   ;;  %v5431_v29 = vld [vmem:[#allocation2] sm:$0xff]  ;;  %v5445_v34 = vld [vmem:[#allocation2 + $0x8] sm:$0xff]  ;;  %vm1710_vm6 = vcmask 1045504   ;;  %vm1779_vm7 = vcmask 1044480  }
 0x2b9   : > { %v1561_v28 = vld [vmem:[%s6360_s15] sm:$0x3]  ;;  %v5454_v38 = vld [vmem:[#allocation2 + $0x10] sm:$0xff]  ;;  %v5456_v39 = vld [vmem:[#allocation2 + $0x18] sm:$0xff]  ;;  %vm1848_vm8 = vcmask 1043456   ;;  %vm1917_vm9 = vcmask 1042432   ;;  %s6401_s29 = scalar_lea.vmem %s6302_s7, %s4944_s17  ;;  %s6403_s24 = scalar_lea.vmem %s6303_s8, %s4944_s17 }
 0x2ba   : > { %v5421_v26 = vshrl.u32 %v1574_v24, 7  ;;  %vm1986_vm10 = vcmask 1041408   ;;  %vm2024_vm11 = vcmask 523264   ;;  %vm3714_vm12 = vcmask 523267   ;;  %p4248_p5 = scmp.ne.s32.totalorder %s4938_s30, 2 }
 0x2bb   : > { %vm3719_vm13 = vcmask 518144  }
 0x2bc   : > { %v5434_v30 = vsub.s32 0, %v5421_v26  ;;  %v5437_v31 = vsub.s32 1, %v5421_v26  ;;  %v5440_v32 = vsub.s32 2, %v5421_v26  ;;  %v5443_v33 = vsub.s32 3, %v5421_v26 }
 0x2bd   : > { %v5448_v35 = vsub.s32 4, %v5421_v26  ;;  %v5451_v36 = vsub.s32 5, %v5421_v26  ;;  %v1956_v37 = vsub.s32 6, %v5421_v26 }
 0x2be   : > { %v5419_v25 = vld [vmem:[%s6359_s19] sm:$0x7f]  ;;  %v5424_v27 = vld [vmem:[%s6359_s19 + $0x8] sm:$0x7f]  ;;  %6361 = vst [vmem:[#allocation9_spill] sm:$0xff] %v5434_v30  ;;  %6362 = vst [vmem:[#allocation10_spill] sm:$0xff] %v5437_v31  ;;  %v5467_v42 = vrot.slane %v1561_v28, %v5434_v30  ;;  %v5470_v43 = vrot.slane %v1561_v28, %v5437_v31 }
 0x2bf   : > { %6363 = vst [vmem:[#allocation11_spill] sm:$0xff] %v5440_v32  ;;  %6364 = vst [vmem:[#allocation12_spill] sm:$0xff] %v5443_v33  ;;  %v5460_v40 = vrot.slane %v5419_v25, %v5434_v30  ;;  %v5464_v41 = vrot.slane %v5424_v27, %v5434_v30  ;;  %v5474_v44 = vrot.slane %v5419_v25, %v5437_v31  ;;  %v1566_v30 = vld [vmem:[#allocation2 + $0x20] sm:$0x3f] }
 0x2c0   : > { %6365 = vst [vmem:[#allocation13_spill] sm:$0xff] %v5448_v35  ;;  %6366 = vst [vmem:[#allocation14_spill] sm:$0xff] %v5451_v36  ;;  %v5478_v45 = vrot.slane %v5424_v27, %v5437_v31  ;;  %v5482_v46 = vrot.slane %v5419_v25, %v5440_v32  ;;  %v5486_v47 = vrot.slane %v5424_v27, %v5440_v32  ;;  %v1567_v31 = vld [vmem:[#allocation2 + $0x28] sm:$0x3f] }
 0x2c1   : > { %v1582_v48 = vmul.f32 %v5460_v40, %v5431_v29  ;;  %v1583_v49 = vmul.f32 %v5464_v41, %v5445_v34  ;;  %v5494_v50 = vrot.slane %v5419_v25, %v5443_v33  ;;  %v5498_v51 = vrot.slane %v5424_v27, %v5443_v33 }
 0x2c2   : > { %v1617_v52 = vmul.f32 %v5474_v44, %v5431_v29  ;;  %v1618_v53 = vmul.f32 %v5478_v45, %v5445_v34  ;;  %v5506_v54 = vmul.f32 %v5474_v44, %v5454_v38  ;;  %v5510_v55 = vmul.f32 %v5478_v45, %v5456_v39 }
 0x2c3   : > { %v1601_v56 = vadd.f32 %v5467_v42, %v1582_v48  ;;  %v1602_v57 = vadd.f32 %v5470_v43, %v1583_v49  ;;  %v1686_v58 = vmul.f32 %v5482_v46, %v5431_v29  ;;  %v1687_v59 = vmul.f32 %v5486_v47, %v5445_v34 }
 0x2c4   : > { %v1642_v60 = vrot.slane %v1617_v52, 1  ;;  %v6326_v9 = vrot.slane %v5506_v54, 1  ;;  %v1645_v61 = vrot.slane %v1618_v53, 1  ;;  %v6323_v12 = vrot.slane %v5510_v55, 1 }
 0x2c5   : > { %v5522_v62 = vmul.f32 %v5482_v46, %v5454_v38  ;;  %v5526_v0 = vmul.f32 %v5486_v47, %v5456_v39  ;;  %v1711_v3 = vrot.slane %v1686_v58, 2  ;;  %v1714_v1 = vrot.slane %v1687_v59, 2 }
 0x2c6   : > { %v1644_v4 = vsel %vm1641_vm5, %v1642_v60, %v6326_v9  ;;  %v1647_v5 = vsel %vm1641_vm5, %v1645_v61, %v6323_v12  ;;  %v1755_v6 = vmul.f32 %v5494_v50, %v5431_v29  ;;  %v1756_v7 = vmul.f32 %v5498_v51, %v5445_v34 }
 0x2c7   : > { %v1670_v63 = vadd.f32 %v1644_v4, %v1601_v56  ;;  %v1671_v2 = vadd.f32 %v1647_v5, %v1602_v57  ;;  %v6322_v8 = vrot.slane %v5522_v62, 2  ;;  %v6321_v10 = vrot.slane %v5526_v0, 2 }
 0x2c8   : > { %v5542_v13 = vmul.f32 %v5494_v50, %v5454_v38  ;;  %v5546_v14 = vmul.f32 %v5498_v51, %v5456_v39  ;;  %v1780_v16 = vrot.slane %v1755_v6, 3  ;;  %v1783_v17 = vrot.slane %v1756_v7, 3 }
 0x2c9   : > { %v1713_v18 = vsel %vm1710_vm6, %v1711_v3, %v6322_v8  ;;  %v1716_v19 = vsel %vm1710_vm6, %v1714_v1, %v6321_v10  ;;  %v5556_v11 = vrot.slane %v5419_v25, %v5448_v35  ;;  %v5560_v15 = vrot.slane %v5424_v27, %v5448_v35  ;;  %v5591_v3 = vld [vmem:[#allocation2 + $0x30] sm:$0xff]  ;;  %v5593_v1 = vld [vmem:[#allocation2 + $0x38] sm:$0xff] }
 0x2ca   : > { %v1739_v20 = vadd.f32 %v1713_v18, %v1670_v63  ;;  %v1740_v21 = vadd.f32 %v1716_v19, %v1671_v2  ;;  %v6319_v22 = vrot.slane %v5542_v13, 3  ;;  %v6315_v23 = vrot.slane %v5546_v14, 3 }
 0x2cb   : > { %v1824_v24 = vmul.f32 %v5556_v11, %v5431_v29  ;;  %v1825_v28 = vmul.f32 %v5560_v15, %v5445_v34  ;;  %v5570_v48 = vmul.f32 %v5556_v11, %v5454_v38  ;;  %v5574_v49 = vmul.f32 %v5560_v15, %v5456_v39 }
 0x2cc   : > { %v1782_v52 = vsel %vm1779_vm7, %v1780_v16, %v6319_v22  ;;  %v1785_v53 = vsel %vm1779_vm7, %v1783_v17, %v6315_v23  ;;  %v5584_v56 = vrot.slane %v5419_v25, %v5451_v36  ;;  %v5588_v57 = vrot.slane %v5424_v27, %v5451_v36 }
 0x2cd   : > { %v1808_v58 = vadd.f32 %v1782_v52, %v1739_v20  ;;  %v1809_v59 = vadd.f32 %v1785_v53, %v1740_v21  ;;  %v1849_v60 = vrot.slane %v1824_v24, 4  ;;  %v6314_v61 = vrot.slane %v5570_v48, 4 }
 0x2ce   : > { %v1852_v4 = vrot.slane %v1825_v28, 4  ;;  %v6313_v5 = vrot.slane %v5574_v49, 4  ;;  %v1893_v6 = vmul.f32 %v5584_v56, %v5431_v29  ;;  %v1894_v7 = vmul.f32 %v5588_v57, %v5445_v34 }
 0x2cf   : > { %v1851_v63 = vsel %vm1848_vm8, %v1849_v60, %v6314_v61  ;;  %v5605_v2 = vmul.f32 %v5584_v56, %v5454_v38  ;;  %v5609_v16 = vmul.f32 %v5588_v57, %v5456_v39  ;;  %v5614_v17 = vrot.slane %v5419_v25, %v1956_v37  ;;  %v5626_v25 = vld [vmem:[#allocation2 + $0x40] sm:$0xff] }
 0x2d0   : > { %v1854_v18 = vsel %vm1848_vm8, %v1852_v4, %v6313_v5  ;;  %v1877_v19 = vadd.f32 %v1851_v63, %v1808_v58  ;;  %v1918_v20 = vrot.slane %v1893_v6, 5  ;;  %v1921_v21 = vrot.slane %v1894_v7, 5  ;;  %v5634_v4 = vld [vmem:[#allocation2 + $0x48] sm:$0xff] }
 0x2d1   : > { %v1878_v24 = vadd.f32 %v1854_v18, %v1809_v59  ;;  %v6316_v28 = vrot.slane %v5605_v2, 5  ;;  %v6318_v52 = vrot.slane %v5609_v16, 5  ;;  %v5624_v53 = vrot.slane %v5424_v27, %v1956_v37 }
 0x2d2   : > { %v1962_v60 = vmul.f32 %v5614_v17, %v5431_v29  ;;  %v5632_v58 = vmul.f32 %v5614_v17, %v5454_v38  ;;  %v1586_v59 = vmul.f32 %v5460_v40, %v5591_v3  ;;  %v1587_v26 = vmul.f32 %v5464_v41, %v5593_v1 }
 0x2d3   : > { %v1920_v27 = vsel %vm1917_vm9, %v1918_v20, %v6316_v28  ;;  %v1923_v29 = vsel %vm1917_vm9, %v1921_v21, %v6318_v52  ;;  %v1963_v37 = vmul.f32 %v5624_v53, %v5445_v34  ;;  %v5650_v6 = vmul.f32 %v5624_v53, %v5456_v39 }
 0x2d4   : > { %v1946_v7 = vadd.f32 %v1920_v27, %v1877_v19  ;;  %v1947_v63 = vadd.f32 %v1923_v29, %v1878_v24  ;;  %v1987_v18 = vrot.slane %v1962_v60, 6  ;;  %v6317_v5 = vrot.slane %v5632_v58, 6 }
 0x2d5   : > { %v1990_v61 = vrot.slane %v1963_v37, 6  ;;  %v6320_v23 = vrot.slane %v5650_v6, 6  ;;  %v1605_v20 = vadd.f32 %v5467_v42, %v1586_v59  ;;  %v1606_v28 = vadd.f32 %v5470_v43, %v1587_v26 }
 0x2d6   : > { %v1989_v34 = vsel %vm1986_vm10, %v1987_v18, %v6317_v5  ;;  %v1623_v21 = vmul.f32 %v5474_v44, %v5591_v3  ;;  %v1624_v19 = vmul.f32 %v5478_v45, %v5593_v1  ;;  %v5665_v24 = vmul.f32 %v5474_v44, %v5626_v25 }
 0x2d7   : > { %v1992_v60 = vsel %vm1986_vm10, %v1990_v61, %v6320_v23  ;;  %v5670_v59 = vadd.f32 %v1989_v34, %v1946_v7  ;;  %v5674_v26 = vmul.f32 %v5478_v45, %v5634_v4  ;;  %v1692_v27 = vmul.f32 %v5482_v46, %v5591_v3 }
 0x2d8   : > { %v2016_v29 = vadd.f32 %v1992_v60, %v1947_v63  ;;  %v1652_v37 = vrot.slane %v1623_v21, 1  ;;  %v6324_v18 = vrot.slane %v5665_v24, 1  ;;  %v1655_v5 = vrot.slane %v1624_v19, 1 }
 0x2d9   : > { %6367 = vst [vmem:[#allocation15_spill] sm:$0xff] %v5670_v59  ;;  %v6325_v52 = vrot.slane %v5674_v26, 1  ;;  %v1693_v22 = vmul.f32 %v5486_v47, %v5593_v1  ;;  %v5684_v61 = vmul.f32 %v5482_v46, %v5626_v25  ;;  %v5688_v7 = vmul.f32 %v5486_v47, %v5634_v4 }
 0x2da   : > { %2025 = vst.msk [vmem:[#allocation3 + $0x8] sm:$0xff] %vm2024_vm11, %v2016_v29  ;;  %v1654_v63 = vsel %vm1641_vm5, %v1652_v37, %v6324_v18  ;;  %v1721_v34 = vrot.slane %v1692_v27, 2  ;;  %v1761_v21 = vmul.f32 %v5494_v50, %v5591_v3  ;;  %v1762_v19 = vmul.f32 %v5498_v51, %v5593_v1 }
 0x2db   : > { %v1657_v60 = vsel %vm1641_vm5, %v1655_v5, %v6325_v52  ;;  %v1674_v23 = vadd.f32 %v1654_v63, %v1605_v20  ;;  %v6329_v10 = vrot.slane %v5684_v61, 2  ;;  %v1724_v8 = vrot.slane %v1693_v22, 2 }
 0x2dc   : > { %v1675_v29 = vadd.f32 %v1657_v60, %v1606_v28  ;;  %v6328_v12 = vrot.slane %v5688_v7, 2  ;;  %v5705_v27 = vmul.f32 %v5494_v50, %v5626_v25  ;;  %v5709_v37 = vmul.f32 %v5498_v51, %v5634_v4 }
 0x2dd   : > { %v1723_v18 = vsel %vm1710_vm6, %v1721_v34, %v6329_v10  ;;  %v1790_v5 = vrot.slane %v1761_v21, 3  ;;  %v1793_v20 = vrot.slane %v1762_v19, 3  ;;  %v1830_v22 = vmul.f32 %v5556_v11, %v5591_v3 }
 0x2de   : > { %v1726_v28 = vsel %vm1710_vm6, %v1724_v8, %v6328_v12  ;;  %v1743_v63 = vadd.f32 %v1723_v18, %v1674_v23  ;;  %v6332_v60 = vrot.slane %v5705_v27, 3  ;;  %v6333_v52 = vrot.slane %v5709_v37, 3 }
 0x2df   : > { %v1744_v9 = vadd.f32 %v1726_v28, %v1675_v29  ;;  %v1831_v36 = vmul.f32 %v5560_v15, %v5593_v1  ;;  %v5725_v34 = vmul.f32 %v5556_v11, %v5626_v25  ;;  %v5729_v21 = vmul.f32 %v5560_v15, %v5634_v4 }
 0x2e0   : > { %v1792_v8 = vsel %vm1779_vm7, %v1790_v5, %v6332_v60  ;;  %v1795_v23 = vsel %vm1779_vm7, %v1793_v20, %v6333_v52  ;;  %v1859_v18 = vrot.slane %v1830_v22, 4  ;;  %v1899_v19 = vmul.f32 %v5584_v56, %v5591_v3 }
 0x2e1   : > { %v5739_v29 = vld [vmem:[#allocation3 + $0x8] sm:$0xff]  ;;  %v1812_v28 = vadd.f32 %v1792_v8, %v1743_v63  ;;  %v1813_v12 = vadd.f32 %v1795_v23, %v1744_v9  ;;  %v6342_v10 = vrot.slane %v5725_v34, 4  ;;  %v1862_v35 = vrot.slane %v1831_v36, 4 }
 0x2e2   : > { %6368 = vst [vmem:[#allocation16_spill] sm:$0xff] %v5739_v29  ;;  %v2040_v33 = vsel %vm2024_vm11, %v5739_v29, 0.0  ;;  %v6341_v5 = vrot.slane %v5729_v21, 4  ;;  %v1900_v60 = vmul.f32 %v5588_v57, %v5593_v1  ;;  %v5749_v20 = vmul.f32 %v5584_v56, %v5626_v25 }
 0x2e3   : > { %v2041_v22 = vadd.f32 %v2040_v33, %v5670_v59  ;;  %v1861_v9 = vsel %vm1848_vm8, %v1859_v18, %v6342_v10  ;;  %v5757_v36 = vmul.f32 %v5588_v57, %v5634_v4  ;;  %v1928_v63 = vrot.slane %v1899_v19, 5 }
 0x2e4   : > { %6369 = vst [vmem:[#allocation17_spill] sm:$0xff] %v5749_v20  ;;  %v1864_v8 = vsel %vm1848_vm8, %v1862_v35, %v6341_v5  ;;  %v1881_v23 = vadd.f32 %v1861_v9, %v1812_v28  ;;  %v6340_v52 = vrot.slane %v5749_v20, 5  ;;  %v1931_v32 = vrot.slane %v1900_v60, 5 }
 0x2e5   : > { %6370 = vst [vmem:[#allocation18_spill] sm:$0xff] %v5757_v36  ;;  %2042 = vadd.xlane.f32.xlu0 %v2041_v22  ;;  %v1882_v33 = vadd.f32 %v1864_v8, %v1813_v12  ;;  %v6345_v29 = vrot.slane %v5757_v36, 5  ;;  %v1968_v18 = vmul.f32 %v5614_v17, %v5591_v3  ;;  %v1969_v19 = vmul.f32 %v5624_v53, %v5593_v1 }
 0x2e6   : > { %v1930_v35 = vsel %vm1917_vm9, %v1928_v63, %v6340_v52  ;;  %v5773_v28 = vmul.f32 %v5614_v17, %v5626_v25  ;;  %v5777_v60 = vmul.f32 %v5624_v53, %v5634_v4  ;;  %v1584_v12 = vmul.f32 %v5460_v40, %v5454_v38 }
 0x2e7   : > { %v1933_v3 = vsel %vm1917_vm9, %v1931_v32, %v6345_v29  ;;  %v1950_v1 = vadd.f32 %v1930_v35, %v1881_v23  ;;  %v1997_v22 = vrot.slane %v1968_v18, 6  ;;  %v2000_v9 = vrot.slane %v1969_v19, 6 }
 0x2e8   : > { %6371 = vst [vmem:[#allocation19_spill] sm:$0xff] %v5773_v28  ;;  %v1951_v8 = vadd.f32 %v1933_v3, %v1882_v33  ;;  %v6349_v63 = vrot.slane %v5773_v28, 6  ;;  %v6348_v52 = vrot.slane %v5777_v60, 6  ;;  %v1585_v5 = vmul.f32 %v5464_v41, %v5456_v39 }
 0x2e9   : > { %v1603_v10 = vadd.f32 %v5467_v42, %v1584_v12  ;;  %v1621_v59 = vmul.f32 %v5474_v44, %v1566_v30  ;;  %v1622_v38 = vmul.f32 %v5478_v45, %v1567_v31  ;;  %v1690_v36 = vmul.f32 %v5482_v46, %v1566_v30 }
 0x2ea   : > { %v1999_v32 = vsel %vm1986_vm10, %v1997_v22, %v6349_v63  ;;  %v2002_v23 = vsel %vm1986_vm10, %v2000_v9, %v6348_v52  ;;  %v1604_v33 = vadd.f32 %v5470_v43, %v1585_v5  ;;  %v1691_v39 = vmul.f32 %v5486_v47, %v1567_v31 }
 0x2eb   : > { %v5800_v18 = vadd.f32 %v1999_v32, %v1950_v1  ;;  %v2020_v19 = vadd.f32 %v2002_v23, %v1951_v8  ;;  %v1648_v35 = vrot.slane %v1621_v59, 1  ;;  %v1650_v12 = vrot.slane %v1622_v38, 1 }
 0x2ec   : > { %v1717_v3 = vrot.slane %v1690_v36, 2  ;;  %v1719_v29 = vrot.slane %v1691_v39, 2  ;;  %v1759_v20 = vmul.f32 %v5494_v50, %v1566_v30  ;;  %v1760_v28 = vmul.f32 %v5498_v51, %v1567_v31 }
 0x2ed   : > { %2029 = vst.msk [vmem:[#allocation3 + $0x28] sm:$0xff] %vm2024_vm11, %v2020_v19  ;;  %v6372_v22 = vrot.slane %v5506_v54, 1  ;;  %v6373_v5 = vrot.slane %v5510_v55, 1  ;;  %v1828_v8 = vmul.f32 %v5556_v11, %v1566_v30  ;;  %v1829_v59 = vmul.f32 %v5560_v15, %v1567_v31 }
 0x2ee   : > { %v6374_v32 = vrot.slane %v5522_v62, 2  ;;  %v6375_v39 = vrot.slane %v5526_v0, 2  ;;  %v1786_v19 = vrot.slane %v1759_v20, 3  ;;  %v1898_v63 = vmul.f32 %v5588_v57, %v1567_v31 }
 0x2ef   : > { %v1649_v9 = vsel %vm1641_vm5, %v6372_v22, %v1648_v35  ;;  %v1651_v1 = vsel %vm1641_vm5, %v6373_v5, %v1650_v12  ;;  %v1788_v35 = vrot.slane %v1760_v28, 3  ;;  %v1855_v22 = vrot.slane %v1828_v8, 4 }
 0x2f0   : > { %v1672_v36 = vadd.f32 %v1649_v9, %v1603_v10  ;;  %v1673_v38 = vadd.f32 %v1651_v1, %v1604_v33  ;;  %v1718_v23 = vsel %vm1710_vm6, %v6374_v32, %v1717_v3  ;;  %v1720_v54 = vsel %vm1710_vm6, %v6375_v39, %v1719_v29 }
 0x2f1   : > { %v1857_v55 = vrot.slane %v1829_v59, 4  ;;  %v1897_v5 = vmul.f32 %v5584_v56, %v1566_v30  ;;  %v6376_v10 = vrot.slane %v5542_v13, 3  ;;  %v6377_v33 = vrot.slane %v5546_v14, 3  ;;  %v1573_v13 = vld [vmem:[#allocation2 + $0x58] sm:$0x3f] }
 0x2f2   : > { %v1741_v52 = vadd.f32 %v1718_v23, %v1672_v36  ;;  %v1742_v12 = vadd.f32 %v1720_v54, %v1673_v38  ;;  %v6378_v29 = vrot.slane %v5570_v48, 4  ;;  %v6379_v28 = vrot.slane %v5574_v49, 4  ;;  %v1572_v36 = vld [vmem:[#allocation2 + $0x50] sm:$0x3f] }
 0x2f3   : > { %v1787_v62 = vsel %vm1779_vm7, %v6376_v10, %v1786_v19  ;;  %v1789_v0 = vsel %vm1779_vm7, %v6377_v33, %v1788_v35  ;;  %v1924_v8 = vrot.slane %v1897_v5, 5  ;;  %v1926_v59 = vrot.slane %v1898_v63, 5 }
 0x2f4   : > { %v1856_v20 = vsel %vm1848_vm8, %v6378_v29, %v1855_v22  ;;  %v1858_v3 = vsel %vm1848_vm8, %v6379_v28, %v1857_v55  ;;  %v1810_v9 = vadd.f32 %v1787_v62, %v1741_v52  ;;  %v1811_v1 = vadd.f32 %v1789_v0, %v1742_v12  ;;  %v5839_v23 = vld [vmem:[#allocation3 + $0x28] sm:$0xff] }
 0x2f5   : > { %v1966_v38 = vmul.f32 %v5614_v17, %v1566_v30  ;;  %v1967_v14 = vmul.f32 %v5624_v53, %v1567_v31  ;;  %v1588_v32 = vmul.f32 %v5460_v40, %v5626_v25  ;;  %v1589_v48 = vmul.f32 %v5464_v41, %v5634_v4 }
 0x2f6   : > { %v1879_v49 = vadd.f32 %v1856_v20, %v1810_v9  ;;  %v1880_v39 = vadd.f32 %v1858_v3, %v1811_v1  ;;  %v6380_v52 = vrot.slane %v5605_v2, 5  ;;  %v6381_v54 = vrot.slane %v5609_v16, 5 }
 0x2f7   : > { %v2048_v31 = vsel %vm2024_vm11, %v5839_v23, 0.0  ;;  %v1993_v19 = vrot.slane %v1966_v38, 6  ;;  %v1995_v40 = vrot.slane %v1967_v14, 6  ;;  %v1607_v25 = vadd.f32 %v5467_v42, %v1588_v32 }
 0x2f8   : > { %v1925_v63 = vsel %vm1917_vm9, %v6380_v52, %v1924_v8  ;;  %v1927_v30 = vsel %vm1917_vm9, %v6381_v54, %v1926_v59  ;;  %v2049_v41 = vadd.f32 %v2048_v31, %v5800_v18  ;;  %v1608_v22 = vadd.f32 %v5470_v43, %v1589_v48 }
 0x2f9   : > { %v1948_v4 = vadd.f32 %v1925_v63, %v1879_v49  ;;  %v1949_v35 = vadd.f32 %v1927_v30, %v1880_v39  ;;  %v6382_v2 = vrot.slane %v5632_v58, 6  ;;  %v6383_v16 = vrot.slane %v5650_v6, 6 }
 0x2fa   : > { %v1627_v5 = vmul.f32 %v5474_v44, %v1572_v36  ;;  %v1628_v10 = vmul.f32 %v5478_v45, %v1573_v13  ;;  %2050 = vadd.xlane.f32.xlu1 %v2049_v41  ;;  %v1696_v33 = vmul.f32 %v5482_v46, %v1572_v36  ;;  %v1697_v43 = vmul.f32 %v5486_v47, %v1573_v13 }
 0x2fb   : > { %v1994_v55 = vsel %vm1986_vm10, %v6382_v2, %v1993_v19  ;;  %v1996_v12 = vsel %vm1986_vm10, %v6383_v16, %v1995_v40  ;;  %v1765_v29 = vmul.f32 %v5494_v50, %v1572_v36  ;;  %v1766_v6 = vmul.f32 %v5498_v51, %v1573_v13  ;;  %v6396_v16 = vld [vmem:[#allocation19_spill] sm:$0xff] }
 0x2fc   : > { %v5860_v42 = vadd.f32 %v1994_v55, %v1948_v4  ;;  %v2018_v62 = vadd.f32 %v1996_v12, %v1949_v35  ;;  %v1658_v0 = vrot.slane %v1627_v5, 1  ;;  %v1660_v58 = vrot.slane %v1628_v10, 1 }
 0x2fd   : > { %v1727_v20 = vrot.slane %v1696_v33, 2  ;;  %v1729_v44 = vrot.slane %v1697_v43, 2  ;;  %v1834_v45 = vmul.f32 %v5556_v11, %v1572_v36  ;;  %v1835_v28 = vmul.f32 %v5560_v15, %v1573_v13 }
 0x2fe   : > { %2027 = vst.msk [vmem:[#allocation3 + $0x18] sm:$0xff] %vm2024_vm11, %v2018_v62  ;;  %v6384_v3 = vrot.slane %v5665_v24, 1  ;;  %v6385_v47 = vrot.slane %v5674_v26, 1  ;;  %v1796_v1 = vrot.slane %v1765_v29, 3  ;;  %v1798_v50 = vrot.slane %v1766_v6, 3 }
 0x2ff   : > { %v6386_v59 = vrot.slane %v5684_v61, 2  ;;  %v6387_v11 = vrot.slane %v5688_v7, 2  ;;  %v6388_v24 = vrot.slane %v5705_v27, 3  ;;  %v6389_v26 = vrot.slane %v5709_v37, 3 }
 0x300   : > { %v1659_v46 = vsel %vm1641_vm5, %v6384_v3, %v1658_v0  ;;  %v1661_v9 = vsel %vm1641_vm5, %v6385_v47, %v1660_v58  ;;  %v1865_v48 = vrot.slane %v1834_v45, 4  ;;  %v1867_v49 = vrot.slane %v1835_v28, 4  ;;  %v4510_v45 = vld [vmem:[%s4974_s23 + $0xc] ss:$24 sps:$4 sm:$0xff]   ;;  %v4512_v28 = vld [vmem:[%s4974_s23 + $0x8] ss:$24 sps:$4 sm:$0xff]  }
 0x301   : > { %v1676_v8 = vadd.f32 %v1659_v46, %v1607_v25  ;;  %v1677_v51 = vadd.f32 %v1661_v9, %v1608_v22  ;;  %v1728_v38 = vsel %vm1710_vm6, %v6386_v59, %v1727_v20  ;;  %v1730_v15 = vsel %vm1710_vm6, %v6387_v11, %v1729_v44  ;;  %v4507_v20 = vld [vmem:[%s4974_s23 + $0x4] ss:$24 sps:$4 sm:$0xff]   ;;  %v4509_v44 = vld [vmem:[%s4974_s23] ss:$24 sps:$4 sm:$0xff]   ;;  %v4513_v3 = vld [vmem:[%s4974_s23 + $0x34] ss:$24 sps:$4 sm:$0xff]   ;;  %2680 = vmatprep.subr.bf16.mxu1 %v4510_v45 }
 0x302   : > { %v1797_v14 = vsel %vm1779_vm7, %v6388_v24, %v1796_v1  ;;  %v1799_v32 = vsel %vm1779_vm7, %v6389_v26, %v1798_v50  ;;  %v1903_v61 = vmul.f32 %v5584_v56, %v1572_v36  ;;  %v1904_v63 = vmul.f32 %v5588_v57, %v1573_v13  ;;  %2627 = vmatprep.subr.bf16.mxu0 %v4507_v20  ;;  %v4516_v46 = vld [vmem:[%s4974_s23 + $0x3c] ss:$24 sps:$4 sm:$0xff]   ;;  %v4515_v47 = vld [vmem:[%s4974_s23 + $0x30] ss:$24 sps:$4 sm:$0xff]   ;;  %v4522_v50 = vld [vmem:[%s4974_s23 + $0x6c] ss:$24 sps:$4 sm:$0xff]  }
 0x303   : > { %v1745_v39 = vadd.f32 %v1728_v38, %v1676_v8  ;;  %v1746_v52 = vadd.f32 %v1730_v15, %v1677_v51  ;;  %v6390_v7 = vrot.slane %v5725_v34, 4  ;;  %v6391_v27 = vrot.slane %v5729_v21, 4  ;;  %v6392_v21 = vld [vmem:[#allocation17_spill] sm:$0xff]  ;;  %2628 = vmatpush1.bf16.msra.mxu0 %v4509_v44  ;;  %2681 = vmatpush1.bf16.msra.mxu1 %v4512_v28  ;;  %v4518_v9 = vld [vmem:[%s4974_s23 + $0x38] ss:$24 sps:$4 sm:$0xff]  }
 0x304   : > { %v1972_v37 = vmul.f32 %v5614_v17, %v1572_v36  ;;  %v1973_v31 = vmul.f32 %v5624_v53, %v1573_v13  ;;  %v1934_v25 = vrot.slane %v1903_v61, 5  ;;  %v1936_v41 = vrot.slane %v1904_v63, 5  ;;  %v6394_v36 = vld [vmem:[#allocation18_spill] sm:$0xff]  ;;  %2629 = vmatprep.subr.bf16.mxu0 %v4513_v3  ;;  %2682 = vmatprep.subr.bf16.mxu1 %v4516_v46  ;;  %v4519_v1 = vld [vmem:[%s4974_s23 + $0x64] ss:$24 sps:$4 sm:$0xff]  }
 0x305   : > { %v1866_v54 = vsel %vm1848_vm8, %v6390_v7, %v1865_v48  ;;  %v1868_v30 = vsel %vm1848_vm8, %v6391_v27, %v1867_v49  ;;  %v1814_v19 = vadd.f32 %v1797_v14, %v1745_v39  ;;  %v1815_v40 = vadd.f32 %v1799_v32, %v1746_v52  ;;  %v5897_v4 = vld [vmem:[#allocation3 + $0x18] sm:$0xff]  ;;  %v4524_v51 = vld [vmem:[%s4974_s23 + $0x68] ss:$24 sps:$4 sm:$0xff]   ;;  %v4525_v59 = vld [vmem:[%s4974_s23 + $0x94] ss:$24 sps:$4 sm:$0xff]  }
 0x306   : > { %v2003_v56 = vrot.slane %v1972_v37, 6  ;;  %v2005_v57 = vrot.slane %v1973_v31, 6  ;;  %v2044_v34 = vsel %vm2024_vm11, %v5897_v4, 0.0  ;;  %v6393_v2 = vrot.slane %v6392_v21, 5  ;;  %v4521_v8 = vld [vmem:[%s4974_s23 + $0x60] ss:$24 sps:$4 sm:$0xff]  }
 0x307   : > { %v1883_v35 = vadd.f32 %v1866_v54, %v1814_v19  ;;  %v1884_v22 = vadd.f32 %v1868_v30, %v1815_v40  ;;  %v2045_v53 = vadd.f32 %v2044_v34, %v5860_v42  ;;  %v6395_v13 = vrot.slane %v6394_v36, 5  ;;  %2630 = vmatpush1.bf16.msra.mxu0 %v4515_v47  ;;  %2683 = vmatpush1.bf16.msra.mxu1 %v4518_v9  ;;  %v4528_v38 = vld [vmem:[%s4974_s23 + $0x9c] ss:$24 sps:$4 sm:$0xff]   ;;  %v4527_v11 = vld [vmem:[%s4974_s23 + $0x90] ss:$24 sps:$4 sm:$0xff]  }
 0x308   : > { %v1935_v17 = vsel %vm1917_vm9, %v6393_v2, %v1934_v25  ;;  %v6397_v12 = vrot.slane %v6396_v16, 6  ;;  %v6398_v10 = vrot.slane %v5777_v60, 6  ;;  %2631 = vmatprep.subr.bf16.mxu0 %v4519_v1  ;;  %2684 = vmatprep.subr.bf16.mxu1 %v4522_v50  ;;  %v4530_v15 = vld [vmem:[%s4974_s23 + $0x98] ss:$24 sps:$4 sm:$0xff]   ;;  %v4531_v24 = vld [vmem:[%s4974_s23 + $0xc4] ss:$24 sps:$4 sm:$0xff]  }
 0x309   : > { %v1937_v55 = vsel %vm1917_vm9, %v6395_v13, %v1936_v41  ;;  %v1952_v33 = vadd.f32 %v1935_v17, %v1883_v35  ;;  %2046 = vadd.xlane.f32.xlu0 %v2045_v53  ;;  %v4534_v14 = vld [vmem:[%s4974_s23 + $0xcc] ss:$24 sps:$4 sm:$0xff]   ;;  %v4533_v26 = vld [vmem:[%s4974_s23 + $0xc0] ss:$24 sps:$4 sm:$0xff]   ;;  %v6399_v52 = vld [vmem:[#allocation15_spill] sm:$0xff] }
 0x30a   : > { %v2004_v5 = vsel %vm1986_vm10, %v6397_v12, %v2003_v56  ;;  %v2006_v62 = vsel %vm1986_vm10, %v6398_v10, %v2005_v57  ;;  %v1953_v43 = vadd.f32 %v1937_v55, %v1884_v22  ;;  %v4536_v32 = vld [vmem:[%s4974_s23 + $0xc8] ss:$24 sps:$4 sm:$0xff]   ;;  %v4537_v48 = vld [vmem:[%s4974_s23 + $0xf4] ss:$24 sps:$4 sm:$0xff]   ;;  %v6400_v63 = vld [vmem:[#allocation16_spill] sm:$0xff] }
 0x30b   : > { %v5914_v0 = vadd.f32 %v2004_v5, %v1952_v33  ;;  %2632 = vmatpush1.bf16.msra.mxu0 %v4521_v8  ;;  %2685 = vmatpush1.bf16.msra.mxu1 %v4524_v51  ;;  %v4539_v35 = vld [vmem:[%s4974_s23 + $0xf0] ss:$24 sps:$4 sm:$0xff]   ;;  %v4540_v22 = vld [vmem:[%s4974_s23 + $0xfc] ss:$24 sps:$4 sm:$0xff]   ;;  %v4557_v28 = vld [vmem:[%s4974_s23 + $0x180] ss:$24 sps:$4 sm:$0xff]  }
 0x30c   : > { %v2022_v58 = vadd.f32 %v2006_v62, %v1953_v43  ;;  %2633 = vmatprep.subr.bf16.mxu0 %v4525_v59  ;;  %2686 = vmatprep.subr.bf16.mxu1 %v4528_v38  ;;  %v4542_v21 = vld [vmem:[%s4974_s23 + $0xf8] ss:$24 sps:$4 sm:$0xff]   ;;  %v4543_v2 = vld [vmem:[%s4974_s23 + $0x124] ss:$24 sps:$4 sm:$0xff]   ;;  %v4560_v46 = vld [vmem:[%s4974_s23 + $0x188] ss:$24 sps:$4 sm:$0xff]  }
 0x30d   : > { %v4552_v20 = vld [vmem:[%s4974_s23 + $0x15c] ss:$24 sps:$4 sm:$0xff]   ;;  %v4554_v44 = vld [vmem:[%s4974_s23 + $0x158] ss:$24 sps:$4 sm:$0xff]   ;;  %v4558_v3 = vld [vmem:[%s4974_s23 + $0x18c] ss:$24 sps:$4 sm:$0xff]  }
 0x30e   : > { %2031 = vst.msk [vmem:[#allocation3 + $0x38] sm:$0xff] %vm2024_vm11, %v2022_v58  ;;  %v4545_v58 = vld [vmem:[%s4974_s23 + $0x120] ss:$24 sps:$4 sm:$0xff]   ;;  %v4555_v45 = vld [vmem:[%s4974_s23 + $0x184] ss:$24 sps:$4 sm:$0xff]  }
 0x30f   : > { %2634 = vmatpush1.bf16.msra.mxu0 %v4527_v11  ;;  %2687 = vmatpush1.bf16.msra.mxu1 %v4530_v15  ;;  %v4561_v47 = vld [vmem:[%s4974_s23 + $0x1b4] ss:$24 sps:$4 sm:$0xff]   ;;  %v4563_v9 = vld [vmem:[%s4974_s23 + $0x1b0] ss:$24 sps:$4 sm:$0xff]   ;;  %v4567_v8 = vld [vmem:[%s4974_s23 + $0x1e4] ss:$24 sps:$4 sm:$0xff]  }
 0x310   : > { %2635 = vmatprep.subr.bf16.mxu0 %v4531_v24  ;;  %2688 = vmatprep.subr.bf16.mxu1 %v4534_v14  ;;  %v4564_v1 = vld [vmem:[%s4974_s23 + $0x1bc] ss:$24 sps:$4 sm:$0xff]   ;;  %v4566_v50 = vld [vmem:[%s4974_s23 + $0x1b8] ss:$24 sps:$4 sm:$0xff]   ;;  %v4570_v59 = vld [vmem:[%s4974_s23 + $0x1ec] ss:$24 sps:$4 sm:$0xff]  }
 0x311   : > { %v4569_v51 = vld [vmem:[%s4974_s23 + $0x1e0] ss:$24 sps:$4 sm:$0xff]   ;;  %v4573_v11 = vld [vmem:[%s4974_s23 + $0x214] ss:$24 sps:$4 sm:$0xff]   ;;  %v4575_v15 = vld [vmem:[%s4974_s23 + $0x210] ss:$24 sps:$4 sm:$0xff]  }
 0x312   : > { %v4572_v38 = vld [vmem:[%s4974_s23 + $0x1e8] ss:$24 sps:$4 sm:$0xff]   ;;  %v4576_v24 = vld [vmem:[%s4974_s23 + $0x21c] ss:$24 sps:$4 sm:$0xff]   ;;  %v4578_v14 = vld [vmem:[%s4974_s23 + $0x218] ss:$24 sps:$4 sm:$0xff]  }
 0x313   : > { %2636 = vmatpush1.bf16.msra.mxu0 %v4533_v26  ;;  %2689 = vmatpush1.bf16.msra.mxu1 %v4536_v32  ;;  %v4581_v26 = vld [vmem:[%s4974_s23 + $0x14] ss:$24 sps:$4 sm:$0xff]  }
 0x314   : > { %2637 = vmatprep.subr.bf16.mxu0 %v4537_v48  ;;  %2690 = vmatprep.subr.bf16.mxu1 %v4540_v22  ;;  %v4617_v32 = vld [vmem:[%s4984_s14 + $0x104] ss:$8 sps:$4 sm:$0xff]  }
 0x315   : > { %v5917_v29 = vld [vmem:[#allocation3 + $0x38] sm:$0xff]  ;;  %v6404_v22 = vld [vmem:[#allocation9_spill] sm:$0xff] }
 0x316   : > { %v2052_v6 = vsel %vm2024_vm11, %v5917_v29, 0.0 }
 0x317   : > { %v2053_v60 = vadd.f32 %v2052_v6, %v5914_v0  ;;  %2638 = vmatpush1.bf16.msra.mxu0 %v4539_v35  ;;  %2691 = vmatpush1.bf16.msra.mxu1 %v4542_v21  ;;  %v4548_v6 = vld [vmem:[%s4974_s23 + $0x128] ss:$24 sps:$4 sm:$0xff]  }
 0x318   : > { %2639 = vmatprep.subr.bf16.mxu0 %v4543_v2 }
 0x319   : > { %2054 = vadd.xlane.f32.xlu1 %v2053_v60  ;;  %v4551_v60 = vld [vmem:[%s4974_s23 + $0x150] ss:$24 sps:$4 sm:$0xff]  }
 0x31b   : > { %2640 = vmatpush1.bf16.msra.mxu0 %v4545_v58 }
 0x372   : > { %v2043_v49 = vpop.xlane.xlu0 %2042 }
 0x373   : > { %v2057_v39 = vmul.f32 0.0052083335, %v2043_v49 }
 0x375   : > { %v5944_v61 = vsub.f32 %v6399_v52, %v2057_v39  ;;  %v5947_v7 = vsub.f32 %v6400_v63, %v2057_v39 }
 0x377   : > { %v2069_v54 = vmul.f32 %v5944_v61, %v5944_v61  ;;  %v2070_v27 = vmul.f32 %v5947_v7, %v5947_v7 }
 0x379   : > { %v2077_v30 = vsel %vm2024_vm11, %v2070_v27, 0.0 }
 0x37a   : > { %v2078_v37 = vadd.f32 %v2077_v30, %v2069_v54 }
 0x37c   : > { %2079 = vadd.xlane.f32.xlu0 %v2078_v37 }
 0x387   : > { %v2051_v31 = vpop.xlane.xlu1 %2050 }
 0x388   : > { %v2059_v19 = vmul.f32 0.0052083335, %v2051_v31 }
 0x38a   : > { %v5955_v40 = vsub.f32 %v5800_v18, %v2059_v19  ;;  %v5958_v25 = vsub.f32 %v5839_v23, %v2059_v19  ;;  %v2113_v19 = vld [vmem:[%s6401_s29] sm:$0x3] }
 0x38b   : > { %v2118_v21 = vrot.slane %v2113_v19, %v6404_v22 }
 0x38c   : > { %v2073_v41 = vmul.f32 %v5955_v40, %v5955_v40  ;;  %v2074_v56 = vmul.f32 %v5958_v25, %v5958_v25 }
 0x38e   : > { %v2085_v57 = vsel %vm2024_vm11, %v2074_v56, 0.0  ;;  %v6402_v56 = vld [vmem:[#allocation10_spill] sm:$0xff] }
 0x38f   : > { %v2086_v34 = vadd.f32 %v2085_v57, %v2073_v41  ;;  %v2122_v57 = vrot.slane %v2113_v19, %v6402_v56  ;;  %v4645_v19 = vld [vmem:[%s4984_s14 + $0x150] ss:$8 sps:$4 sm:$0xff]  }
 0x391   : > { %2087 = vadd.xlane.f32.xlu0 %v2086_v34  ;;  %v2133_v34 = vld [vmem:[%s6403_s24] sm:$0x3] }
 0x396   : > { %v2047_v18 = vpop.xlane.xlu0 %2046 }
 0x397   : > { %v2058_v23 = vmul.f32 0.0052083335, %v2047_v18 }
 0x399   : > { %v5970_v17 = vsub.f32 %v5860_v42, %v2058_v23  ;;  %v5973_v53 = vsub.f32 %v5897_v4, %v2058_v23 }
 0x39b   : > { %v2071_v36 = vmul.f32 %v5970_v17, %v5970_v17  ;;  %v2072_v13 = vmul.f32 %v5973_v53, %v5973_v53 }
 0x39d   : > { %v2081_v55 = vsel %vm2024_vm11, %v2072_v13, 0.0 }
 0x39e   : > { %v2082_v16 = vadd.f32 %v2081_v55, %v2071_v36  ;;  %v2142_v36 = vrot.slane %v2133_v34, %v6402_v56 }
 0x3a0   : > { %2083 = vadd.xlane.f32.xlu1 %v2082_v16 }
 0x3a6   : > { %v2055_v12 = vpop.xlane.xlu1 %2054 }
 0x3a7   : > { %v2060_v42 = vmul.f32 0.0052083335, %v2055_v12 }
 0x3a9   : > { %v5981_v5 = vsub.f32 %v5914_v0, %v2060_v42  ;;  %v5984_v4 = vsub.f32 %v5917_v29, %v2060_v42  ;;  %v4546_v0 = vld [vmem:[%s4974_s23 + $0x12c] ss:$24 sps:$4 sm:$0xff]  }
 0x3aa   : > { %v4549_v29 = vld [vmem:[%s4974_s23 + $0x154] ss:$24 sps:$4 sm:$0xff]   ;;  %2692 = vmatprep.subr.bf16.mxu1 %v4546_v0 }
 0x3ab   : > { %v2075_v10 = vmul.f32 %v5981_v5, %v5981_v5  ;;  %v2076_v62 = vmul.f32 %v5984_v4, %v5984_v4  ;;  %2693 = vmatpush1.bf16.msra.mxu1 %v4548_v6  ;;  %2641 = vmatprep.subr.bf16.mxu0 %v4549_v29  ;;  %v4579_v6 = vld [vmem:[%s4974_s23 + $0x10] ss:$24 sps:$4 sm:$0xff]  }
 0x3ac   : > { %2642 = vmatpush1.bf16.msra.mxu0 %v4551_v60  ;;  %2694 = vmatprep.subr.bf16.mxu1 %v4552_v20  ;;  %v4615_v29 = vld [vmem:[%s4984_s14 + $0x100] ss:$8 sps:$4 sm:$0xff]   ;;  %v4623_v20 = vld [vmem:[%s4984_s14 + $0x114] ss:$8 sps:$4 sm:$0xff]  }
 0x3ad   : > { %v2089_v33 = vsel %vm2024_vm11, %v2076_v62, 0.0  ;;  %2643 = vmatprep.subr.bf16.mxu0 %v4555_v45  ;;  %v4582_v45 = vld [vmem:[%s4974_s23 + $0x40] ss:$24 sps:$4 sm:$0xff]  }
 0x3ae   : > { %v2090_v43 = vadd.f32 %v2089_v33, %v2075_v10 }
 0x3af   : > { %2695 = vmatpush1.bf16.msra.mxu1 %v4554_v44 }
 0x3b0   : > { %2091 = vadd.xlane.f32.xlu1 %v2090_v43  ;;  %2644 = vmatpush1.bf16.msra.mxu0 %v4557_v28  ;;  %v4621_v28 = vld [vmem:[%s4984_s14 + $0x110] ss:$8 sps:$4 sm:$0xff]  }
 0x3b1   : > { %2696 = vmatprep.subr.bf16.mxu1 %v4558_v3  ;;  %2645 = vmatprep.subr.bf16.mxu0 %v4561_v47  ;;  %v4587_v3 = vld [vmem:[%s4974_s23 + $0x74] ss:$24 sps:$4 sm:$0xff]  }
 0x3b2   : > { %v4629_v47 = vld [vmem:[%s4984_s14 + $0x124] ss:$8 sps:$4 sm:$0xff]  }
 0x3b3   : > { %2697 = vmatpush1.bf16.msra.mxu1 %v4560_v46 }
 0x3b4   : > { %2646 = vmatpush1.bf16.msra.mxu0 %v4563_v9  ;;  %2698 = vmatprep.subr.bf16.mxu1 %v4564_v1 }
 0x3b5   : > { %2647 = vmatprep.subr.bf16.mxu0 %v4567_v8  ;;  %v4585_v8 = vld [vmem:[%s4974_s23 + $0x70] ss:$24 sps:$4 sm:$0xff]  }
 0x3b7   : > { %2699 = vmatpush1.bf16.msra.mxu1 %v4566_v50 }
 0x3b8   : > { %2648 = vmatpush1.bf16.msra.mxu0 %v4569_v51  ;;  %2700 = vmatprep.subr.bf16.mxu1 %v4570_v59  ;;  %v4627_v51 = vld [vmem:[%s4984_s14 + $0x120] ss:$8 sps:$4 sm:$0xff]  }
 0x3b9   : > { %2649 = vmatprep.subr.bf16.mxu0 %v4573_v11 }
 0x3bb   : > { %2701 = vmatpush1.bf16.msra.mxu1 %v4572_v38  ;;  %v4590_v38 = vld [vmem:[%s4974_s23 + $0xa4] ss:$24 sps:$4 sm:$0xff]  }
 0x3bc   : > { %2650 = vmatpush1.bf16.msra.mxu0 %v4575_v15  ;;  %2702 = vmatprep.subr.bf16.mxu1 %v4576_v24 }
 0x3bd   : > { %2733 = vmatprep.subr.bf16.mxu0 %v4581_v26 }
 0x3bf   : > { %2703 = vmatpush1.bf16.msra.mxu1 %v4578_v14 }
 0x3c0   : > { %3559 = vmatprep.subr.bf16.mxu1 %v4617_v32  ;;  %v4588_v32 = vld [vmem:[%s4974_s23 + $0xa0] ss:$24 sps:$4 sm:$0xff]  }
 0x409   : > { %v2080_v48 = vpop.xlane.xlu0 %2079 }
 0x40a   : > { %v2093_v49 = vmul.f32 0.0052083335, %v2080_v48 }
 0x40c   : > { %v2097_v39 = vadd.f32 1e-06, %v2093_v49  ;;  %v4593_v49 = vld [vmem:[%s4974_s23 + $0xd4] ss:$24 sps:$4 sm:$0xff]  }
 0x40e   : > { %4759 = vrsqrt.f32 %v2097_v39  ;;  %v4633_v39 = vld [vmem:[%s4984_s14 + $0x130] ss:$8 sps:$4 sm:$0xff]  }
 0x418   : > { %v4760_v37 = vpop.eup %4759 }
 0x419   : > { %v2106_v41 = vmul.f32 %v4760_v37, %v5947_v7  ;;  %v2105_v35 = vmul.f32 %v4760_v37, %v5944_v61  ;;  %v2138_v7 = vrot.slane %v2133_v34, %v6404_v22  ;;  %v4594_v37 = vld [vmem:[%s4974_s23 + $0x100] ss:$24 sps:$4 sm:$0xff]   ;;  %v4602_v34 = vld [vmem:[%s4974_s23 + $0x164] ss:$24 sps:$4 sm:$0xff]  }
 0x41b   : > { %v2126_v55 = vmul.f32 %v2122_v57, %v2106_v41  ;;  %v2125_v61 = vmul.f32 %v2118_v21, %v2105_v35  ;;  %v4653_v41 = vld [vmem:[%s4984_s14 + $0x164] ss:$8 sps:$4 sm:$0xff]   ;;  %v4651_v35 = vld [vmem:[%s4984_s14 + $0x160] ss:$8 sps:$4 sm:$0xff]  }
 0x41d   : > { %v2146_v62 = vadd.f32 %v2142_v36, %v2126_v55  ;;  %v2145_v43 = vadd.f32 %v2138_v7, %v2125_v61  ;;  %v4663_v55 = vld [vmem:[%s4984_s14 + $0x180] ss:$8 sps:$4 sm:$0xff]  }
 0x41e   : > { %v2088_v54 = vpop.xlane.xlu0 %2087  ;;  %v4606_v61 = vld [vmem:[%s4974_s23 + $0x1c0] ss:$24 sps:$4 sm:$0xff]  }
 0x41f   : > { %v2095_v30 = vmul.f32 0.0052083335, %v2088_v54  ;;  %v4596_v54 = vld [vmem:[%s4974_s23 + $0x104] ss:$24 sps:$4 sm:$0xff]  }
 0x421   : > { %v2099_v31 = vadd.f32 1e-06, %v2095_v30  ;;  %v4647_v30 = vld [vmem:[%s4984_s14 + $0x154] ss:$8 sps:$4 sm:$0xff]  }
 0x42d   : > { %v2084_v52 = vpop.xlane.xlu1 %2083 }
 0x42e   : > { %v2094_v63 = vmul.f32 0.0052083335, %v2084_v52  ;;  %v4641_v52 = vld [vmem:[%s4984_s14 + $0x144] ss:$8 sps:$4 sm:$0xff]  }
 0x430   : > { %v2098_v27 = vadd.f32 1e-06, %v2094_v63  ;;  %v4591_v63 = vld [vmem:[%s4974_s23 + $0xd0] ss:$24 sps:$4 sm:$0xff]  }
 0x432   : > { %4761 = vrsqrt.f32 %v2098_v27  ;;  %v4639_v27 = vld [vmem:[%s4984_s14 + $0x140] ss:$8 sps:$4 sm:$0xff]  }
 0x433   : > { %4763 = vrsqrt.f32 %v2099_v31  ;;  %v4599_v31 = vld [vmem:[%s4974_s23 + $0x134] ss:$24 sps:$4 sm:$0xff]  }
 0x43c   : > { %v4762_v18 = vpop.eup %4761 }
 0x43d   : > { %v2092_v2 = vpop.xlane.xlu1 %2091  ;;  %v2108_v13 = vmul.f32 %v4762_v18, %v5973_v53  ;;  %v2107_v16 = vmul.f32 %v4762_v18, %v5970_v17  ;;  %v4764_v60 = vpop.eup %4763  ;;  %v4584_v17 = vld [vmem:[%s4974_s23 + $0x44] ss:$24 sps:$4 sm:$0xff]   ;;  %v4605_v18 = vld [vmem:[%s4974_s23 + $0x194] ss:$24 sps:$4 sm:$0xff]  }
 0x43e   : > { %v2096_v23 = vmul.f32 0.0052083335, %v2092_v2  ;;  %v2110_v44 = vmul.f32 %v4764_v60, %v5958_v25  ;;  %v2109_v46 = vmul.f32 %v4764_v60, %v5955_v40  ;;  %v4635_v40 = vld [vmem:[%s4984_s14 + $0x134] ss:$8 sps:$4 sm:$0xff]   ;;  %v4600_v2 = vld [vmem:[%s4974_s23 + $0x160] ss:$24 sps:$4 sm:$0xff]  }
 0x43f   : > { %v2128_v42 = vmul.f32 %v2122_v57, %v2108_v13  ;;  %v2127_v10 = vmul.f32 %v2118_v21, %v2107_v16  ;;  %v4608_v13 = vld [vmem:[%s4974_s23 + $0x1c4] ss:$24 sps:$4 sm:$0xff]   ;;  %v4630_v60 = vld [vmem:[%s4984_s14 + $0x20] ss:$8 sps:$4 sm:$0xff]  }
 0x440   : > { %v2100_v12 = vadd.f32 1e-06, %v2096_v23  ;;  %v2130_v50 = vmul.f32 %v2122_v57, %v2110_v44  ;;  %v2129_v59 = vmul.f32 %v2118_v21, %v2109_v46  ;;  %v4657_v23 = vld [vmem:[%s4984_s14 + $0x170] ss:$8 sps:$4 sm:$0xff]   ;;  %v4671_v16 = vld [vmem:[%s4984_s14 + $0x194] ss:$8 sps:$4 sm:$0xff]  }
 0x441   : > { %v2148_v33 = vadd.f32 %v2142_v36, %v2128_v42  ;;  %v2147_v58 = vadd.f32 %v2138_v7, %v2127_v10  ;;  %v4669_v42 = vld [vmem:[%s4984_s14 + $0x190] ss:$8 sps:$4 sm:$0xff]   ;;  %v4642_v44 = vld [vmem:[%s4984_s14 + $0x40] ss:$8 sps:$4 sm:$0xff]  }
 0x442   : > { %4765 = vrsqrt.f32 %v2100_v12  ;;  %v2150_v24 = vadd.f32 %v2142_v36, %v2130_v50  ;;  %v4611_v12 = vld [vmem:[%s4974_s23 + $0x1f4] ss:$24 sps:$4 sm:$0xff]   ;;  %v4609_v10 = vld [vmem:[%s4974_s23 + $0x1f0] ss:$24 sps:$4 sm:$0xff]  }
 0x443   : > { %v2154_v0 = vpack.c.bf16 %v2148_v33, %v2146_v62  ;;  %v6035_v53 = vpack.c.bf16 %v2147_v58, %v2145_v43  ;;  %v4614_v62 = vld [vmem:[%s4974_s23 + $0x224] ss:$24 sps:$4 sm:$0xff]   ;;  %v4612_v33 = vld [vmem:[%s4974_s23 + $0x220] ss:$24 sps:$4 sm:$0xff]  }
 0x444   : > { %v4620_v43 = vld [vmem:[%s4984_s14 + $0x4] ss:$8 sps:$4 sm:$0xff]   ;;  %v4618_v58 = vld [vmem:[%s4984_s14] ss:$8 sps:$4 sm:$0xff]  }
 0x445   : > { %4146 = vmatprep.mubr.msk.bf16.mxu0 %vm2024_vm11, %v2154_v0  ;;  %4148 = vmatprep.mubr.msk.bf16.mxu1 %vm2024_vm11, %v2154_v0  ;;  %v4654_v46 = vld [vmem:[%s4984_s14 + $0x60] ss:$8 sps:$4 sm:$0xff]  }
 0x446   : > { %2660 = vmatmul.mubr.bf16.vlgmr.msra.gmra.mrb[0].mxu0 %v6035_v53  ;;  %2713 = vmatmul.mubr.bf16.vlgmr.msra.gmra.mrb[0].mxu1 %v6035_v53  ;;  %v4666_v50 = vld [vmem:[%s4984_s14 + $0x80] ss:$8 sps:$4 sm:$0xff]  }
 0x447   : > { %2734 = vmatpush1.bf16.msra.mxu0 %v4579_v6  ;;  %3560 = vmatpush1.bf16.msra.mxu1 %v4615_v29  ;;  %v4624_v6 = vld [vmem:[%s4984_s14 + $0x10] ss:$8 sps:$4 sm:$0xff]   ;;  %v4632_v29 = vld [vmem:[%s4984_s14 + $0x24] ss:$8 sps:$4 sm:$0xff]  }
 0x448   : > { %2735 = vmatprep.subr.bf16.mxu0 %v4584_v17  ;;  %3561 = vmatprep.subr.bf16.mxu1 %v4623_v20  ;;  %v4638_v17 = vld [vmem:[%s4984_s14 + $0x34] ss:$8 sps:$4 sm:$0xff]   ;;  %v4644_v20 = vld [vmem:[%s4984_s14 + $0x44] ss:$8 sps:$4 sm:$0xff]  }
 0x44b   : > { %2736 = vmatpush1.bf16.msra.mxu0 %v4582_v45  ;;  %3562 = vmatpush1.bf16.msra.mxu1 %v4621_v28  ;;  %v4650_v45 = vld [vmem:[%s4984_s14 + $0x54] ss:$8 sps:$4 sm:$0xff]   ;;  %v4648_v28 = vld [vmem:[%s4984_s14 + $0x50] ss:$8 sps:$4 sm:$0xff]  }
 0x44c   : > { %v4766_v9 = vpop.eup %4765  ;;  %2737 = vmatprep.subr.bf16.mxu0 %v4587_v3  ;;  %3563 = vmatprep.subr.bf16.mxu1 %v4629_v47  ;;  %v4656_v3 = vld [vmem:[%s4984_s14 + $0x64] ss:$8 sps:$4 sm:$0xff]   ;;  %v4662_v47 = vld [vmem:[%s4984_s14 + $0x74] ss:$8 sps:$4 sm:$0xff]  }
 0x44d   : > { %v2112_v1 = vmul.f32 %v4766_v9, %v5984_v4  ;;  %v2111_v25 = vmul.f32 %v4766_v9, %v5981_v5  ;;  %v2149_v5 = vadd.f32 %v2138_v7, %v2129_v59  ;;  %v4660_v9 = vld [vmem:[%s4984_s14 + $0x70] ss:$8 sps:$4 sm:$0xff]   ;;  %v4675_v59 = vld [vmem:[%s4984_s14 + $0x1a0] ss:$8 sps:$4 sm:$0xff]  }
 0x44f   : > { %v2132_v11 = vmul.f32 %v2122_v57, %v2112_v1  ;;  %v2131_v15 = vmul.f32 %v2118_v21, %v2111_v25  ;;  %2738 = vmatpush1.bf16.msra.mxu0 %v4585_v8  ;;  %3564 = vmatpush1.bf16.msra.mxu1 %v4627_v51  ;;  %v4597_v57 = vld [vmem:[%s4974_s23 + $0x130] ss:$24 sps:$4 sm:$0xff]   ;;  %v4659_v21 = vld [vmem:[%s4984_s14 + $0x174] ss:$8 sps:$4 sm:$0xff]   ;;  %v4668_v1 = vld [vmem:[%s4984_s14 + $0x84] ss:$8 sps:$4 sm:$0xff]  }
 0x450   : > { %2739 = vmatprep.subr.bf16.mxu0 %v4590_v38  ;;  %3565 = vmatprep.subr.bf16.mxu1 %v4635_v40  ;;  %v4674_v8 = vld [vmem:[%s4984_s14 + $0x94] ss:$8 sps:$4 sm:$0xff]   ;;  %v4672_v25 = vld [vmem:[%s4984_s14 + $0x90] ss:$8 sps:$4 sm:$0xff]   ;;  %v4677_v51 = vld [vmem:[%s4984_s14 + $0x1a4] ss:$8 sps:$4 sm:$0xff]  }
 0x451   : > { %v2152_v4 = vadd.f32 %v2142_v36, %v2132_v11  ;;  %v2151_v14 = vadd.f32 %v2138_v7, %v2131_v15  ;;  %v4665_v36 = vld [vmem:[%s4984_s14 + $0x184] ss:$8 sps:$4 sm:$0xff]   ;;  %v4603_v7 = vld [vmem:[%s4974_s23 + $0x190] ss:$24 sps:$4 sm:$0xff]   ;;  %v4683_v11 = vld [vmem:[%s4984_s14 + $0x1b4] ss:$8 sps:$4 sm:$0xff]  }
 0x452   : > { %v4680_v38 = vld [vmem:[%s4984_s14 + $0xa4] ss:$8 sps:$4 sm:$0xff]   ;;  %v4678_v40 = vld [vmem:[%s4984_s14 + $0xa0] ss:$8 sps:$4 sm:$0xff]   ;;  %v4681_v15 = vld [vmem:[%s4984_s14 + $0x1b0] ss:$8 sps:$4 sm:$0xff]  }
 0x453   : > { %v6056_v26 = vpack.c.bf16 %v2152_v4, %v2150_v24  ;;  %v6059_v48 = vpack.c.bf16 %v2151_v14, %v2149_v5  ;;  %2740 = vmatpush1.bf16.msra.mxu0 %v4588_v32  ;;  %3566 = vmatpush1.bf16.msra.mxu1 %v4633_v39  ;;  %v4686_v24 = vld [vmem:[%s4984_s14 + $0xb4] ss:$8 sps:$4 sm:$0xff]   ;;  %v4684_v4 = vld [vmem:[%s4984_s14 + $0xb0] ss:$8 sps:$4 sm:$0xff]   ;;  %v4689_v14 = vld [vmem:[%s4984_s14 + $0x1c4] ss:$8 sps:$4 sm:$0xff]  }
 0x454   : > { %2741 = vmatprep.subr.bf16.mxu0 %v4593_v49  ;;  %3567 = vmatprep.subr.bf16.mxu1 %v4641_v52  ;;  %v4687_v5 = vld [vmem:[%s4984_s14 + $0x1c0] ss:$8 sps:$4 sm:$0xff]   ;;  %v4693_v49 = vld [vmem:[%s4984_s14 + $0x1d0] ss:$8 sps:$4 sm:$0xff]   ;;  %v4698_v39 = vld [vmem:[%s4984_s14 + $0xd4] ss:$8 sps:$4 sm:$0xff]  }
 0x455   : > { %4147 = vmatprep.mubr.msk.bf16.mxu0 %vm2024_vm11, %v6056_v26  ;;  %4149 = vmatprep.mubr.msk.bf16.mxu1 %vm2024_vm11, %v6056_v26  ;;  %v4690_v32 = vld [vmem:[%s4984_s14 + $0xc0] ss:$8 sps:$4 sm:$0xff]   ;;  %v4696_v52 = vld [vmem:[%s4984_s14 + $0xd0] ss:$8 sps:$4 sm:$0xff]  }
 0x456   : > { %2670 = vmatmul.mubr.bf16.gmra.mrb[4].mxu0 %v6059_v48  ;;  %2723 = vmatmul.mubr.bf16.gmra.mrb[4].mxu1 %v6059_v48 }
 0x457   : > { %4150 = vmatprep.mubr.msk.bf16.mxu0 %vm2024_vm11, %v2154_v0  ;;  %2742 = vmatpush1.bf16.msra.mxu0 %v4591_v63  ;;  %v4626_v0 = vld [vmem:[%s4984_s14 + $0x14] ss:$8 sps:$4 sm:$0xff]   ;;  %v4701_v63 = vld [vmem:[%s4984_s14 + $0x1e4] ss:$8 sps:$4 sm:$0xff]  }
 0x458   : > { %2743 = vmatprep.subr.bf16.mxu0 %v4596_v54  ;;  %3568 = vmatpush1.bf16.msra.mxu1 %v4639_v27  ;;  %v4699_v54 = vld [vmem:[%s4984_s14 + $0x1e0] ss:$8 sps:$4 sm:$0xff]   ;;  %v4704_v27 = vld [vmem:[%s4984_s14 + $0xe4] ss:$8 sps:$4 sm:$0xff]  }
 0x459   : > { %3569 = vmatprep.subr.bf16.mxu1 %v4647_v30  ;;  %v4702_v30 = vld [vmem:[%s4984_s14 + $0xe0] ss:$8 sps:$4 sm:$0xff]  }
 0x45b   : > { %2744 = vmatpush1.bf16.msra.mxu0 %v4594_v37  ;;  %v4707_v37 = vld [vmem:[%s4984_s14 + $0x1f4] ss:$8 sps:$4 sm:$0xff]  }
 0x45c   : > { %2745 = vmatprep.subr.bf16.mxu0 %v4599_v31  ;;  %3570 = vmatpush1.bf16.msra.mxu1 %v4645_v19  ;;  %v4705_v31 = vld [vmem:[%s4984_s14 + $0x1f0] ss:$8 sps:$4 sm:$0xff]   ;;  %v4710_v19 = vld [vmem:[%s4984_s14 + $0xf4] ss:$8 sps:$4 sm:$0xff]  }
 0x45d   : > { %3571 = vmatprep.subr.bf16.mxu1 %v4653_v41  ;;  %v4708_v41 = vld [vmem:[%s4984_s14 + $0xf0] ss:$8 sps:$4 sm:$0xff]  }
 0x45f   : > { %2746 = vmatpush1.bf16.msra.mxu0 %v4597_v57  ;;  %v4713_v57 = vld [vmem:[%s4984_s14 + $0x204] ss:$8 sps:$4 sm:$0xff]  }
 0x460   : > { %2747 = vmatprep.subr.bf16.mxu0 %v4602_v34  ;;  %3572 = vmatpush1.bf16.msra.mxu1 %v4651_v35  ;;  %v6147_v34 = vld [vmem:[%s4979_s27] sm:$0x3f] }
 0x461   : > { %3573 = vmatprep.subr.bf16.mxu1 %v4659_v21  ;;  %v6151_v35 = vrot.slane %v6147_v34, %v6404_v22  ;;  %v6405_v21 = vld [vmem:[#allocation11_spill] sm:$0xff] }
 0x463   : > { %2748 = vmatpush1.bf16.msra.mxu0 %v4600_v2  ;;  %v6155_v2 = vrot.slane %v6147_v34, %v6405_v21 }
 0x464   : > { %2749 = vmatprep.subr.bf16.mxu0 %v4605_v18  ;;  %3574 = vmatpush1.bf16.msra.mxu1 %v4657_v23  ;;  %v6159_v18 = vrot.slane %v6147_v34, %v6402_v56  ;;  %v6406_v23 = vld [vmem:[#allocation12_spill] sm:$0xff] }
 0x465   : > { %3575 = vmatprep.subr.bf16.mxu1 %v4665_v36  ;;  %v6163_v36 = vrot.slane %v6147_v34, %v6406_v23 }
 0x467   : > { %2750 = vmatpush1.bf16.msra.mxu0 %v4603_v7 }
 0x468   : > { %2751 = vmatprep.subr.bf16.mxu0 %v4608_v13  ;;  %3576 = vmatpush1.bf16.msra.mxu1 %v4663_v55 }
 0x469   : > { %3577 = vmatprep.subr.bf16.mxu1 %v4671_v16 }
 0x46b   : > { %2752 = vmatpush1.bf16.msra.mxu0 %v4606_v61 }
 0x46c   : > { %2753 = vmatprep.subr.bf16.mxu0 %v4611_v12  ;;  %3578 = vmatpush1.bf16.msra.mxu1 %v4669_v42 }
 0x46d   : > { %3579 = vmatprep.subr.bf16.mxu1 %v4677_v51 }
 0x46f   : > { %2754 = vmatpush1.bf16.msra.mxu0 %v4609_v10 }
 0x470   : > { %2755 = vmatprep.subr.bf16.mxu0 %v4614_v62  ;;  %3580 = vmatpush1.bf16.msra.mxu1 %v4675_v59 }
 0x471   : > { %3581 = vmatprep.subr.bf16.mxu1 %v4683_v11 }
 0x473   : > { %2756 = vmatpush1.bf16.msra.mxu0 %v4612_v33 }
 0x474   : > { %3506 = vmatprep.subr.bf16.mxu0 %v4620_v43  ;;  %3582 = vmatpush1.bf16.msra.mxu1 %v4681_v15 }
 0x475   : > { %3583 = vmatprep.subr.bf16.mxu1 %v4689_v14 }
 0x476   : > { %2766 = vmatmul.mubr.bf16.vlgmr.msra.gmra.mrb[8].mxu0 %v6035_v53  ;;  %v4636_v53 = vld [vmem:[%s4984_s14 + $0x30] ss:$8 sps:$4 sm:$0xff]  }
 0x477   : > { %4151 = vmatprep.mubr.msk.bf16.mxu0 %vm2024_vm11, %v6056_v26  ;;  %3507 = vmatpush1.bf16.msra.mxu0 %v4618_v58  ;;  %v4692_v26 = vld [vmem:[%s4984_s14 + $0xc4] ss:$8 sps:$4 sm:$0xff]  }
 0x478   : > { %3508 = vmatprep.subr.bf16.mxu0 %v4626_v0  ;;  %3584 = vmatpush1.bf16.msra.mxu1 %v4687_v5 }
 0x47b   : > { %3509 = vmatpush1.bf16.msra.mxu0 %v4624_v6 }
 0x47c   : > { %3510 = vmatprep.subr.bf16.mxu0 %v4632_v29 }
 0x47e   : > { %2776 = vmatmul.mubr.bf16.gmra.mrb[12].mxu0 %v6059_v48  ;;  %v4695_v48 = vld [vmem:[%s4984_s14 + $0x1d4] ss:$8 sps:$4 sm:$0xff]  }
 0x47f   : > { %3511 = vmatpush1.bf16.msra.mxu0 %v4630_v60  ;;  %3585 = vmatprep.subr.bf16.mxu1 %v4695_v48 }
 0x480   : > { %3512 = vmatprep.subr.bf16.mxu0 %v4638_v17  ;;  %3586 = vmatpush1.bf16.msra.mxu1 %v4693_v49 }
 0x481   : > { %3587 = vmatprep.subr.bf16.mxu1 %v4701_v63 }
 0x483   : > { %3513 = vmatpush1.bf16.msra.mxu0 %v4636_v53 }
 0x484   : > { %3514 = vmatprep.subr.bf16.mxu0 %v4644_v20  ;;  %3588 = vmatpush1.bf16.msra.mxu1 %v4699_v54 }
 0x485   : > { %3589 = vmatprep.subr.bf16.mxu1 %v4707_v37 }
 0x487   : > { %3515 = vmatpush1.bf16.msra.mxu0 %v4642_v44 }
 0x488   : > { %3516 = vmatprep.subr.bf16.mxu0 %v4650_v45  ;;  %3590 = vmatpush1.bf16.msra.mxu1 %v4705_v31 }
 0x489   : > { %3612 = vmatprep.subr.bf16.mxu1 %v4713_v57 }
 0x48b   : > { %3517 = vmatpush1.bf16.msra.mxu0 %v4648_v28 }
 0x48c   : > { %3518 = vmatprep.subr.bf16.mxu0 %v4656_v3 }
 0x48f   : > { %3519 = vmatpush1.bf16.msra.mxu0 %v4654_v46 }
 0x490   : > { %3520 = vmatprep.subr.bf16.mxu0 %v4662_v47 }
 0x493   : > { %3521 = vmatpush1.bf16.msra.mxu0 %v4660_v9 }
 0x494   : > { %3522 = vmatprep.subr.bf16.mxu0 %v4668_v1 }
 0x497   : > { %3523 = vmatpush1.bf16.msra.mxu0 %v4666_v50 }
 0x498   : > { %3524 = vmatprep.subr.bf16.mxu0 %v4674_v8 }
 0x49b   : > { %3525 = vmatpush1.bf16.msra.mxu0 %v4672_v25 }
 0x49c   : > { %3526 = vmatprep.subr.bf16.mxu0 %v4680_v38 }
 0x49f   : > { %3527 = vmatpush1.bf16.msra.mxu0 %v4678_v40 }
 0x4a0   : > { %3528 = vmatprep.subr.bf16.mxu0 %v4686_v24 }
 0x4a3   : > { %3529 = vmatpush1.bf16.msra.mxu0 %v4684_v4 }
 0x4a4   : > { %3530 = vmatprep.subr.bf16.mxu0 %v4692_v26 }
 0x4a7   : > { %3531 = vmatpush1.bf16.msra.mxu0 %v4690_v32 }
 0x4a8   : > { %3532 = vmatprep.subr.bf16.mxu0 %v4698_v39 }
 0x4ab   : > { %3533 = vmatpush1.bf16.msra.mxu0 %v4696_v52 }
 0x4ac   : > { %3534 = vmatprep.subr.bf16.mxu0 %v4704_v27 }
 0x4af   : > { %3535 = vmatpush1.bf16.msra.mxu0 %v4702_v30 }
 0x4b0   : > { %3536 = vmatprep.subr.bf16.mxu0 %v4710_v19 }
 0x4b3   : > { %3537 = vmatpush1.bf16.msra.mxu0 %v4708_v41 }
 0x519   : > { %v2661_v7 = vpop.f32.mrb[0].mxu0  ;;  %v2714_v13 = vpop.f32.mrb[0].mxu1 }
 0x51a   : > { %v2662_v55 = vadd.f32 %v2661_v7, %v6151_v35  ;;  %v2715_v16 = vadd.f32 %v2714_v13, %v6155_v2  ;;  %v2663_v61 = vpop.f32.mrb[1].mxu0  ;;  %v2716_v12 = vpop.f32.mrb[1].mxu1 }
 0x51b   : > { %v2664_v42 = vadd.f32 %v2663_v61, %v6159_v18  ;;  %v2717_v10 = vadd.f32 %v2716_v12, %v6163_v36  ;;  %v2665_v62 = vpop.f32.mrb[2].mxu0  ;;  %v2718_v33 = vpop.f32.mrb[2].mxu1 }
 0x51c   : > { %v2810_v43 = vmul.f32 0.70710677, %v2662_v55  ;;  %v2812_v58 = vmul.f32 0.70710677, %v2715_v16  ;;  %v2666_v29 = vadd.f32 %v2665_v62, %v6151_v35  ;;  %v2719_v60 = vadd.f32 %v2718_v33, %v6155_v2  ;;  %v2667_v17 = vpop.f32.mrb[3].mxu0  ;;  %v2720_v53 = vpop.f32.mrb[3].mxu1 }
 0x51d   : > { %v2811_v0 = vmul.f32 0.70710677, %v2664_v42  ;;  %v2813_v6 = vmul.f32 0.70710677, %v2717_v10  ;;  %v2668_v20 = vadd.f32 %v2667_v17, %v6159_v18  ;;  %v2721_v44 = vadd.f32 %v2720_v53, %v6163_v36 }
 0x51e   : > { %4767 = verf.f32 %v2810_v43  ;;  %v2816_v45 = vmul.f32 0.70710677, %v2666_v29  ;;  %v2818_v28 = vmul.f32 0.70710677, %v2719_v60  ;;  %v2786_v50 = vmul.f32 0.5, %v2662_v55 }
 0x51f   : > { %4769 = verf.f32 %v2812_v58  ;;  %v2817_v3 = vmul.f32 0.70710677, %v2668_v20  ;;  %v2819_v46 = vmul.f32 0.70710677, %v2721_v44  ;;  %v2788_v11 = vmul.f32 0.5, %v2715_v16 }
 0x520   : > { %4771 = verf.f32 %v2811_v0  ;;  %v2787_v15 = vmul.f32 0.5, %v2664_v42  ;;  %v2789_v32 = vmul.f32 0.5, %v2717_v10  ;;  %v2792_v54 = vmul.f32 0.5, %v2666_v29 }
 0x521   : > { %4773 = verf.f32 %v2813_v6  ;;  %v2794_v27 = vmul.f32 0.5, %v2719_v60  ;;  %v2793_v57 = vmul.f32 0.5, %v2668_v20  ;;  %v2795_v21 = vmul.f32 0.5, %v2721_v44 }
 0x522   : > { %4775 = verf.f32 %v2816_v45 }
 0x523   : > { %4777 = verf.f32 %v2818_v28 }
 0x524   : > { %4779 = verf.f32 %v2817_v3 }
 0x525   : > { %4781 = verf.f32 %v2819_v46 }
 0x528   : > { %v4768_v1 = vpop.eup %4767 }
 0x529   : > { %v2671_v47 = vpop.f32.mrb[4].mxu0  ;;  %v2724_v9 = vpop.f32.mrb[4].mxu1  ;;  %v2858_v40 = vadd.f32 1.0, %v4768_v1 }
 0x52a   : > { %v6174_v8 = vadd.f32 %v2671_v47, %v6151_v35  ;;  %v6177_v25 = vadd.f32 %v2724_v9, %v6155_v2  ;;  %v2673_v51 = vpop.f32.mrb[5].mxu0  ;;  %v2726_v59 = vpop.f32.mrb[5].mxu1  ;;  %v4711_v47 = vld [vmem:[%s4984_s14 + $0x200] ss:$8 sps:$4 sm:$0xff]   ;;  %v4716_v9 = vld [vmem:[%s4984_s14 + $0x214] ss:$8 sps:$4 sm:$0xff]  }
 0x52b   : > { %v4770_v38 = vpop.eup %4769  ;;  %v6180_v24 = vadd.f32 %v2673_v51, %v6159_v18  ;;  %v2675_v4 = vpop.f32.mrb[6].mxu0  ;;  %v6184_v49 = vadd.f32 %v2726_v59, %v6163_v36  ;;  %v2882_v19 = vmul.f32 %v2858_v40, %v2786_v50  ;;  %v4719_v51 = vld [vmem:[%s4984_s14 + $0x224] ss:$8 sps:$4 sm:$0xff]  }
 0x52c   : > { %v2728_v14 = vpop.f32.mrb[6].mxu1  ;;  %v4772_v5 = vpop.eup %4771  ;;  %v2860_v26 = vadd.f32 1.0, %v4770_v38  ;;  %v2822_v48 = vmul.f32 0.70710677, %v6174_v8  ;;  %v2824_v30 = vmul.f32 0.70710677, %v6177_v25  ;;  %v2676_v43 = vadd.f32 %v2675_v4, %v6151_v35 }
 0x52d   : > { %v2677_v39 = vpop.f32.mrb[7].mxu0  ;;  %v4774_v52 = vpop.eup %4773  ;;  %v2859_v63 = vadd.f32 1.0, %v4772_v5  ;;  %v2823_v55 = vmul.f32 0.70710677, %v6180_v24  ;;  %v2825_v42 = vmul.f32 0.70710677, %v6184_v49  ;;  %v2729_v58 = vadd.f32 %v2728_v14, %v6155_v2 }
 0x52e   : > { %v2730_v37 = vpop.f32.mrb[7].mxu1  ;;  %v4776_v31 = vpop.eup %4775  ;;  %v2861_v41 = vadd.f32 1.0, %v4774_v52  ;;  %v2884_v7 = vmul.f32 %v2860_v26, %v2788_v11  ;;  %4783 = verf.f32 %v2822_v48  ;;  %v2678_v60 = vadd.f32 %v2677_v39, %v6159_v18  ;;  %v4717_v11 = vld [vmem:[%s4984_s14 + $0x220] ss:$8 sps:$4 sm:$0xff]   ;;  %v4722_v5 = vld [vmem:[%s4984_s14 + $0x234] ss:$8 sps:$4 sm:$0xff]  }
 0x52f   : > { %v4778_v23 = vpop.eup %4777  ;;  %v2864_v13 = vadd.f32 1.0, %v4776_v31  ;;  %v2883_v61 = vmul.f32 %v2859_v63, %v2787_v15  ;;  %4785 = verf.f32 %v2824_v30  ;;  %v2828_v20 = vmul.f32 0.70710677, %v2676_v43 }
 0x530   : > { %v4780_v16 = vpop.eup %4779  ;;  %v2866_v12 = vadd.f32 1.0, %v4778_v23  ;;  %v2885_v0 = vmul.f32 %v2861_v41, %v2789_v32  ;;  %4787 = verf.f32 %v2823_v55  ;;  %v2830_v28 = vmul.f32 0.70710677, %v2729_v58 }
 0x531   : > { %v4782_v10 = vpop.eup %4781  ;;  %v2888_v62 = vmul.f32 %v2864_v13, %v2792_v54  ;;  %v2865_v33 = vadd.f32 1.0, %v4780_v16  ;;  %4789 = verf.f32 %v2825_v42  ;;  %v2829_v3 = vmul.f32 0.70710677, %v2678_v60 }
 0x532   : > { %v2890_v6 = vmul.f32 %v2866_v12, %v2794_v27  ;;  %v2867_v29 = vadd.f32 1.0, %v4782_v10  ;;  %4791 = verf.f32 %v2828_v20  ;;  %v2731_v35 = vadd.f32 %v2730_v37, %v6163_v36  ;;  %v4714_v36 = vld [vmem:[%s4984_s14 + $0x210] ss:$8 sps:$4 sm:$0xff]  }
 0x533   : > { %v2906_v17 = vpack.c.bf16 %v2888_v62, %v2882_v19  ;;  %v2889_v53 = vmul.f32 %v2865_v33, %v2793_v57  ;;  %4793 = verf.f32 %v2830_v28  ;;  %v2798_v4 = vmul.f32 0.5, %v6174_v8  ;;  %v4720_v57 = vld [vmem:[%s4984_s14 + $0x230] ss:$8 sps:$4 sm:$0xff]   ;;  %v4729_v28 = vld [vmem:[%s4984_s14 + $0x260] ss:$8 sps:$4 sm:$0xff]  }
 0x534   : > { %v2908_v44 = vpack.c.bf16 %v2890_v6, %v2884_v7  ;;  %v2891_v45 = vmul.f32 %v2867_v29, %v2795_v21  ;;  %4795 = verf.f32 %v2829_v3  ;;  %v2831_v18 = vmul.f32 0.70710677, %v2731_v35  ;;  %v6407_v6 = vld [vmem:[#allocation13_spill] sm:$0xff] }
 0x535   : > { %v2907_v2 = vpack.c.bf16 %v2889_v53, %v2883_v61  ;;  %v2800_v32 = vmul.f32 0.5, %v6177_v25  ;;  %v2804_v39 = vmul.f32 0.5, %v2676_v43  ;;  %v2799_v54 = vmul.f32 0.5, %v6180_v24  ;;  %v4725_v24 = vld [vmem:[%s4984_s14 + $0x244] ss:$8 sps:$4 sm:$0xff]  }
 0x536   : > { %v2909_v46 = vpack.c.bf16 %v2891_v45, %v2885_v0  ;;  %4797 = verf.f32 %v2831_v18  ;;  %v2806_v27 = vmul.f32 0.5, %v2729_v58  ;;  %v2805_v37 = vmul.f32 0.5, %v2678_v60  ;;  %v4723_v43 = vld [vmem:[%s4984_s14 + $0x240] ss:$8 sps:$4 sm:$0xff]   ;;  %v4728_v58 = vld [vmem:[%s4984_s14 + $0x254] ss:$8 sps:$4 sm:$0xff]  }
 0x537   : > { %3538 = vmatprep.mubr.bf16.mxu0 %v2907_v2  ;;  %v2801_v25 = vmul.f32 0.5, %v6184_v49  ;;  %v2807_v13 = vmul.f32 0.5, %v2731_v35  ;;  %v4726_v0 = vld [vmem:[%s4984_s14 + $0x250] ss:$8 sps:$4 sm:$0xff]   ;;  %v2250_v29 = vrot.slane %v6147_v34, %v6407_v6  ;;  %v6408_v60 = vld [vmem:[#allocation14_spill] sm:$0xff] }
 0x538   : > { %3591 = vmatprep.mubr.bf16.mxu1 %v2909_v46  ;;  %v4784_v1 = vpop.eup %4783  ;;  %3539 = vmatmul.mubr.bf16.vlgmr.msra.gmra.mrb[16].mxu0 %v2906_v17  ;;  %v2254_v17 = vrot.slane %v6147_v34, %v6408_v60  ;;  %v4731_v53 = vld [vmem:[%s4984_s14 + $0x264] ss:$8 sps:$4 sm:$0xff]   ;;  %v4734_v2 = vld [vmem:[%s4984_s14 + $0x274] ss:$8 sps:$4 sm:$0xff]   ;;  %v4747_v60 = vld [vmem:[%s4984_s14 + $0x2c0] ss:$8 sps:$4 sm:$0xff]  }
 0x539   : > { %3592 = vmatmul.mubr.bf16.vlgmr.msra.gmra.mrb[8].mxu1 %v2908_v44  ;;  %v4786_v50 = vpop.eup %4785  ;;  %v2870_v40 = vadd.f32 1.0, %v4784_v1 }
 0x53a   : > { %3613 = vmatpush1.bf16.msra.mxu1 %v4711_v47  ;;  %v4788_v59 = vpop.eup %4787  ;;  %v2872_v14 = vadd.f32 1.0, %v4786_v50  ;;  %v4732_v50 = vld [vmem:[%s4984_s14 + $0x270] ss:$8 sps:$4 sm:$0xff]  }
 0x53b   : > { %3614 = vmatprep.subr.bf16.mxu1 %v4716_v9  ;;  %v4790_v38 = vpop.eup %4789  ;;  %v2871_v48 = vadd.f32 1.0, %v4788_v59  ;;  %v2894_v31 = vmul.f32 %v2870_v40, %v2798_v4 }
 0x53c   : > { %v4792_v15 = vpop.eup %4791  ;;  %v2873_v19 = vadd.f32 1.0, %v4790_v38  ;;  %v2896_v23 = vmul.f32 %v2872_v14, %v2800_v32  ;;  %v4740_v14 = vld [vmem:[%s4984_s14 + $0x294] ss:$8 sps:$4 sm:$0xff]  }
 0x53d   : > { %v4794_v26 = vpop.eup %4793  ;;  %v2876_v52 = vadd.f32 1.0, %v4792_v15  ;;  %v2895_v55 = vmul.f32 %v2871_v48, %v2799_v54 }
 0x53e   : > { %3615 = vmatpush1.bf16.msra.mxu1 %v4714_v36  ;;  %v4796_v63 = vpop.eup %4795  ;;  %v2878_v30 = vadd.f32 1.0, %v4794_v26  ;;  %v2897_v10 = vmul.f32 %v2873_v19, %v2801_v25 }
 0x53f   : > { %3616 = vmatprep.subr.bf16.mxu1 %v4719_v51  ;;  %v2900_v8 = vmul.f32 %v2876_v52, %v2804_v39  ;;  %v2877_v41 = vadd.f32 1.0, %v4796_v63  ;;  %v4737_v51 = vld [vmem:[%s4984_s14 + $0x284] ss:$8 sps:$4 sm:$0xff]   ;;  %v4738_v63 = vld [vmem:[%s4984_s14 + $0x290] ss:$8 sps:$4 sm:$0xff]  }
 0x540   : > { %v4798_v21 = vpop.eup %4797  ;;  %v2902_v7 = vmul.f32 %v2878_v30, %v2806_v27  ;;  %v4743_v27 = vld [vmem:[%s4984_s14 + $0x2a4] ss:$8 sps:$4 sm:$0xff]  }
 0x541   : > { %v2901_v16 = vmul.f32 %v2877_v41, %v2805_v37  ;;  %v2879_v61 = vadd.f32 1.0, %v4798_v21  ;;  %v2912_v12 = vpack.c.bf16 %v2900_v8, %v2894_v31  ;;  %v4741_v41 = vld [vmem:[%s4984_s14 + $0x2a0] ss:$8 sps:$4 sm:$0xff]  }
 0x542   : > { %3617 = vmatpush1.bf16.msra.mxu1 %v4717_v11  ;;  %v2914_v42 = vpack.c.bf16 %v2902_v7, %v2896_v23  ;;  %v4735_v11 = vld [vmem:[%s4984_s14 + $0x280] ss:$8 sps:$4 sm:$0xff]   ;;  %v4746_v7 = vld [vmem:[%s4984_s14 + $0x2b4] ss:$8 sps:$4 sm:$0xff]  }
 0x543   : > { %3618 = vmatprep.subr.bf16.mxu1 %v4722_v5  ;;  %v2903_v62 = vmul.f32 %v2879_v61, %v2807_v13  ;;  %v2913_v33 = vpack.c.bf16 %v2901_v16, %v2895_v55 }
 0x545   : > { %3548 = vmatprep.mubr.bf16.mxu0 %v2913_v33  ;;  %v2915_v49 = vpack.c.bf16 %v2903_v62, %v2897_v10  ;;  %v4744_v10 = vld [vmem:[%s4984_s14 + $0x2b0] ss:$8 sps:$4 sm:$0xff]   ;;  %v4749_v33 = vld [vmem:[%s4984_s14 + $0x2c4] ss:$8 sps:$4 sm:$0xff]  }
 0x546   : > { %3619 = vmatpush1.bf16.msra.mxu1 %v4720_v57  ;;  %3549 = vmatmul.mubr.bf16.gmra.mrb[20].mxu0 %v2912_v12 }
 0x547   : > { %3620 = vmatprep.subr.bf16.mxu1 %v4725_v24  ;;  %3601 = vmatprep.mubr.bf16.mxu1 %v2915_v49 }
 0x548   : > { %3602 = vmatmul.mubr.bf16.gmra.mrb[12].mxu1 %v2914_v42 }
 0x549   : > { %v2767_v20 = vpop.f32.mrb[8].mxu0 }
 0x54a   : > { %3621 = vmatpush1.bf16.msra.mxu1 %v4723_v43  ;;  %v2768_v44 = vadd.f32 %v2767_v20, %v2250_v29  ;;  %v2769_v45 = vpop.f32.mrb[9].mxu0 }
 0x54b   : > { %3622 = vmatprep.subr.bf16.mxu1 %v4728_v58  ;;  %v2770_v3 = vadd.f32 %v2769_v45, %v2254_v17  ;;  %v2771_v35 = vpop.f32.mrb[10].mxu0  ;;  %v4752_v45 = vld [vmem:[%s4984_s14 + $0x2d4] ss:$8 sps:$4 sm:$0xff]  }
 0x54c   : > { %v2814_v46 = vmul.f32 0.70710677, %v2768_v44  ;;  %v2772_v47 = vadd.f32 %v2771_v35, %v2250_v29  ;;  %v2773_v18 = vpop.f32.mrb[11].mxu0  ;;  %v2790_v21 = vmul.f32 0.5, %v2768_v44 }
 0x54d   : > { %v2815_v9 = vmul.f32 0.70710677, %v2770_v3  ;;  %v2774_v1 = vadd.f32 %v2773_v18, %v2254_v17  ;;  %v2791_v13 = vmul.f32 0.5, %v2770_v3 }
 0x54e   : > { %3623 = vmatpush1.bf16.msra.mxu1 %v4726_v0  ;;  %4799 = verf.f32 %v2814_v46  ;;  %v2820_v34 = vmul.f32 0.70710677, %v2772_v47  ;;  %v2796_v23 = vmul.f32 0.5, %v2772_v47 }
 0x54f   : > { %3624 = vmatprep.subr.bf16.mxu1 %v4731_v53  ;;  %4801 = verf.f32 %v2815_v9  ;;  %v2821_v36 = vmul.f32 0.70710677, %v2774_v1  ;;  %v2797_v24 = vmul.f32 0.5, %v2774_v1  ;;  %v4750_v9 = vld [vmem:[%s4984_s14 + $0x2d0] ss:$8 sps:$4 sm:$0xff]  }
 0x550   : > { %4803 = verf.f32 %v2820_v34  ;;  %v4755_v1 = vld [vmem:[%s4984_s14 + $0x2e4] ss:$8 sps:$4 sm:$0xff]  }
 0x551   : > { %4805 = verf.f32 %v2821_v36  ;;  %v2777_v59 = vpop.f32.mrb[12].mxu0  ;;  %v4753_v36 = vld [vmem:[%s4984_s14 + $0x2e0] ss:$8 sps:$4 sm:$0xff]  }
 0x552   : > { %3625 = vmatpush1.bf16.msra.mxu1 %v4729_v28  ;;  %v2778_v38 = vadd.f32 %v2777_v59, %v2250_v29  ;;  %v2779_v40 = vpop.f32.mrb[13].mxu0  ;;  %v4756_v59 = vld [vmem:[%s4984_s14 + $0x2f0] ss:$8 sps:$4 sm:$0xff]  }
 0x553   : > { %3626 = vmatprep.subr.bf16.mxu1 %v4734_v2  ;;  %v2780_v15 = vadd.f32 %v2779_v40, %v2254_v17  ;;  %v2781_v4 = vpop.f32.mrb[14].mxu0 }
 0x554   : > { %v2826_v5 = vmul.f32 0.70710677, %v2778_v38  ;;  %v2782_v26 = vadd.f32 %v2781_v4, %v2250_v29  ;;  %v2783_v32 = vpop.f32.mrb[15].mxu0  ;;  %v2802_v53 = vmul.f32 0.5, %v2778_v38 }
 0x555   : > { %v2827_v48 = vmul.f32 0.70710677, %v2780_v15  ;;  %v2784_v39 = vadd.f32 %v2783_v32, %v2254_v17  ;;  %v2803_v28 = vmul.f32 0.5, %v2780_v15  ;;  %v3014_v32 = vld [vmem:[%s591_s4] sm:$0x3] }
 0x556   : > { %3627 = vmatpush1.bf16.msra.mxu1 %v4732_v50  ;;  %4807 = verf.f32 %v2826_v5  ;;  %v2832_v52 = vmul.f32 0.70710677, %v2782_v26  ;;  %v2808_v20 = vmul.f32 0.5, %v2782_v26 }
 0x557   : > { %3628 = vmatprep.subr.bf16.mxu1 %v4737_v51  ;;  %4809 = verf.f32 %v2827_v48  ;;  %v2833_v54 = vmul.f32 0.70710677, %v2784_v39  ;;  %v2809_v3 = vmul.f32 0.5, %v2784_v39  ;;  %v4758_v51 = vld [vmem:[%s4984_s14 + $0x2f4] ss:$8 sps:$4 sm:$0xff]   ;;  %v3019_v48 = vrot.slane %v3014_v32, %v6404_v22 }
 0x558   : > { %v4800_v30 = vpop.eup %4799  ;;  %4811 = verf.f32 %v2832_v52  ;;  %v3023_v39 = vrot.slane %v3014_v32, %v6402_v56  ;;  %v3665_v52 = vld [vmem:[%s595_s20] sm:$0x3]  ;;  %v3727_v32 = vld [vmem:[#allocation2 + $0x58] sm:$0x7] }
 0x559   : > { %v4802_v37 = vpop.eup %4801  ;;  %v2862_v31 = vadd.f32 1.0, %v4800_v30  ;;  %4813 = verf.f32 %v2833_v54  ;;  %v3670_v54 = vrot.slane %v3665_v52, %v6404_v22 }
 0x55a   : > { %3629 = vmatpush1.bf16.msra.mxu1 %v4735_v11  ;;  %v4804_v19 = vpop.eup %4803  ;;  %v2863_v8 = vadd.f32 1.0, %v4802_v37  ;;  %v3674_v37 = vrot.slane %v3665_v52, %v6402_v56 }
 0x55b   : > { %3630 = vmatprep.subr.bf16.mxu1 %v4740_v14  ;;  %v4806_v57 = vpop.eup %4805  ;;  %v2868_v25 = vadd.f32 1.0, %v4804_v19  ;;  %v2886_v16 = vmul.f32 %v2862_v31, %v2790_v21 }
 0x55c   : > { %v2869_v55 = vadd.f32 1.0, %v4806_v57  ;;  %v2887_v12 = vmul.f32 %v2863_v8, %v2791_v13  ;;  %v3685_v13 = vld [vmem:[#allocation2] sm:$0xf8] }
 0x55d   : > { %v2892_v61 = vmul.f32 %v2868_v25, %v2796_v23 }
 0x55e   : > { %3631 = vmatpush1.bf16.msra.mxu1 %v4738_v63  ;;  %v2893_v42 = vmul.f32 %v2869_v55, %v2797_v24 }
 0x55f   : > { %3632 = vmatprep.subr.bf16.mxu1 %v4743_v27  ;;  %v2910_v62 = vpack.c.bf16 %v2892_v61, %v2886_v16  ;;  %v3686_v61 = vld [vmem:[#allocation2 + $0x8] sm:$0xf8] }
 0x560   : > { %v4808_v43 = vpop.eup %4807  ;;  %v2911_v58 = vpack.c.bf16 %v2893_v42, %v2887_v12  ;;  %v3689_v42 = vld [vmem:[#allocation2 + $0x20] sm:$0x7] }
 0x561   : > { %v4810_v49 = vpop.eup %4809  ;;  %v2874_v0 = vadd.f32 1.0, %v4808_v43 }
 0x562   : > { %3633 = vmatpush1.bf16.msra.mxu1 %v4741_v41  ;;  %v4812_v6 = vpop.eup %4811  ;;  %v2875_v29 = vadd.f32 1.0, %v4810_v49  ;;  %3644 = vmatprep.mubr.bf16.mxu1 %v2911_v58  ;;  %v3690_v58 = vld [vmem:[#allocation2 + $0x28] sm:$0x7] }
 0x563   : > { %3634 = vmatprep.subr.bf16.mxu1 %v4746_v7  ;;  %v4814_v17 = vpop.eup %4813  ;;  %v2880_v44 = vadd.f32 1.0, %v4812_v6  ;;  %v2898_v2 = vmul.f32 %v2874_v0, %v2802_v53 }
 0x564   : > { %v2881_v35 = vadd.f32 1.0, %v4814_v17  ;;  %v2899_v47 = vmul.f32 %v2875_v29, %v2803_v28  ;;  %v3688_v29 = vld [vmem:[#allocation2 + $0x18] sm:$0xff] }
 0x565   : > { %v2904_v46 = vmul.f32 %v2880_v44, %v2808_v20 }
 0x566   : > { %3635 = vmatpush1.bf16.msra.mxu1 %v4744_v10  ;;  %v2905_v18 = vmul.f32 %v2881_v35, %v2809_v3 }
 0x567   : > { %3636 = vmatprep.subr.bf16.mxu1 %v4749_v33  ;;  %v2916_v34 = vpack.c.bf16 %v2904_v46, %v2898_v2  ;;  %v3687_v33 = vld [vmem:[#allocation2 + $0x10] sm:$0xff] }
 0x568   : > { %v2917_v50 = vpack.c.bf16 %v2905_v18, %v2899_v47 }
 0x56a   : > { %3637 = vmatpush1.bf16.msra.mxu1 %v4747_v60 }
 0x56b   : > { %3638 = vmatprep.subr.bf16.mxu1 %v4752_v45 }
 0x56e   : > { %3639 = vmatpush1.bf16.msra.mxu1 %v4750_v9 }
 0x56f   : > { %3640 = vmatprep.subr.bf16.mxu1 %v4755_v1 }
 0x572   : > { %3641 = vmatpush1.bf16.msra.mxu1 %v4753_v36 }
 0x573   : > { %3642 = vmatprep.subr.bf16.mxu1 %v4758_v51 }
 0x576   : > { %3643 = vmatpush1.bf16.msra.mxu1 %v4756_v59 }
 0x579   : > { %3645 = vmatmul.mubr.bf16.vlgmr.msra.gmra.mrb[8].mxu1 %v2910_v62 }
 0x57a   : > { %3654 = vmatprep.mubr.bf16.mxu1 %v2917_v50  ;;  %v3722_v50 = vld [vmem:[#allocation2 + $0x30] sm:$0xf8] }
 0x581   : > { %3655 = vmatmul.mubr.bf16.gmra.mrb[12].mxu1 %v2916_v34 }
 0x60b   : > { %v3540_v38 = vpop.f32.mrb[16].mxu0 }
 0x60c   : > { %v3542_v40 = vpop.f32.mrb[17].mxu0  ;;  %v3541_v63 = vadd.f32 %v3540_v38, %v3019_v48  ;;  %v3723_v38 = vld [vmem:[#allocation2 + $0x38] sm:$0xf8] }
 0x60d   : > { %v3544_v11 = vpop.f32.mrb[18].mxu0  ;;  %v3543_v27 = vadd.f32 %v3542_v40, %v3023_v39 }
 0x60e   : > { %v3546_v15 = vpop.f32.mrb[19].mxu0  ;;  %v3545_v31 = vadd.f32 %v3544_v11, %v3019_v48 }
 0x60f   : > { %v3547_v41 = vadd.f32 %v3546_v15, %v3023_v39  ;;  %v3726_v15 = vld [vmem:[#allocation2 + $0x50] sm:$0x7] }
 0x619   : > { %v3550_v4 = vpop.f32.mrb[20].mxu0 }
 0x61a   : > { %v3552_v14 = vpop.f32.mrb[21].mxu0  ;;  %v3551_v56 = vadd.f32 %v3550_v4, %v3019_v48 }
 0x61b   : > { %v3554_v5 = vpop.f32.mrb[22].mxu0  ;;  %v3553_v49 = vadd.f32 %v3552_v14, %v3023_v39 }
 0x61c   : > { %v3556_v26 = vpop.f32.mrb[23].mxu0  ;;  %v3555_v0 = vadd.f32 %v3554_v5, %v3019_v48  ;;  %v3724_v5 = vld [vmem:[#allocation2 + $0x40] sm:$0xff] }
 0x61d   : > { %v3557_v53 = vadd.f32 %v3556_v26, %v3023_v39  ;;  %v3725_v39 = vld [vmem:[#allocation2 + $0x48] sm:$0xff] }
 0x64c   : > { %v3646_v30 = vpop.f32.mrb[8].mxu1 }
 0x64d   : > { %v4311_v19 = vadd.f32 %v3646_v30, %v3541_v63  ;;  %v3648_v8 = vpop.f32.mrb[9].mxu1 }
 0x64e   : > { %v4313_v57 = vadd.f32 %v3648_v8, %v3543_v27  ;;  %v3650_v21 = vpop.f32.mrb[10].mxu1 }
 0x64f   : > { %v3677_v23 = vmul.f32 %v4311_v19, %v3670_v54  ;;  %v4315_v25 = vadd.f32 %v3650_v21, %v3545_v31  ;;  %v3652_v7 = vpop.f32.mrb[11].mxu1 }
 0x650   : > { %v3678_v24 = vmul.f32 %v4313_v57, %v3674_v37  ;;  %v4317_v55 = vadd.f32 %v3652_v7, %v3547_v41 }
 0x651   : > { %v3695_v16 = vrot.slane %v3677_v23, 5  ;;  %v3679_v12 = vmul.f32 %v4315_v25, %v3670_v54 }
 0x652   : > { %v3696_v22 = vrot.slane %v3678_v24, 5  ;;  %v3680_v10 = vmul.f32 %v4317_v55, %v3674_v37 }
 0x653   : > { %v3707_v62 = vadd.f32 %v3695_v16, %v3685_v13  ;;  %v3697_v43 = vrot.slane %v3679_v12, 5 }
 0x654   : > { %v3708_v6 = vadd.f32 %v3696_v22, %v3686_v61  ;;  %v3699_v60 = vrot.slane %v3680_v10, 5  ;;  %v3656_v17 = vpop.f32.mrb[12].mxu1 }
 0x655   : > { %3713 = vst [vmem:[#allocation2] sm:$0xf8] %v3707_v62  ;;  %v3698_v20 = vsel %vm1917_vm9, %v3695_v16, %v3697_v43  ;;  %v3711_v44 = vadd.f32 %v3697_v43, %v3689_v42  ;;  %v4319_v45 = vadd.f32 %v3656_v17, %v3551_v56  ;;  %v3658_v28 = vpop.f32.mrb[13].mxu1 }
 0x656   : > { %3715 = vst.msk [vmem:[#allocation2 + $0x8] sm:$0xf8] %vm3714_vm12, %v3708_v6  ;;  %v3709_v3 = vadd.f32 %v3698_v20, %v3687_v33  ;;  %v3700_v35 = vsel %vm1917_vm9, %v3696_v22, %v3699_v60  ;;  %v3712_v2 = vadd.f32 %v3699_v60, %v3690_v58  ;;  %v4321_v46 = vadd.f32 %v3658_v28, %v3553_v49  ;;  %v3660_v47 = vpop.f32.mrb[14].mxu1 }
 0x657   : > { %3718 = vst [vmem:[#allocation2 + $0x20] sm:$0x7] %v3711_v44  ;;  %v3710_v18 = vadd.f32 %v3700_v35, %v3688_v29  ;;  %v3681_v9 = vmul.f32 %v4319_v45, %v3670_v54  ;;  %v4323_v1 = vadd.f32 %v3660_v47, %v3555_v0  ;;  %v3662_v34 = vpop.f32.mrb[15].mxu1 }
 0x658   : > { %3716 = vst [vmem:[#allocation2 + $0x10] sm:$0xff] %v3709_v3  ;;  %3720 = vst.msk [vmem:[#allocation2 + $0x28] sm:$0x7] %vm3719_vm13, %v3712_v2  ;;  %v3682_v36 = vmul.f32 %v4321_v46, %v3674_v37  ;;  %v4325_v51 = vadd.f32 %v3662_v34, %v3557_v53 }
 0x659   : > { %3717 = vst.msk [vmem:[#allocation2 + $0x18] sm:$0xff] %vm2024_vm11, %v3710_v18  ;;  %v3732_v59 = vrot.slane %v3681_v9, 5  ;;  %v3683_v40 = vmul.f32 %v4323_v1, %v3670_v54 }
 0x65a   : > { %v3733_v11 = vrot.slane %v3682_v36, 5  ;;  %v3684_v4 = vmul.f32 %v4325_v51, %v3674_v37 }
 0x65b   : > { %v3744_v14 = vadd.f32 %v3732_v59, %v3722_v50  ;;  %v3734_v26 = vrot.slane %v3683_v40, 5  ;;  %3759 = sbr.rel (%p4248_p5) target bundleno = 1645 (0x66d), region = 84 }
 0x65c   : > { %v3745_v48 = vadd.f32 %v3733_v11, %v3723_v38  ;;  %v3736_v52 = vrot.slane %v3684_v4, 5  ;;  %v3760_v37 = vld [vmem:[#allocation2] sm:$0xf8] (!%p4248_p5) }
 0x65d   : > { %3750 = vst [vmem:[#allocation2 + $0x30] sm:$0xf8] %v3744_v14  ;;  %v3735_v63 = vsel %vm1917_vm9, %v3732_v59, %v3734_v26  ;;  %v3748_v27 = vadd.f32 %v3734_v26, %v3726_v15  ;;  %v3761_v41 = vld [vmem:[#allocation2 + $0x8] sm:$0xf8] (!%p4248_p5)  ;;  %v3772_v57 = vrot.slane (!%p4248_p5), %v3760_v37, 3 }
 0x65e   : > { %3751 = vst.msk [vmem:[#allocation2 + $0x38] sm:$0xf8] %vm3714_vm12, %v3745_v48  ;;  %v3746_v30 = vadd.f32 %v3735_v63, %v3724_v5  ;;  %v3737_v31 = vsel %vm1917_vm9, %v3733_v11, %v3736_v52  ;;  %v3749_v54 = vadd.f32 %v3736_v52, %v3727_v32  ;;  %v3775_v25 = vrot.slane (!%p4248_p5), %v3761_v41, 3  ;;  %v3764_v7 = vld [vmem:[#allocation2 + $0x20] sm:$0x7] (!%p4248_p5) }
 0x65f   : > { %3754 = vst [vmem:[#allocation2 + $0x50] sm:$0x7] %v3748_v27  ;;  %v3747_v19 = vadd.f32 %v3737_v31, %v3725_v39  ;;  %v3762_v8 = vld [vmem:[#allocation2 + $0x10] sm:$0xff] (!%p4248_p5)  ;;  %v3778_v24 = vrot.slane (!%p4248_p5), %v3764_v7, 3  ;;  %v3765_v55 = vld [vmem:[#allocation2 + $0x28] sm:$0x7] (!%p4248_p5) }
 0x660   : > { %3752 = vst [vmem:[#allocation2 + $0x40] sm:$0xff] %v3746_v30  ;;  %3755 = vst.msk [vmem:[#allocation2 + $0x58] sm:$0x7] %vm3719_vm13, %v3749_v54  ;;  %v3773_v21 = vrot.slane (!%p4248_p5), %v3762_v8, 3  ;;  %v3763_v23 = vld [vmem:[#allocation2 + $0x18] sm:$0xff] (!%p4248_p5)  ;;  %v3780_v12 = vrot.slane (!%p4248_p5), %v3765_v55, 3 }
 0x661   : > { %3753 = vst.msk [vmem:[#allocation2 + $0x48] sm:$0xff] %vm2024_vm11, %v3747_v19  ;;  %v3776_v13 = vrot.slane (!%p4248_p5), %v3763_v23, 3 }
 0x662   : > { %v3774_v61 = vsel %vm1779_vm7, %v3772_v57, %v3773_v21  ;;  %v3779_v33 = vsel %vm1779_vm7, %v3773_v21, %v3778_v24 }
 0x663   : > { %3786 = vst [vmem:[#allocation4] sm:$0xff] %v3774_v61  ;;  %v3777_v62 = vsel %vm1779_vm7, %v3775_v25, %v3776_v13  ;;  %3788 = vst [vmem:[#allocation4 + $0x10] sm:$0xff] %v3779_v33  ;;  %v3781_v6 = vsel %vm1779_vm7, %v3776_v13, %v3780_v12 }
 0x664   : > { %v3790_v16 = vld [vmem:[#allocation2 + $0x30] sm:$0xf8]  ;;  %3787 = vst.msk [vmem:[#allocation4 + $0x8] sm:$0xff] %vm2024_vm11, %v3777_v62  ;;  %3789 = vst.msk [vmem:[#allocation4 + $0x18] sm:$0xff] %vm2024_vm11, %v3781_v6 }
 0x665   : > { %v3802_v42 = vrot.slane %v3790_v16, 3  ;;  %v3791_v10 = vld [vmem:[#allocation2 + $0x38] sm:$0xf8] }
 0x666   : > { %v3805_v58 = vrot.slane %v3791_v10, 3  ;;  %v3794_v49 = vld [vmem:[#allocation2 + $0x50] sm:$0x7] }
 0x667   : > { %v3792_v22 = vld [vmem:[#allocation2 + $0x40] sm:$0xff]  ;;  %v3795_v0 = vld [vmem:[#allocation2 + $0x58] sm:$0x7]  ;;  %v3808_v60 = vrot.slane %v3794_v49, 3 }
 0x668   : > { %v3793_v56 = vld [vmem:[#allocation2 + $0x48] sm:$0xff]  ;;  %v3803_v43 = vrot.slane %v3792_v22, 3  ;;  %v3810_v17 = vrot.slane %v3795_v0, 3 }
 0x669   : > { %v3806_v29 = vrot.slane %v3793_v56, 3 }
 0x66a   : > { %v3804_v53 = vsel %vm1779_vm7, %v3802_v42, %v3803_v43  ;;  %v3809_v44 = vsel %vm1779_vm7, %v3803_v43, %v3808_v60 }
 0x66b   : > { %3816 = vst [vmem:[#allocation4 + $0x20] sm:$0xff] %v3804_v53  ;;  %v3807_v20 = vsel %vm1779_vm7, %v3805_v58, %v3806_v29  ;;  %v3811_v45 = vsel %vm1779_vm7, %v3806_v29, %v3810_v17  ;;  %3818 = vst [vmem:[#allocation4 + $0x30] sm:$0xff] %v3809_v44 }
 0x66c   : > { %3817 = vst.msk [vmem:[#allocation4 + $0x28] sm:$0xff] %vm2024_vm11, %v3807_v20  ;;  %3819 = vst.msk [vmem:[#allocation4 + $0x38] sm:$0xff] %vm2024_vm11, %v3811_v45 }
 0x66d PF: > { %p4341_p6 = scmp.eq.s32.totalorder %s4938_s30, 2  ;;  %s4854_s4 = smov [#allocation4]  }
 0x66e   : > { %s3826_s17 = sshll.u32 %s4854_s4, 4  ;;  %s3827_s17 = int_to_ptr.vmem [resolvable:$true] %s3826_s17 }
 0x66f   : > { %s4815_s20 = scalar_lea.vmem %s3827_s17, 1024  ;;  %p4822_p10 = scmp.lt.s32.totalorder %s3827_s17, %s3827_s17 }
 0x670   : > { %p4816_p7 = scmp.ne.s32.totalorder %s3827_s17, %s4815_s20  ;;  %p4823_p11 = scmp.lt.s32.totalorder %s4815_s20, %s4815_s20 }
 0x672   : > { %p4817_p8 = pnand %p4816_p7, %p4341_p6  ;;  %p4824_p12 = por %p4823_p11, %p4822_p10 }
 0x674   : > { %p4818_p9 = pneg %p4817_p8 }
 0x676   : > { %p4825_p13 = pnand %p4824_p12, %p4818_p9 }
 0x678   : > { %4828 = shalt.err (!%p4825_p13)
}
 0x679   : > { %s6409_s19 = sld [smem:[#allocation23_spill]] }
 0x67f   : > { %s4829_s18 = scalar_lea.hbm %s6409_s19, 1024 }
 0x680   : > { %p4830_p0 = scmp.ne.s32.totalorder %s6409_s19, %s4829_s18  ;;  %p4835_p3 = scmp.lt.u32.totalorder %s4829_s18, %s6409_s19 }
 0x682   : > { %p4831_p1 = pnand %p4830_p0, %p4341_p6 }
 0x684   : > { %p4832_p2 = pneg %p4831_p1 }
 0x686   : > { %p4837_p4 = pnand %p4835_p3, %p4832_p2 }
 0x688   : > { %4840 = shalt.err (!%p4837_p4)
}
 0x689   : > { %s4855_s29 = smov 256   ;;  %s4856_s21 = smov 16  }
 0x68a   : > { %4338 = dma.vmem_to_hbm [thread:$0]  (%p4341_p6), %s3827_s17, 1024, %s6409_s19, [#allocation5], %s4855_s29, %s4855_s29, %s4856_s21  }
 0x68b   : > { %4846 = dma.done.wait (%p4341_p6), [#allocation5], 1024  }
 0x68c   : > { %4848 = vsyncadd (%p4341_p6), [#allocation5], 4294966272 }
 0x68d PF: > { %s6410_s23 = sld [smem:[#allocation7_spill]] }
 0x693   : > { %s25_s29 = sadd.s32 1, %s6410_s23  }
 0x694   : > { %p22_p5 = scmp.ge.s32.totalorder %s25_s29, 5  }
 0x696   :  { %24 = sbr.rel (!%p22_p5) target bundleno = 6 (0x6), region = 137 }
 0x69d   :  { %3842 = vsyncpa [#allocation5], 1 }
 0x69e   :  { %3844 = vsyncpa [#allocation5 + $0x1], 1 }

</bundles_post_ra>
